<compile_context>
chip_gen: v6e
topology: v6e:2x2x1
jax: 0.10.0
libtpu: 0.0.40
codegen_flags: <defaults>
</compile_context>

<pallas_src>
import jax
import jax.numpy as jnp
from jax.experimental import pallas as pl
from jax.experimental.pallas import tpu as pltpu


def _conv3x3_gemm_kernel(w_ref, xcol_ref, o_ref):
    """One (batch, row-tile) grid step.

    w_ref:    (C_out, 9*C_in)       weights, tap-major (k = dy*3 + dx, then ci)
    xcol_ref: (9*C_in, tile_h * W)  lane-dense im2col operand for this tile
    o_ref:    (C_out, tile_h, W)    NCHW output block
    """
    # Single K=27 GEMM, weights as LHS -> result already (C_out, tile_h*W); f32 accumulate.
    res = jnp.dot(w_ref[...], xcol_ref[...], preferred_element_type=jnp.float32)
    # VMEM-local relayout to the NCHW block shape; store is lane-dense when W % 128 == 0.
    o_ref[...] = res.reshape(o_ref.shape).astype(o_ref.dtype)


def _vmem_capacity_bytes():
    """Physical VMEM per core; conservative fallback (v7x = 64 MiB) if the query fails."""
    try:
        info = pltpu.get_tpu_info()
        cap = getattr(info, "vmem_capacity_bytes", None)
        if cap:
            return int(cap)
    except Exception:
        pass
    return 64 << 20


def _round_up(v, m):
    return ((v + m - 1) // m) * m


def _step_vmem_bytes(tile_h, W, c_in, c_out, itemsize):
    """Layout-padded per-grid-step working set: double-buffered in/out blocks + f32 temps."""
    k_pad = _round_up(9 * c_in, 8)            # sublane padding of the im2col operand
    co_pad = _round_up(c_out, 8)
    lanes_flat = _round_up(tile_h * W, 128)   # lane padding of the flattened spatial dim
    lanes_w = _round_up(W, 128)
    in_blk = k_pad * lanes_flat * itemsize
    out_blk = co_pad * tile_h * lanes_w * itemsize
    f32_tmp = 2 * co_pad * lanes_flat * 4     # GEMM result + relayout temporary
    return 2 * in_blk + 2 * out_blk + f32_tmp


def _pick_tile_h(H, W, c_in, c_out, itemsize, budget_bytes, batch):
    """Largest 8-aligned divisor of H (or H itself) that fits the VMEM budget."""
    cands = sorted({d for d in range(8, H + 1, 8) if H % d == 0} | {H})
    fitting = [t for t in cands
               if _step_vmem_bytes(t, W, c_in, c_out, itemsize) <= budget_bytes]
    if not fitting:
        fitting = [cands[0]]
    tile_h = fitting[-1]
    # v7x has 2 TensorCores per chip: keep the parallel grid at >= 2 programs when possible.
    if batch * (H // tile_h) < 2:
        smaller = [t for t in fitting if H // t >= 2]
        if smaller:
            tile_h = smaller[-1]
    return tile_h


def overlap_patch_embed(x, weight, *, tile_h=None):
    """3x3, stride-1, pad-1, bias-free conv. x: (B, C_in, H, W); weight: (C_out, C_in, 3, 3)."""
    B, C_in, H, W = x.shape
    C_out, C_in_w, kh, kw = weight.shape
    assert (C_in_w, kh, kw) == (C_in, 3, 3)

    vmem_cap = _vmem_capacity_bytes()
    if tile_h is None or H % tile_h != 0:
        tile_h = _pick_tile_h(H, W, C_in, C_out, x.dtype.itemsize,
                              budget_bytes=int(0.35 * vmem_cap), batch=B)
    n_tiles = H // tile_h
    K = 9 * C_in

    # im2col operand (halo rows folded in), one fused XLA producer pass:
    #   xcol[b, t, k*C_in + c, i*W + j] = x_pad[b, c, t*tile_h + i + dy, j + dx],  k = dy*3+dx
    # Layout (B, n_tiles, 9*C_in, tile_h*W): the kernel block (9*C_in, tile_h*W) is
    # lane-dense, with the contraction dim on sublanes.
    # TODO(synk): for very large images, a manual-DMA halo (memory_space=pl.ANY +
    # pltpu.make_async_copy) would avoid materializing the 9x im2col copy in HBM.
    x_pad = jnp.pad(x, ((0, 0), (0, 0), (1, 1), (1, 1)))              # (B, C_in, H+2, W+2)
    taps = [x_pad[:, :, dy:dy + H, dx:dx + W] for dy in range(3) for dx in range(3)]
    xcol = jnp.stack(taps, axis=1)                                    # (B, 9, C_in, H, W)
    xcol = xcol.reshape(B, K, n_tiles, tile_h, W)
    xcol = jnp.transpose(xcol, (0, 2, 1, 3, 4))                       # (B, n_tiles, K, th, W)
    xcol = xcol.reshape(B, n_tiles, K, tile_h * W)

    # Weights: (C_out, C_in, 3, 3) -> (C_out, 9*C_in), tap-major to match xcol.  Keep the MXU
    # input dtype equal to the activation dtype (bf16 stays bf16); accumulation is f32.
    w2 = jnp.transpose(weight, (0, 2, 3, 1)).reshape(C_out, K).astype(x.dtype)

    out = pl.pallas_call(
        _conv3x3_gemm_kernel,
        out_shape=jax.ShapeDtypeStruct((B, C_out, H, W), x.dtype),    # NCHW, written directly
        grid_spec=pltpu.PrefetchScalarGridSpec(
            num_scalar_prefetch=0,
            grid=(B, n_tiles),
            in_specs=[
                pl.BlockSpec((C_out, K), lambda b, t: (0, 0)),
                pl.BlockSpec((None, None, K, tile_h * W), lambda b, t: (b, t, 0, 0)),
            ],
            out_specs=pl.BlockSpec((None, C_out, tile_h, W), lambda b, t: (b, 0, t, 0)),
        ),
        compiler_params=pltpu.CompilerParams(
            dimension_semantics=("parallel", "parallel"),             # megacore split on v7x
            vmem_limit_bytes=int(0.7 * vmem_cap),                     # per-generation limit
        ),
    )(w2, xcol)
    return out


if __name__ == "__main__":
    key = jax.random.PRNGKey(0)
    kx, kw = jax.random.split(key)

    # Small demo shapes, module defaults in_c=3 / embed_dim=48 / bias=False.
    # W is a multiple of 128 so the kernel's output stores are lane-dense (per the review);
    # the kernel is still correct (just slower) for other widths.
    B, C_in, H, W = 2, 3, 32, 128
    C_out = 48

    x = jax.random.normal(kx, (B, C_in, H, W), dtype=jnp.float32)
    weight = (jax.random.normal(kw, (C_out, C_in, 3, 3), dtype=jnp.float32)
              * (1.0 / (9 * C_in) ** 0.5))

    out = jax.block_until_ready(jax.jit(overlap_patch_embed)(x, weight))

    # Reference: XLA convolution (cross-correlation + zero padding), identical to nn.Conv2d.
    ref = jax.lax.conv_general_dilated(
        x, weight, window_strides=(1, 1), padding=((1, 1), (1, 1)),
        dimension_numbers=("NCHW", "OIHW", "NCHW"))

    assert out.shape == ref.shape == (B, C_out, H, W)
    assert out.dtype == x.dtype
    max_err = float(jnp.max(jnp.abs(out - ref)))
    assert jnp.allclose(out, ref, atol=1e-2, rtol=1e-2), max_err
    print("KERNEL_OK")
</pallas_src>

<mosaic_0001>
module attributes {stable_mosaic.version = 11 : i64} {
  func.func @_conv3x3_gemm_kernel(%arg0: i32, %arg1: i32, %arg2: memref<48x27xf32, #tpu.memory_space<vmem>>, %arg3: memref<1x1x27x4096xf32, #tpu.memory_space<vmem>>, %arg4: memref<1x48x32x128xf32, #tpu.memory_space<vmem>>) attributes {dimension_semantics = [#tpu.dimension_semantics<parallel>, #tpu.dimension_semantics<parallel>], iteration_bounds = array<i64: 2, 1>, scalar_prefetch = 0 : i64, scratch_operands = 0 : i64, tpu.core_type = #tpu.core_type<tc>, window_params = [{pipeline_mode = #tpu.pipeline_mode<synchronous>, transform_indices = @transform_0, window_bounds = array<i64: 48, 27>}, {transform_indices = @transform_1, window_bounds = array<i64: 1, 1, 27, 4096>}, {transform_indices = @transform_2, window_bounds = array<i64: 1, 48, 32, 128>}]} {
    %c0 = arith.constant 0 : index
    %c0_0 = arith.constant 0 : index
    %0 = vector.load %arg2[%c0, %c0_0] : memref<48x27xf32, #tpu.memory_space<vmem>>, vector<48x27xf32>
    %c0_1 = arith.constant 0 : index
    %c0_2 = arith.constant 0 : index
    %c0_3 = arith.constant 0 : index
    %c0_4 = arith.constant 0 : index
    %1 = vector.load %arg3[%c0_1, %c0_2, %c0_3, %c0_4] : memref<1x1x27x4096xf32, #tpu.memory_space<vmem>>, vector<1x1x27x4096xf32>
    %2 = vector.shape_cast %1 : vector<1x1x27x4096xf32> to vector<27x4096xf32>
    %cst = arith.constant dense<0.000000e+00> : vector<48x4096xf32>
    %3 = tpu.matmul %0, %2, %cst {dimension_numbers = #tpu.dot_dimension_numbers<[1], [0], [0], [1], [0, 0, 1, 1], [], []>} : vector<48x27xf32>, vector<27x4096xf32>, vector<48x4096xf32> -> vector<48x4096xf32>
    %4 = vector.shape_cast %3 : vector<48x4096xf32> to vector<48x32x128xf32>
    %c0_5 = arith.constant 0 : index
    %c0_6 = arith.constant 0 : index
    %c0_7 = arith.constant 0 : index
    %c0_8 = arith.constant 0 : index
    %5 = vector.load %arg4[%c0_5, %c0_6, %c0_7, %c0_8] : memref<1x48x32x128xf32, #tpu.memory_space<vmem>>, vector<1x48x32x128xf32>
    %6 = vector.shape_cast %5 : vector<1x48x32x128xf32> to vector<48x32x128xf32>
    %7 = vector.shape_cast %4 : vector<48x32x128xf32> to vector<1x48x32x128xf32>
    tpu.vector_store %arg4[%c0_5, %c0_6, %c0_7, %c0_8], %7 {strides = array<i32>} : memref<1x48x32x128xf32, #tpu.memory_space<vmem>>, vector<1x48x32x128xf32>,
    return
  }
  func.func @transform_0(%arg0: i32, %arg1: i32) -> (i32, i32) {
    %c0_i32 = arith.constant 0 : i32
    %c0_i32_0 = arith.constant 0 : i32
    %c0_i32_1 = arith.constant 0 : i32
    return %c0_i32, %c0_i32_0 : i32, i32
  }
  func.func @transform_1(%arg0: i32, %arg1: i32) -> (i32, i32, i32, i32) {
    %c0_i32 = arith.constant 0 : i32
    %c0_i32_0 = arith.constant 0 : i32
    %c0_i32_1 = arith.constant 0 : i32
    return %arg0, %arg1, %c0_i32, %c0_i32_0 : i32, i32, i32, i32
  }
  func.func @transform_2(%arg0: i32, %arg1: i32) -> (i32, i32, i32, i32) {
    %c0_i32 = arith.constant 0 : i32
    %c0_i32_0 = arith.constant 0 : i32
    %c0_i32_1 = arith.constant 0 : i32
    return %arg0, %c0_i32, %arg1, %c0_i32_0 : i32, i32, i32, i32
  }
}

</mosaic_0001>

<bundles_post_ra>
// kernel: overlap_patch_embed.1
= control target key start
LH: loop header
LB: loop body
LE: loop exit
PB: predicated region body
PF: predicated region fallthrough
CT: control target
= control target key end

     0   :  { %7 = vsyncpa [#allocation3], 0  ;;  %s8017_s0 = inlined_call_operand.vmem [shape: f32[48,27], index: 0, kind: input, shape index: {}]   ;;  %s8018_s1 = inlined_call_operand.vmem [shape: f32[2,1,27,4096], index: 1, kind: input, shape index: {}]   ;;  %s8019_s2 = inlined_call_operand.hbm [shape: f32[2,48,32,128], index: 2, kind: output, shape index: {}]  }
   0x1   :  { %9 = vsyncpa [#allocation3 + $0x1], 0  ;;  %s5878_s9 = smov 0   ;;  %s5880_s10 = smov 0  }
   0x2   :  { %s5882_s11 = smov 0   ;;  %s5884_s12 = smov 0  }
   0x3   :  { %s5886_s13 = smov 0   ;;  %s5888_s14 = smov 0  }
   0x4 LB: > { %s4054_s15 = sadd.s32 4294967295, %s5857_s14   ;;  %s4055_s16 = sadd.s32 4294967294, %s5857_s14   ;;  %s5857_s14 = sphi %s5888_s14, %s15_s14   ;;  %s5853_s13 = sphi %s5886_s13, %s8026_s13   ;;  %s5849_s12 = sphi %s5884_s12, %s8025_s12   ;;  %s5845_s11 = sphi %s5882_s11, %s8024_s11   ;;  %s5841_s10 = sphi %s5880_s10, %s8023_s10   ;;  %s5837_s9 = sphi %s5878_s9, %s8022_s9  }
   0x5   : > { %s27_s17 = sadd.s32 1, %s5853_s13  ;;  %s85_s18 = sadd.s32 1, %s5845_s11 }
   0x6   : > { %p29_p0 = scmp.ge.s32.totalorder %s27_s17, 2  ;;  %p95_p1 = scmp.ne.s32.totalorder %s5845_s11, %s5841_s10 }
   0x7   : > { %p96_p2 = scmp.eq.s32.totalorder %s4054_s15, 1  ;;  %p101_p3 = scmp.ne.s32.totalorder %s5841_s10, %s5837_s9 }
   0x8   : > { %s8028_s17 = smov (%p29_p0, %s27_s17), 0  ;;  %p102_p5 = scmp.eq.s32.totalorder %s4055_s16, 1 }
   0x9   : > { %p5918_p4 = por %p96_p2, %p95_p1  ;;  %s80_s20 = ssub.s32 %s5853_s13, %s8028_s17 }
   0xa   : > { %p4058_p6 = scmp.ge.s32.totalorder %s5857_s14, 1  ;;  %p83_p7 = scmp.eq.s32.totalorder %s80_s20, 0 }
   0xb   : > { %p5925_p8 = por %p102_p5, %p101_p3  ;;  %p135_p9 = scmp.lt.s32.totalorder %s5857_s14, 3 }
   0xc   : > { %s5931_s22 = scalar_select %p83_p7, %s5845_s11, %s85_s18  }
   0xd   : > { %p136_p10 = pnand %p4058_p6, %p135_p9 }
   0xe   : > { %p161_p11 = scmp.lt.s32.totalorder (!%p136_p10), %s5849_s12, 1  ;;  %s158_s20 = sand.u32 (!%p136_p10), 1, %s5841_s10  }
   0xf   : > { %139 = sbr.rel (%p136_p10) target bundleno = 1007 (0x3ef), region = 28  ;;  %s5860_s3 = smov (!%p136_p10), [#allocation2]  }
  0x10   : > { %s5722_s25 = smul.u32 (!%p136_p10), 24576, %s5849_s12  ;;  %s5785_s4 = sshll.u32 (!%p136_p10), %s5860_s3, 4  ;;  %s5786_s4 = int_to_ptr.vmem [resolvable:$false] %s5785_s4 }
  0x11   : > { %s5787_s5 = scalar_lea.vmem (!%p136_p10), %s5786_s4, 49152 }
  0x12   : > { %s7934_s29 = scalar_lea.hbm (!%p136_p10), %s8019_s2, %s5722_s25 }
  0x14   : > { %v5859_v0 = vmov 0.0   ;;  %s162_s23 = scalar_select %p161_p11, %s5849_s12, 1  ;;  %vm324_vm0 = vcmask 1042432   ;;  %v5965_v17 = vld [vmem:[%s8017_s0] sm:$0xff]  ;;  %vm305_vm1 = vcmask 220160   ;;  %v5980_v22 = vld [vmem:[%s8017_s0 + $0x8] sm:$0xff] }
  0x15   : > { %485 = vmatprep.mubr.f32.mxu0 %v5859_v0  ;;  %586 = vmatprep.mubr.f32.mxu1 %v5859_v0  ;;  %v5997_v27 = vld [vmem:[%s8017_s0 + $0x10] sm:$0xff]  ;;  %v6014_v32 = vld [vmem:[%s8017_s0 + $0x18] sm:$0xff]  ;;  %v6029_v37 = vld [vmem:[%s8017_s0 + $0x20] sm:$0xff]  ;;  %s7972_s12 = scalar_lea.sflag [#allocation3], %s158_s20 }
  0x16   : > { %s5720_s24 = sshll.u32 %s162_s23, 10  ;;  %v6042_v40 = vld [vmem:[%s8017_s0 + $0x28] sm:$0xff]  ;;  %s5721_s23 = smul.u32 1536, %s158_s20 }
  0x17   : > { %s5940_s27 = scalar_lea.vmem %s8018_s1, %s5720_s24 }
  0x18   : > { %v274_v1 = vld [vmem:[%s5940_s27 + $0x308] sm:$0x7]  ;;  %v276_v2 = vld [vmem:[%s5940_s27 + $0x318] sm:$0x7]  ;;  %v273_v3 = vld [vmem:[%s5940_s27 + $0x300] sm:$0x7] }
  0x19   : > { %4061 = vmatprep.subr.msk.mxu0 %vm324_vm0, %v274_v1  ;;  %4069 = vmatprep.subr.msk.mxu1 %vm324_vm0, %v276_v2  ;;  %v275_v4 = vld [vmem:[%s5940_s27 + $0x310] sm:$0x7]  ;;  %v242_v5 = vld [vmem:[%s5940_s27 + $0x208] sm:$0xff]  ;;  %v244_v6 = vld [vmem:[%s5940_s27 + $0x218] sm:$0xff]  ;;  %s6421_s24 = scalar_lea.vmem [#allocation2], %s5721_s23 }
  0x1a   : > { %4062 = vmatpush1.msk.msra.mxu0 %vm324_vm0, %v273_v3  ;;  %4070 = vmatpush1.msk.msra.mxu1 %vm324_vm0, %v275_v4  ;;  %v241_v7 = vld [vmem:[%s5940_s27 + $0x200] sm:$0xff]  ;;  %v243_v8 = vld [vmem:[%s5940_s27 + $0x210] sm:$0xff]  ;;  %v210_v9 = vld [vmem:[%s5940_s27 + $0x108] sm:$0xff]  ;;  %s3972_s26 = sshll.u32 %s6421_s24, 4  ;;  %s7936_s26 = int_to_ptr.vmem [resolvable:$true] %s3972_s26 }
  0x1b   : > { %447 = vmatprep.subr.mxu0 %v242_v5  ;;  %548 = vmatprep.subr.mxu1 %v244_v6  ;;  %v212_v10 = vld [vmem:[%s5940_s27 + $0x118] sm:$0xff]  ;;  %v209_v11 = vld [vmem:[%s5940_s27 + $0x100] sm:$0xff]  ;;  %v211_v12 = vld [vmem:[%s5940_s27 + $0x110] sm:$0xff]  ;;  %s5781_s30 = scalar_lea.vmem %s7936_s26, 24576  ;;  %p5788_p1 = scmp.lt.s32.totalorder %s7936_s26, %s5786_s4 }
  0x1c   : > { %448 = vmatpush1.msra.mxu0 %v241_v7  ;;  %549 = vmatpush1.msra.mxu1 %v243_v8  ;;  %v178_v13 = vld [vmem:[%s5940_s27 + $0x8] sm:$0xff]  ;;  %v180_v14 = vld [vmem:[%s5940_s27 + $0x18] sm:$0xff]  ;;  %v177_v15 = vld [vmem:[%s5940_s27] sm:$0xff]  ;;  %p5782_p12 = scmp.ne.s32.totalorder %s7936_s26, %s5781_s30  ;;  %p5789_p2 = scmp.lt.s32.totalorder %s5787_s5, %s5781_s30 }
  0x1d   : > { %449 = vmatprep.subr.mxu0 %v210_v9  ;;  %550 = vmatprep.subr.mxu1 %v212_v10  ;;  %v179_v16 = vld [vmem:[%s5940_s27 + $0x10] sm:$0xff]  ;;  %v278_v18 = vld [vmem:[%s5940_s27 + $0x328] sm:$0x7]  ;;  %v280_v19 = vld [vmem:[%s5940_s27 + $0x338] sm:$0x7] }
  0x1e   : > { %450 = vmatpush1.msra.mxu0 %v209_v11  ;;  %551 = vmatpush1.msra.mxu1 %v211_v12  ;;  %v277_v20 = vld [vmem:[%s5940_s27 + $0x320] sm:$0x7]  ;;  %v279_v21 = vld [vmem:[%s5940_s27 + $0x330] sm:$0x7]  ;;  %v246_v23 = vld [vmem:[%s5940_s27 + $0x228] sm:$0xff]  ;;  %p5783_p13 = pnand %p5782_p12, %p5918_p4  ;;  %p5790_p3 = por %p5789_p2, %p5788_p1 }
  0x1f   : > { %451 = vmatprep.subr.mxu0 %v178_v13  ;;  %552 = vmatprep.subr.mxu1 %v180_v14  ;;  %v248_v24 = vld [vmem:[%s5940_s27 + $0x238] sm:$0xff]  ;;  %v245_v25 = vld [vmem:[%s5940_s27 + $0x220] sm:$0xff]  ;;  %v247_v26 = vld [vmem:[%s5940_s27 + $0x230] sm:$0xff] }
  0x20   : > { %452 = vmatpush1.msra.mxu0 %v177_v15  ;;  %553 = vmatpush1.msra.mxu1 %v179_v16  ;;  %v214_v28 = vld [vmem:[%s5940_s27 + $0x128] sm:$0xff]  ;;  %v216_v29 = vld [vmem:[%s5940_s27 + $0x138] sm:$0xff]  ;;  %v213_v30 = vld [vmem:[%s5940_s27 + $0x120] sm:$0xff]  ;;  %p5784_p0 = pneg %p5783_p13 }
  0x21   : > { %4063 = vmatmul.mubr.msk.f32.vlgmr.msra.gmra.mxu0 %vm305_vm1, %v5965_v17  ;;  %4071 = vmatmul.mubr.msk.f32.vlgmr.msra.gmra.mxu1 %vm305_vm1, %v5965_v17  ;;  %v215_v31 = vld [vmem:[%s5940_s27 + $0x130] sm:$0xff]  ;;  %v182_v33 = vld [vmem:[%s5940_s27 + $0x28] sm:$0xff]  ;;  %v184_v34 = vld [vmem:[%s5940_s27 + $0x38] sm:$0xff] }
  0x22   : > { %4077 = vmatprep.subr.msk.mxu0 %vm324_vm0, %v278_v18  ;;  %4085 = vmatprep.subr.msk.mxu1 %vm324_vm0, %v280_v19  ;;  %v181_v35 = vld [vmem:[%s5940_s27 + $0x20] sm:$0xff]  ;;  %v183_v36 = vld [vmem:[%s5940_s27 + $0x30] sm:$0xff]  ;;  %v282_v38 = vld [vmem:[%s5940_s27 + $0x348] sm:$0x7]  ;;  %p5791_p5 = pnand %p5790_p3, %p5784_p0 }
  0x23   : > { %4078 = vmatpush1.msk.msra.mxu0 %vm324_vm0, %v277_v20  ;;  %4086 = vmatpush1.msk.msra.mxu1 %vm324_vm0, %v279_v21  ;;  %v284_v39 = vld [vmem:[%s5940_s27 + $0x358] sm:$0x7]  ;;  %v281_v41 = vld [vmem:[%s5940_s27 + $0x340] sm:$0x7]  ;;  %v283_v42 = vld [vmem:[%s5940_s27 + $0x350] sm:$0x7] }
  0x24   : > { %491 = vmatprep.mubr.f32.mxu0 %v5859_v0  ;;  %592 = vmatprep.mubr.f32.mxu1 %v5859_v0  ;;  %v250_v43 = vld [vmem:[%s5940_s27 + $0x248] sm:$0xff]  ;;  %v252_v44 = vld [vmem:[%s5940_s27 + $0x258] sm:$0xff]  ;;  %v249_v45 = vld [vmem:[%s5940_s27 + $0x240] sm:$0xff] }
  0x25   : > { %4064 = vmatmul.mubr.msk.f32.gmra.mxu0 %vm305_vm1, %v5980_v22  ;;  %4072 = vmatmul.mubr.msk.f32.gmra.mxu1 %vm305_vm1, %v5980_v22  ;;  %v251_v46 = vld [vmem:[%s5940_s27 + $0x250] sm:$0xff]  ;;  %v218_v47 = vld [vmem:[%s5940_s27 + $0x148] sm:$0xff]  ;;  %v220_v48 = vld [vmem:[%s5940_s27 + $0x158] sm:$0xff] }
  0x26   : > { %649 = vmatprep.subr.mxu0 %v246_v23  ;;  %750 = vmatprep.subr.mxu1 %v248_v24  ;;  %v217_v49 = vld [vmem:[%s5940_s27 + $0x140] sm:$0xff]  ;;  %v219_v50 = vld [vmem:[%s5940_s27 + $0x150] sm:$0xff]  ;;  %v186_v51 = vld [vmem:[%s5940_s27 + $0x48] sm:$0xff] }
  0x27   : > { %497 = vmatprep.mubr.f32.mxu0 %v5859_v0  ;;  %598 = vmatprep.mubr.f32.mxu1 %v5859_v0  ;;  %v188_v52 = vld [vmem:[%s5940_s27 + $0x58] sm:$0xff]  ;;  %v185_v53 = vld [vmem:[%s5940_s27 + $0x40] sm:$0xff]  ;;  %v187_v54 = vld [vmem:[%s5940_s27 + $0x50] sm:$0xff] }
  0x28   : > { %650 = vmatpush1.msra.mxu0 %v245_v25  ;;  %751 = vmatpush1.msra.mxu1 %v247_v26  ;;  %v286_v55 = vld [vmem:[%s5940_s27 + $0x368] sm:$0x7]  ;;  %v288_v56 = vld [vmem:[%s5940_s27 + $0x378] sm:$0x7]  ;;  %v285_v57 = vld [vmem:[%s5940_s27 + $0x360] sm:$0x7] }
  0x29   : > { %4065 = vmatmul.mubr.msk.f32.gmra.mxu0 %vm305_vm1, %v5997_v27  ;;  %4073 = vmatmul.mubr.msk.f32.gmra.mxu1 %vm305_vm1, %v5997_v27  ;;  %v287_v58 = vld [vmem:[%s5940_s27 + $0x370] sm:$0x7]  ;;  %v254_v59 = vld [vmem:[%s5940_s27 + $0x268] sm:$0xff]  ;;  %v256_v60 = vld [vmem:[%s5940_s27 + $0x278] sm:$0xff] }
  0x2a   : > { %503 = vmatprep.mubr.f32.mxu0 %v5859_v0  ;;  %604 = vmatprep.mubr.f32.mxu1 %v5859_v0  ;;  %v253_v61 = vld [vmem:[%s5940_s27 + $0x260] sm:$0xff]  ;;  %v255_v62 = vld [vmem:[%s5940_s27 + $0x270] sm:$0xff]  ;;  %v222_v63 = vld [vmem:[%s5940_s27 + $0x168] sm:$0xff] }
  0x2b   : > { %651 = vmatprep.subr.mxu0 %v214_v28  ;;  %752 = vmatprep.subr.mxu1 %v216_v29  ;;  %v224_v1 = vld [vmem:[%s5940_s27 + $0x178] sm:$0xff]  ;;  %v221_v2 = vld [vmem:[%s5940_s27 + $0x160] sm:$0xff]  ;;  %v223_v3 = vld [vmem:[%s5940_s27 + $0x170] sm:$0xff] }
  0x2c   : > { %652 = vmatpush1.msra.mxu0 %v213_v30  ;;  %753 = vmatpush1.msra.mxu1 %v215_v31  ;;  %v190_v4 = vld [vmem:[%s5940_s27 + $0x68] sm:$0xff]  ;;  %v192_v5 = vld [vmem:[%s5940_s27 + $0x78] sm:$0xff]  ;;  %v189_v6 = vld [vmem:[%s5940_s27 + $0x60] sm:$0xff] }
  0x2d   : > { %4066 = vmatmul.mubr.msk.f32.gmra.mxu0 %vm305_vm1, %v6014_v32  ;;  %4074 = vmatmul.mubr.msk.f32.gmra.mxu1 %vm305_vm1, %v6014_v32  ;;  %v191_v7 = vld [vmem:[%s5940_s27 + $0x70] sm:$0xff]  ;;  %v290_v8 = vld [vmem:[%s5940_s27 + $0x388] sm:$0x7]  ;;  %v292_v9 = vld [vmem:[%s5940_s27 + $0x398] sm:$0x7] }
  0x2e   : > { %509 = vmatprep.mubr.f32.mxu0 %v5859_v0  ;;  %610 = vmatprep.mubr.f32.mxu1 %v5859_v0  ;;  %v289_v10 = vld [vmem:[%s5940_s27 + $0x380] sm:$0x7]  ;;  %v291_v11 = vld [vmem:[%s5940_s27 + $0x390] sm:$0x7]  ;;  %v258_v12 = vld [vmem:[%s5940_s27 + $0x288] sm:$0xff] }
  0x2f   : > { %653 = vmatprep.subr.mxu0 %v182_v33  ;;  %754 = vmatprep.subr.mxu1 %v184_v34  ;;  %v260_v13 = vld [vmem:[%s5940_s27 + $0x298] sm:$0xff]  ;;  %v257_v14 = vld [vmem:[%s5940_s27 + $0x280] sm:$0xff]  ;;  %v259_v15 = vld [vmem:[%s5940_s27 + $0x290] sm:$0xff] }
  0x30   : > { %654 = vmatpush1.msra.mxu0 %v181_v35  ;;  %755 = vmatpush1.msra.mxu1 %v183_v36  ;;  %v226_v16 = vld [vmem:[%s5940_s27 + $0x188] sm:$0xff]  ;;  %v228_v18 = vld [vmem:[%s5940_s27 + $0x198] sm:$0xff]  ;;  %v225_v19 = vld [vmem:[%s5940_s27 + $0x180] sm:$0xff] }
  0x31   : > { %4067 = vmatmul.mubr.msk.f32.gmra.mxu0 %vm305_vm1, %v6029_v37  ;;  %4075 = vmatmul.mubr.msk.f32.gmra.mxu1 %vm305_vm1, %v6029_v37  ;;  %v227_v20 = vld [vmem:[%s5940_s27 + $0x190] sm:$0xff]  ;;  %v194_v21 = vld [vmem:[%s5940_s27 + $0x88] sm:$0xff]  ;;  %v196_v23 = vld [vmem:[%s5940_s27 + $0x98] sm:$0xff] }
  0x32   : > { %515 = vmatprep.mubr.f32.mxu0 %v5859_v0  ;;  %616 = vmatprep.mubr.f32.mxu1 %v5859_v0  ;;  %v193_v24 = vld [vmem:[%s5940_s27 + $0x80] sm:$0xff]  ;;  %v195_v25 = vld [vmem:[%s5940_s27 + $0x90] sm:$0xff]  ;;  %v294_v26 = vld [vmem:[%s5940_s27 + $0x3a8] sm:$0x7] }
  0x33   : > { %4093 = vmatprep.subr.msk.mxu0 %vm324_vm0, %v282_v38  ;;  %4101 = vmatprep.subr.msk.mxu1 %vm324_vm0, %v284_v39  ;;  %v296_v28 = vld [vmem:[%s5940_s27 + $0x3b8] sm:$0x7]  ;;  %v293_v29 = vld [vmem:[%s5940_s27 + $0x3a0] sm:$0x7]  ;;  %v295_v30 = vld [vmem:[%s5940_s27 + $0x3b0] sm:$0x7] }
  0x34   : > { %v262_v31 = vld [vmem:[%s5940_s27 + $0x2a8] sm:$0xff]  ;;  %v264_v33 = vld [vmem:[%s5940_s27 + $0x2b8] sm:$0xff]  ;;  %v261_v34 = vld [vmem:[%s5940_s27 + $0x2a0] sm:$0xff] }
  0x35   : > { %4068 = vmatmul.mubr.msk.f32.gmra.mxu0 %vm305_vm1, %v6042_v40  ;;  %4076 = vmatmul.mubr.msk.f32.gmra.mxu1 %vm305_vm1, %v6042_v40  ;;  %v263_v35 = vld [vmem:[%s5940_s27 + $0x2b0] sm:$0xff]  ;;  %v230_v36 = vld [vmem:[%s5940_s27 + $0x1a8] sm:$0xff]  ;;  %v232_v38 = vld [vmem:[%s5940_s27 + $0x1b8] sm:$0xff] }
  0x36   : > { %687 = vmatprep.mubr.f32.mxu0 %v5859_v0  ;;  %788 = vmatprep.mubr.f32.mxu1 %v5859_v0  ;;  %v229_v39 = vld [vmem:[%s5940_s27 + $0x1a0] sm:$0xff] }
  0x39   : > { %4079 = vmatmul.mubr.msk.f32.vlgmr.msra.gmra.mxu0 %vm305_vm1, %v5965_v17  ;;  %4087 = vmatmul.mubr.msk.f32.vlgmr.msra.gmra.mxu1 %vm305_vm1, %v5965_v17 }
  0x3a   : > { %4094 = vmatpush1.msk.msra.mxu0 %vm324_vm0, %v281_v41  ;;  %4102 = vmatpush1.msk.msra.mxu1 %vm324_vm0, %v283_v42  ;;  %v231_v41 = vld [vmem:[%s5940_s27 + $0x1b0] sm:$0xff]  ;;  %v198_v42 = vld [vmem:[%s5940_s27 + $0xa8] sm:$0xff] }
  0x3b   : > { %693 = vmatprep.mubr.f32.mxu0 %v5859_v0  ;;  %794 = vmatprep.mubr.f32.mxu1 %v5859_v0 }
  0x3c   : > { %851 = vmatprep.subr.mxu0 %v250_v43  ;;  %952 = vmatprep.subr.mxu1 %v252_v44  ;;  %v200_v43 = vld [vmem:[%s5940_s27 + $0xb8] sm:$0xff]  ;;  %v197_v44 = vld [vmem:[%s5940_s27 + $0xa0] sm:$0xff] }
  0x3d   : > { %4080 = vmatmul.mubr.msk.f32.gmra.mxu0 %vm305_vm1, %v5980_v22  ;;  %4088 = vmatmul.mubr.msk.f32.gmra.mxu1 %vm305_vm1, %v5980_v22 }
  0x3e   : > { %699 = vmatprep.mubr.f32.mxu0 %v5859_v0  ;;  %800 = vmatprep.mubr.f32.mxu1 %v5859_v0 }
  0x3f   : > { %852 = vmatpush1.msra.mxu0 %v249_v45  ;;  %953 = vmatpush1.msra.mxu1 %v251_v46  ;;  %v199_v45 = vld [vmem:[%s5940_s27 + $0xb0] sm:$0xff]  ;;  %v298_v46 = vld [vmem:[%s5940_s27 + $0x3c8] sm:$0x7] }
  0x40   : > { %853 = vmatprep.subr.mxu0 %v218_v47  ;;  %954 = vmatprep.subr.mxu1 %v220_v48  ;;  %v300_v47 = vld [vmem:[%s5940_s27 + $0x3d8] sm:$0x7]  ;;  %v297_v48 = vld [vmem:[%s5940_s27 + $0x3c0] sm:$0x7] }
  0x41   : > { %4081 = vmatmul.mubr.msk.f32.gmra.mxu0 %vm305_vm1, %v5997_v27  ;;  %4089 = vmatmul.mubr.msk.f32.gmra.mxu1 %vm305_vm1, %v5997_v27 }
  0x42   : > { %705 = vmatprep.mubr.f32.mxu0 %v5859_v0  ;;  %806 = vmatprep.mubr.f32.mxu1 %v5859_v0 }
  0x43   : > { %854 = vmatpush1.msra.mxu0 %v217_v49  ;;  %955 = vmatpush1.msra.mxu1 %v219_v50  ;;  %v299_v49 = vld [vmem:[%s5940_s27 + $0x3d0] sm:$0x7]  ;;  %v266_v50 = vld [vmem:[%s5940_s27 + $0x2c8] sm:$0xff] }
  0x44   : > { %855 = vmatprep.subr.mxu0 %v186_v51  ;;  %956 = vmatprep.subr.mxu1 %v188_v52  ;;  %v268_v51 = vld [vmem:[%s5940_s27 + $0x2d8] sm:$0xff]  ;;  %v265_v52 = vld [vmem:[%s5940_s27 + $0x2c0] sm:$0xff] }
  0x45   : > { %4082 = vmatmul.mubr.msk.f32.gmra.mxu0 %vm305_vm1, %v6014_v32  ;;  %4090 = vmatmul.mubr.msk.f32.gmra.mxu1 %vm305_vm1, %v6014_v32 }
  0x46   : > { %711 = vmatprep.mubr.f32.mxu0 %v5859_v0  ;;  %812 = vmatprep.mubr.f32.mxu1 %v5859_v0 }
  0x47   : > { %856 = vmatpush1.msra.mxu0 %v185_v53  ;;  %957 = vmatpush1.msra.mxu1 %v187_v54  ;;  %v267_v53 = vld [vmem:[%s5940_s27 + $0x2d0] sm:$0xff]  ;;  %v234_v54 = vld [vmem:[%s5940_s27 + $0x1c8] sm:$0xff] }
  0x48   : > { %4109 = vmatprep.subr.msk.mxu0 %vm324_vm0, %v286_v55  ;;  %4117 = vmatprep.subr.msk.mxu1 %vm324_vm0, %v288_v56  ;;  %v236_v55 = vld [vmem:[%s5940_s27 + $0x1d8] sm:$0xff]  ;;  %v233_v56 = vld [vmem:[%s5940_s27 + $0x1c0] sm:$0xff] }
  0x49   : > { %4083 = vmatmul.mubr.msk.f32.gmra.mxu0 %vm305_vm1, %v6029_v37  ;;  %4091 = vmatmul.mubr.msk.f32.gmra.mxu1 %vm305_vm1, %v6029_v37 }
  0x4a   : > { %717 = vmatprep.mubr.f32.mxu0 %v5859_v0  ;;  %818 = vmatprep.mubr.f32.mxu1 %v5859_v0 }
  0x4d   : > { %4084 = vmatmul.mubr.msk.f32.gmra.mxu0 %vm305_vm1, %v6042_v40  ;;  %4092 = vmatmul.mubr.msk.f32.gmra.mxu1 %vm305_vm1, %v6042_v40 }
  0x4e   : > { %889 = vmatprep.mubr.f32.mxu0 %v5859_v0  ;;  %990 = vmatprep.mubr.f32.mxu1 %v5859_v0 }
  0x51   : > { %4095 = vmatmul.mubr.msk.f32.vlgmr.msra.gmra.mxu0 %vm305_vm1, %v5965_v17  ;;  %4103 = vmatmul.mubr.msk.f32.vlgmr.msra.gmra.mxu1 %vm305_vm1, %v5965_v17 }
  0x52   : > { %4110 = vmatpush1.msk.msra.mxu0 %vm324_vm0, %v285_v57  ;;  %4118 = vmatpush1.msk.msra.mxu1 %vm324_vm0, %v287_v58  ;;  %v235_v57 = vld [vmem:[%s5940_s27 + $0x1d0] sm:$0xff]  ;;  %v202_v58 = vld [vmem:[%s5940_s27 + $0xc8] sm:$0xff] }
  0x53   : > { %895 = vmatprep.mubr.f32.mxu0 %v5859_v0  ;;  %996 = vmatprep.mubr.f32.mxu1 %v5859_v0 }
  0x54   : > { %1053 = vmatprep.subr.mxu0 %v254_v59  ;;  %1154 = vmatprep.subr.mxu1 %v256_v60  ;;  %v204_v59 = vld [vmem:[%s5940_s27 + $0xd8] sm:$0xff]  ;;  %v201_v60 = vld [vmem:[%s5940_s27 + $0xc0] sm:$0xff] }
  0x55   : > { %4096 = vmatmul.mubr.msk.f32.gmra.mxu0 %vm305_vm1, %v5980_v22  ;;  %4104 = vmatmul.mubr.msk.f32.gmra.mxu1 %vm305_vm1, %v5980_v22 }
  0x56   : > { %901 = vmatprep.mubr.f32.mxu0 %v5859_v0  ;;  %1002 = vmatprep.mubr.f32.mxu1 %v5859_v0 }
  0x57   : > { %1054 = vmatpush1.msra.mxu0 %v253_v61  ;;  %1155 = vmatpush1.msra.mxu1 %v255_v62  ;;  %v203_v61 = vld [vmem:[%s5940_s27 + $0xd0] sm:$0xff]  ;;  %v302_v62 = vld [vmem:[%s5940_s27 + $0x3e8] sm:$0x7] }
  0x58   : > { %1055 = vmatprep.subr.mxu0 %v222_v63  ;;  %1156 = vmatprep.subr.mxu1 %v224_v1  ;;  %v304_v63 = vld [vmem:[%s5940_s27 + $0x3f8] sm:$0x7]  ;;  %v301_v1 = vld [vmem:[%s5940_s27 + $0x3e0] sm:$0x7] }
  0x59   : > { %4097 = vmatmul.mubr.msk.f32.gmra.mxu0 %vm305_vm1, %v5997_v27  ;;  %4105 = vmatmul.mubr.msk.f32.gmra.mxu1 %vm305_vm1, %v5997_v27 }
  0x5a   : > { %907 = vmatprep.mubr.f32.mxu0 %v5859_v0  ;;  %1008 = vmatprep.mubr.f32.mxu1 %v5859_v0 }
  0x5b   : > { %1056 = vmatpush1.msra.mxu0 %v221_v2  ;;  %1157 = vmatpush1.msra.mxu1 %v223_v3  ;;  %v303_v2 = vld [vmem:[%s5940_s27 + $0x3f0] sm:$0x7]  ;;  %v270_v3 = vld [vmem:[%s5940_s27 + $0x2e8] sm:$0xff] }
  0x5c   : > { %1057 = vmatprep.subr.mxu0 %v190_v4  ;;  %1158 = vmatprep.subr.mxu1 %v192_v5  ;;  %v272_v4 = vld [vmem:[%s5940_s27 + $0x2f8] sm:$0xff]  ;;  %v269_v5 = vld [vmem:[%s5940_s27 + $0x2e0] sm:$0xff] }
  0x5d   : > { %4098 = vmatmul.mubr.msk.f32.gmra.mxu0 %vm305_vm1, %v6014_v32  ;;  %4106 = vmatmul.mubr.msk.f32.gmra.mxu1 %vm305_vm1, %v6014_v32 }
  0x5e   : > { %913 = vmatprep.mubr.f32.mxu0 %v5859_v0  ;;  %1014 = vmatprep.mubr.f32.mxu1 %v5859_v0 }
  0x5f   : > { %1058 = vmatpush1.msra.mxu0 %v189_v6  ;;  %1159 = vmatpush1.msra.mxu1 %v191_v7  ;;  %v271_v6 = vld [vmem:[%s5940_s27 + $0x2f0] sm:$0xff]  ;;  %v238_v7 = vld [vmem:[%s5940_s27 + $0x1e8] sm:$0xff] }
  0x60   : > { %4125 = vmatprep.subr.msk.mxu0 %vm324_vm0, %v290_v8  ;;  %4133 = vmatprep.subr.msk.mxu1 %vm324_vm0, %v292_v9  ;;  %v240_v8 = vld [vmem:[%s5940_s27 + $0x1f8] sm:$0xff]  ;;  %v237_v9 = vld [vmem:[%s5940_s27 + $0x1e0] sm:$0xff] }
  0x61   : > { %4099 = vmatmul.mubr.msk.f32.gmra.mxu0 %vm305_vm1, %v6029_v37  ;;  %4107 = vmatmul.mubr.msk.f32.gmra.mxu1 %vm305_vm1, %v6029_v37 }
  0x62   : > { %919 = vmatprep.mubr.f32.mxu0 %v5859_v0  ;;  %1020 = vmatprep.mubr.f32.mxu1 %v5859_v0 }
  0x65   : > { %4100 = vmatmul.mubr.msk.f32.gmra.mxu0 %vm305_vm1, %v6042_v40  ;;  %4108 = vmatmul.mubr.msk.f32.gmra.mxu1 %vm305_vm1, %v6042_v40 }
  0x66   : > { %1091 = vmatprep.mubr.f32.mxu0 %v5859_v0  ;;  %1192 = vmatprep.mubr.f32.mxu1 %v5859_v0 }
  0x69   : > { %4111 = vmatmul.mubr.msk.f32.vlgmr.msra.gmra.mxu0 %vm305_vm1, %v5965_v17  ;;  %4119 = vmatmul.mubr.msk.f32.vlgmr.msra.gmra.mxu1 %vm305_vm1, %v5965_v17 }
  0x6a   : > { %4126 = vmatpush1.msk.msra.mxu0 %vm324_vm0, %v289_v10  ;;  %4134 = vmatpush1.msk.msra.mxu1 %vm324_vm0, %v291_v11  ;;  %v239_v10 = vld [vmem:[%s5940_s27 + $0x1f0] sm:$0xff]  ;;  %v206_v11 = vld [vmem:[%s5940_s27 + $0xe8] sm:$0xff] }
  0x6b   : > { %1097 = vmatprep.mubr.f32.mxu0 %v5859_v0  ;;  %1198 = vmatprep.mubr.f32.mxu1 %v5859_v0 }
  0x6c   : > { %1255 = vmatprep.subr.mxu0 %v258_v12  ;;  %1356 = vmatprep.subr.mxu1 %v260_v13  ;;  %v208_v12 = vld [vmem:[%s5940_s27 + $0xf8] sm:$0xff]  ;;  %v205_v13 = vld [vmem:[%s5940_s27 + $0xe0] sm:$0xff] }
  0x6d   : > { %4112 = vmatmul.mubr.msk.f32.gmra.mxu0 %vm305_vm1, %v5980_v22  ;;  %4120 = vmatmul.mubr.msk.f32.gmra.mxu1 %vm305_vm1, %v5980_v22 }
  0x6e   : > { %1103 = vmatprep.mubr.f32.mxu0 %v5859_v0  ;;  %1204 = vmatprep.mubr.f32.mxu1 %v5859_v0 }
  0x6f   : > { %1256 = vmatpush1.msra.mxu0 %v257_v14  ;;  %1357 = vmatpush1.msra.mxu1 %v259_v15  ;;  %v207_v14 = vld [vmem:[%s5940_s27 + $0xf0] sm:$0xff] }
  0x70   : > { %1257 = vmatprep.subr.mxu0 %v226_v16  ;;  %1358 = vmatprep.subr.mxu1 %v228_v18 }
  0x71   : > { %4113 = vmatmul.mubr.msk.f32.gmra.mxu0 %vm305_vm1, %v5997_v27  ;;  %4121 = vmatmul.mubr.msk.f32.gmra.mxu1 %vm305_vm1, %v5997_v27 }
  0x72   : > { %1109 = vmatprep.mubr.f32.mxu0 %v5859_v0  ;;  %1210 = vmatprep.mubr.f32.mxu1 %v5859_v0 }
  0x73   : > { %1258 = vmatpush1.msra.mxu0 %v225_v19  ;;  %1359 = vmatpush1.msra.mxu1 %v227_v20 }
  0x74   : > { %1259 = vmatprep.subr.mxu0 %v194_v21  ;;  %1360 = vmatprep.subr.mxu1 %v196_v23 }
  0x75   : > { %4114 = vmatmul.mubr.msk.f32.gmra.mxu0 %vm305_vm1, %v6014_v32  ;;  %4122 = vmatmul.mubr.msk.f32.gmra.mxu1 %vm305_vm1, %v6014_v32 }
  0x76   : > { %1115 = vmatprep.mubr.f32.mxu0 %v5859_v0  ;;  %1216 = vmatprep.mubr.f32.mxu1 %v5859_v0 }
  0x77   : > { %1260 = vmatpush1.msra.mxu0 %v193_v24  ;;  %1361 = vmatpush1.msra.mxu1 %v195_v25 }
  0x78   : > { %4141 = vmatprep.subr.msk.mxu0 %vm324_vm0, %v294_v26  ;;  %4149 = vmatprep.subr.msk.mxu1 %vm324_vm0, %v296_v28 }
  0x79   : > { %4115 = vmatmul.mubr.msk.f32.gmra.mxu0 %vm305_vm1, %v6029_v37  ;;  %4123 = vmatmul.mubr.msk.f32.gmra.mxu1 %vm305_vm1, %v6029_v37 }
  0x7a   : > { %1121 = vmatprep.mubr.f32.mxu0 %v5859_v0  ;;  %1222 = vmatprep.mubr.f32.mxu1 %v5859_v0 }
  0x7d   : > { %4116 = vmatmul.mubr.msk.f32.gmra.mxu0 %vm305_vm1, %v6042_v40  ;;  %4124 = vmatmul.mubr.msk.f32.gmra.mxu1 %vm305_vm1, %v6042_v40 }
  0x7e   : > { %1293 = vmatprep.mubr.f32.mxu0 %v5859_v0  ;;  %1394 = vmatprep.mubr.f32.mxu1 %v5859_v0 }
  0x81   : > { %4127 = vmatmul.mubr.msk.f32.vlgmr.msra.gmra.mxu0 %vm305_vm1, %v5965_v17  ;;  %4135 = vmatmul.mubr.msk.f32.vlgmr.msra.gmra.mxu1 %vm305_vm1, %v5965_v17 }
  0x82   : > { %4142 = vmatpush1.msk.msra.mxu0 %vm324_vm0, %v293_v29  ;;  %4150 = vmatpush1.msk.msra.mxu1 %vm324_vm0, %v295_v30 }
  0x83   : > { %1299 = vmatprep.mubr.f32.mxu0 %v5859_v0  ;;  %1400 = vmatprep.mubr.f32.mxu1 %v5859_v0 }
  0x84   : > { %1457 = vmatprep.subr.mxu0 %v262_v31  ;;  %1558 = vmatprep.subr.mxu1 %v264_v33 }
  0x85   : > { %4128 = vmatmul.mubr.msk.f32.gmra.mxu0 %vm305_vm1, %v5980_v22  ;;  %4136 = vmatmul.mubr.msk.f32.gmra.mxu1 %vm305_vm1, %v5980_v22 }
  0x86   : > { %1305 = vmatprep.mubr.f32.mxu0 %v5859_v0  ;;  %1406 = vmatprep.mubr.f32.mxu1 %v5859_v0 }
  0x87   : > { %1458 = vmatpush1.msra.mxu0 %v261_v34  ;;  %1559 = vmatpush1.msra.mxu1 %v263_v35 }
  0x88   : > { %1459 = vmatprep.subr.mxu0 %v230_v36  ;;  %1560 = vmatprep.subr.mxu1 %v232_v38 }
  0x89   : > { %4129 = vmatmul.mubr.msk.f32.gmra.mxu0 %vm305_vm1, %v5997_v27  ;;  %4137 = vmatmul.mubr.msk.f32.gmra.mxu1 %vm305_vm1, %v5997_v27 }
  0x8a   : > { %1311 = vmatprep.mubr.f32.mxu0 %v5859_v0  ;;  %1412 = vmatprep.mubr.f32.mxu1 %v5859_v0 }
  0x8b   : > { %1460 = vmatpush1.msra.mxu0 %v229_v39  ;;  %1561 = vmatpush1.msra.mxu1 %v231_v41 }
  0x8c   : > { %1461 = vmatprep.subr.mxu0 %v198_v42  ;;  %1562 = vmatprep.subr.mxu1 %v200_v43 }
  0x8d   : > { %4130 = vmatmul.mubr.msk.f32.gmra.mxu0 %vm305_vm1, %v6014_v32  ;;  %4138 = vmatmul.mubr.msk.f32.gmra.mxu1 %vm305_vm1, %v6014_v32 }
  0x8e   : > { %1317 = vmatprep.mubr.f32.mxu0 %v5859_v0  ;;  %1418 = vmatprep.mubr.f32.mxu1 %v5859_v0 }
  0x8f   : > { %1462 = vmatpush1.msra.mxu0 %v197_v44  ;;  %1563 = vmatpush1.msra.mxu1 %v199_v45 }
  0x90   : > { %4157 = vmatprep.subr.msk.mxu0 %vm324_vm0, %v298_v46  ;;  %4165 = vmatprep.subr.msk.mxu1 %vm324_vm0, %v300_v47 }
  0x91   : > { %4131 = vmatmul.mubr.msk.f32.gmra.mxu0 %vm305_vm1, %v6029_v37  ;;  %4139 = vmatmul.mubr.msk.f32.gmra.mxu1 %vm305_vm1, %v6029_v37 }
  0x92   : > { %1323 = vmatprep.mubr.f32.mxu0 %v5859_v0  ;;  %1424 = vmatprep.mubr.f32.mxu1 %v5859_v0 }
  0x95   : > { %4132 = vmatmul.mubr.msk.f32.gmra.mxu0 %vm305_vm1, %v6042_v40  ;;  %4140 = vmatmul.mubr.msk.f32.gmra.mxu1 %vm305_vm1, %v6042_v40 }
  0x96   : > { %1495 = vmatprep.mubr.f32.mxu0 %v5859_v0  ;;  %1596 = vmatprep.mubr.f32.mxu1 %v5859_v0 }
  0x99   : > { %4143 = vmatmul.mubr.msk.f32.vlgmr.msra.gmra.mxu0 %vm305_vm1, %v5965_v17  ;;  %4151 = vmatmul.mubr.msk.f32.vlgmr.msra.gmra.mxu1 %vm305_vm1, %v5965_v17 }
  0x9a   : > { %4158 = vmatpush1.msk.msra.mxu0 %vm324_vm0, %v297_v48  ;;  %4166 = vmatpush1.msk.msra.mxu1 %vm324_vm0, %v299_v49 }
  0x9b   : > { %1501 = vmatprep.mubr.f32.mxu0 %v5859_v0  ;;  %1602 = vmatprep.mubr.f32.mxu1 %v5859_v0 }
  0x9c   : > { %1659 = vmatprep.subr.mxu0 %v266_v50  ;;  %1760 = vmatprep.subr.mxu1 %v268_v51 }
  0x9d   : > { %4144 = vmatmul.mubr.msk.f32.gmra.mxu0 %vm305_vm1, %v5980_v22  ;;  %4152 = vmatmul.mubr.msk.f32.gmra.mxu1 %vm305_vm1, %v5980_v22 }
  0x9e   : > { %1507 = vmatprep.mubr.f32.mxu0 %v5859_v0  ;;  %1608 = vmatprep.mubr.f32.mxu1 %v5859_v0 }
  0x9f   : > { %1660 = vmatpush1.msra.mxu0 %v265_v52  ;;  %1761 = vmatpush1.msra.mxu1 %v267_v53 }
  0xa0   : > { %1661 = vmatprep.subr.mxu0 %v234_v54  ;;  %1762 = vmatprep.subr.mxu1 %v236_v55 }
  0xa1   : > { %4145 = vmatmul.mubr.msk.f32.gmra.mxu0 %vm305_vm1, %v5997_v27  ;;  %4153 = vmatmul.mubr.msk.f32.gmra.mxu1 %vm305_vm1, %v5997_v27 }
  0xa2   : > { %1513 = vmatprep.mubr.f32.mxu0 %v5859_v0  ;;  %1614 = vmatprep.mubr.f32.mxu1 %v5859_v0 }
  0xa3   : > { %1662 = vmatpush1.msra.mxu0 %v233_v56  ;;  %1763 = vmatpush1.msra.mxu1 %v235_v57 }
  0xa4   : > { %1663 = vmatprep.subr.mxu0 %v202_v58  ;;  %1764 = vmatprep.subr.mxu1 %v204_v59 }
  0xa5   : > { %4146 = vmatmul.mubr.msk.f32.gmra.mxu0 %vm305_vm1, %v6014_v32  ;;  %4154 = vmatmul.mubr.msk.f32.gmra.mxu1 %vm305_vm1, %v6014_v32 }
  0xa6   : > { %1519 = vmatprep.mubr.f32.mxu0 %v5859_v0  ;;  %1620 = vmatprep.mubr.f32.mxu1 %v5859_v0 }
  0xa7   : > { %1664 = vmatpush1.msra.mxu0 %v201_v60  ;;  %1765 = vmatpush1.msra.mxu1 %v203_v61 }
  0xa8   : > { %4173 = vmatprep.subr.msk.mxu0 %vm324_vm0, %v302_v62  ;;  %4181 = vmatprep.subr.msk.mxu1 %vm324_vm0, %v304_v63 }
  0xa9   : > { %4147 = vmatmul.mubr.msk.f32.gmra.mxu0 %vm305_vm1, %v6029_v37  ;;  %4155 = vmatmul.mubr.msk.f32.gmra.mxu1 %vm305_vm1, %v6029_v37 }
  0xaa   : > { %1525 = vmatprep.mubr.f32.mxu0 %v5859_v0  ;;  %1626 = vmatprep.mubr.f32.mxu1 %v5859_v0 }
  0xad   : > { %4148 = vmatmul.mubr.msk.f32.gmra.mxu0 %vm305_vm1, %v6042_v40  ;;  %4156 = vmatmul.mubr.msk.f32.gmra.mxu1 %vm305_vm1, %v6042_v40 }
  0xae   : > { %1697 = vmatprep.mubr.f32.mxu0 %v5859_v0  ;;  %1798 = vmatprep.mubr.f32.mxu1 %v5859_v0 }
  0xb1   : > { %4159 = vmatmul.mubr.msk.f32.vlgmr.msra.gmra.mxu0 %vm305_vm1, %v5965_v17  ;;  %4167 = vmatmul.mubr.msk.f32.vlgmr.msra.gmra.mxu1 %vm305_vm1, %v5965_v17 }
  0xb2   : > { %4174 = vmatpush1.msk.msra.mxu0 %vm324_vm0, %v301_v1  ;;  %4182 = vmatpush1.msk.msra.mxu1 %vm324_vm0, %v303_v2 }
  0xb3   : > { %1703 = vmatprep.mubr.f32.mxu0 %v5859_v0  ;;  %1804 = vmatprep.mubr.f32.mxu1 %v5859_v0 }
  0xb4   : > { %1861 = vmatprep.subr.mxu0 %v270_v3  ;;  %1962 = vmatprep.subr.mxu1 %v272_v4 }
  0xb5   : > { %4160 = vmatmul.mubr.msk.f32.gmra.mxu0 %vm305_vm1, %v5980_v22  ;;  %4168 = vmatmul.mubr.msk.f32.gmra.mxu1 %vm305_vm1, %v5980_v22 }
  0xb6   : > { %1709 = vmatprep.mubr.f32.mxu0 %v5859_v0  ;;  %1810 = vmatprep.mubr.f32.mxu1 %v5859_v0 }
  0xb7   : > { %1862 = vmatpush1.msra.mxu0 %v269_v5  ;;  %1963 = vmatpush1.msra.mxu1 %v271_v6 }
  0xb8   : > { %1863 = vmatprep.subr.mxu0 %v238_v7  ;;  %1964 = vmatprep.subr.mxu1 %v240_v8 }
  0xb9   : > { %4161 = vmatmul.mubr.msk.f32.gmra.mxu0 %vm305_vm1, %v5997_v27  ;;  %4169 = vmatmul.mubr.msk.f32.gmra.mxu1 %vm305_vm1, %v5997_v27 }
  0xba   : > { %1715 = vmatprep.mubr.f32.mxu0 %v5859_v0  ;;  %1816 = vmatprep.mubr.f32.mxu1 %v5859_v0 }
  0xbb   : > { %1864 = vmatpush1.msra.mxu0 %v237_v9  ;;  %1965 = vmatpush1.msra.mxu1 %v239_v10 }
  0xbc   : > { %1865 = vmatprep.subr.mxu0 %v206_v11  ;;  %1966 = vmatprep.subr.mxu1 %v208_v12 }
  0xbd   : > { %4162 = vmatmul.mubr.msk.f32.gmra.mxu0 %vm305_vm1, %v6014_v32  ;;  %4170 = vmatmul.mubr.msk.f32.gmra.mxu1 %vm305_vm1, %v6014_v32 }
  0xbe   : > { %1721 = vmatprep.mubr.f32.mxu0 %v5859_v0  ;;  %1822 = vmatprep.mubr.f32.mxu1 %v5859_v0 }
  0xbf   : > { %1866 = vmatpush1.msra.mxu0 %v205_v13  ;;  %1967 = vmatpush1.msra.mxu1 %v207_v14 }
  0xc1   : > { %4163 = vmatmul.mubr.msk.f32.gmra.mxu0 %vm305_vm1, %v6029_v37  ;;  %4171 = vmatmul.mubr.msk.f32.gmra.mxu1 %vm305_vm1, %v6029_v37 }
  0xc2   : > { %1727 = vmatprep.mubr.f32.mxu0 %v5859_v0  ;;  %1828 = vmatprep.mubr.f32.mxu1 %v5859_v0 }
  0xc5   : > { %4164 = vmatmul.mubr.msk.f32.gmra.mxu0 %vm305_vm1, %v6042_v40  ;;  %4172 = vmatmul.mubr.msk.f32.gmra.mxu1 %vm305_vm1, %v6042_v40 }
  0xc6   : > { %1899 = vmatprep.mubr.f32.mxu0 %v5859_v0  ;;  %2000 = vmatprep.mubr.f32.mxu1 %v5859_v0 }
  0xc9   : > { %4175 = vmatmul.mubr.msk.f32.vlgmr.msra.gmra.mxu0 %vm305_vm1, %v5965_v17  ;;  %4183 = vmatmul.mubr.msk.f32.vlgmr.msra.gmra.mxu1 %vm305_vm1, %v5965_v17 }
  0xca   : > { %1905 = vmatprep.mubr.f32.mxu0 %v5859_v0  ;;  %2006 = vmatprep.mubr.f32.mxu1 %v5859_v0 }
  0xcd   : > { %4176 = vmatmul.mubr.msk.f32.gmra.mxu0 %vm305_vm1, %v5980_v22  ;;  %4184 = vmatmul.mubr.msk.f32.gmra.mxu1 %vm305_vm1, %v5980_v22 }
  0xce   : > { %1911 = vmatprep.mubr.f32.mxu0 %v5859_v0  ;;  %2012 = vmatprep.mubr.f32.mxu1 %v5859_v0 }
  0xd1   : > { %4177 = vmatmul.mubr.msk.f32.gmra.mxu0 %vm305_vm1, %v5997_v27  ;;  %4185 = vmatmul.mubr.msk.f32.gmra.mxu1 %vm305_vm1, %v5997_v27 }
  0xd2   : > { %1917 = vmatprep.mubr.f32.mxu0 %v5859_v0  ;;  %2018 = vmatprep.mubr.f32.mxu1 %v5859_v0 }
  0xd5   : > { %4178 = vmatmul.mubr.msk.f32.gmra.mxu0 %vm305_vm1, %v6014_v32  ;;  %4186 = vmatmul.mubr.msk.f32.gmra.mxu1 %vm305_vm1, %v6014_v32 }
  0xd6   : > { %1923 = vmatprep.mubr.f32.mxu0 %v5859_v0  ;;  %2024 = vmatprep.mubr.f32.mxu1 %v5859_v0 }
  0xd9   : > { %4179 = vmatmul.mubr.msk.f32.gmra.mxu0 %vm305_vm1, %v6029_v37  ;;  %4187 = vmatmul.mubr.msk.f32.gmra.mxu1 %vm305_vm1, %v6029_v37 }
  0xda   : > { %1929 = vmatprep.mubr.f32.mxu0 %v5859_v0  ;;  %2030 = vmatprep.mubr.f32.mxu1 %v5859_v0 }
  0xdd   : > { %4180 = vmatmul.mubr.msk.f32.gmra.mxu0 %vm305_vm1, %v6042_v40  ;;  %4188 = vmatmul.mubr.msk.f32.gmra.mxu1 %vm305_vm1, %v6042_v40 }
  0xe1   : > { %v487_v17 = vpop.f32.mrf.mxu0  ;;  %v588_v22 = vpop.f32.mrf.mxu1 }
  0xe2   : > { %2043 = vst [vmem:[%s6421_s24] ss:$32 sm:$0x1] %v487_v17  ;;  %2044 = vst [vmem:[%s6421_s24] ss:$32 sm:$0x2] %v487_v17 }
  0xe3   : > { %2045 = vst [vmem:[%s6421_s24] ss:$32 sm:$0x4] %v487_v17  ;;  %2046 = vst [vmem:[%s6421_s24] ss:$32 sm:$0x8] %v487_v17  ;;  %v489_v0 = vpop.f32.mrf.mxu0  ;;  %v590_v27 = vpop.f32.mrf.mxu1 }
  0xe4   : > { %2047 = vst [vmem:[%s6421_s24] ss:$32 sm:$0x10] %v487_v17  ;;  %2048 = vst [vmem:[%s6421_s24] ss:$32 sm:$0x20] %v487_v17 }
  0xe5   : > { %2049 = vst [vmem:[%s6421_s24] ss:$32 sm:$0x40] %v487_v17  ;;  %2050 = vst [vmem:[%s6421_s24] ss:$32 sm:$0x80] %v487_v17  ;;  %v493_v32 = vpop.f32.mrf.mxu0  ;;  %v594_v37 = vpop.f32.mrf.mxu1 }
  0xe6   : > { %4277 = vst [vmem:[%s6421_s24 + $0x2] ss:$32 sm:$0x1] %v588_v22  ;;  %4278 = vst [vmem:[%s6421_s24 + $0x2] ss:$32 sm:$0x2] %v588_v22 }
  0xe7   : > { %4279 = vst [vmem:[%s6421_s24 + $0x2] ss:$32 sm:$0x4] %v588_v22  ;;  %4280 = vst [vmem:[%s6421_s24 + $0x2] ss:$32 sm:$0x8] %v588_v22  ;;  %v495_v40 = vpop.f32.mrf.mxu0  ;;  %v596_v15 = vpop.f32.mrf.mxu1 }
  0xe8   : > { %4281 = vst [vmem:[%s6421_s24 + $0x2] ss:$32 sm:$0x10] %v588_v22  ;;  %4282 = vst [vmem:[%s6421_s24 + $0x2] ss:$32 sm:$0x20] %v588_v22 }
  0xe9   : > { %4283 = vst [vmem:[%s6421_s24 + $0x2] ss:$32 sm:$0x40] %v588_v22  ;;  %4284 = vst [vmem:[%s6421_s24 + $0x2] ss:$32 sm:$0x80] %v588_v22  ;;  %v499_v16 = vpop.f32.mrf.mxu0  ;;  %v600_v18 = vpop.f32.mrf.mxu1 }
  0xea   : > { %4229 = vst [vmem:[%s6421_s24 + $0x1] ss:$32 sm:$0x1] %v489_v0  ;;  %4230 = vst [vmem:[%s6421_s24 + $0x1] ss:$32 sm:$0x2] %v489_v0 }
  0xeb   : > { %4231 = vst [vmem:[%s6421_s24 + $0x1] ss:$32 sm:$0x4] %v489_v0  ;;  %4232 = vst [vmem:[%s6421_s24 + $0x1] ss:$32 sm:$0x8] %v489_v0  ;;  %v501_v19 = vpop.f32.mrf.mxu0  ;;  %v602_v20 = vpop.f32.mrf.mxu1 }
  0xec   : > { %4233 = vst [vmem:[%s6421_s24 + $0x1] ss:$32 sm:$0x10] %v489_v0  ;;  %4234 = vst [vmem:[%s6421_s24 + $0x1] ss:$32 sm:$0x20] %v489_v0 }
  0xed   : > { %4235 = vst [vmem:[%s6421_s24 + $0x1] ss:$32 sm:$0x40] %v489_v0  ;;  %4236 = vst [vmem:[%s6421_s24 + $0x1] ss:$32 sm:$0x80] %v489_v0  ;;  %v505_v21 = vpop.f32.mrf.mxu0  ;;  %v606_v23 = vpop.f32.mrf.mxu1 }
  0xee   : > { %4325 = vst [vmem:[%s6421_s24 + $0x3] ss:$32 sm:$0x1] %v590_v27  ;;  %4326 = vst [vmem:[%s6421_s24 + $0x3] ss:$32 sm:$0x2] %v590_v27 }
  0xef   : > { %4327 = vst [vmem:[%s6421_s24 + $0x3] ss:$32 sm:$0x4] %v590_v27  ;;  %4328 = vst [vmem:[%s6421_s24 + $0x3] ss:$32 sm:$0x8] %v590_v27  ;;  %v507_v24 = vpop.f32.mrf.mxu0  ;;  %v608_v25 = vpop.f32.mrf.mxu1 }
  0xf0   : > { %4329 = vst [vmem:[%s6421_s24 + $0x3] ss:$32 sm:$0x10] %v590_v27  ;;  %4330 = vst [vmem:[%s6421_s24 + $0x3] ss:$32 sm:$0x20] %v590_v27 }
  0xf1   : > { %4331 = vst [vmem:[%s6421_s24 + $0x3] ss:$32 sm:$0x40] %v590_v27  ;;  %4332 = vst [vmem:[%s6421_s24 + $0x3] ss:$32 sm:$0x80] %v590_v27  ;;  %v511_v26 = vpop.f32.mrf.mxu0  ;;  %v612_v28 = vpop.f32.mrf.mxu1 }
  0xf2   : > { %4189 = vst [vmem:[%s6421_s24 + $0x100] ss:$32 sm:$0x1] %v493_v32  ;;  %4190 = vst [vmem:[%s6421_s24 + $0x100] ss:$32 sm:$0x2] %v493_v32 }
  0xf3   : > { %4191 = vst [vmem:[%s6421_s24 + $0x100] ss:$32 sm:$0x4] %v493_v32  ;;  %4192 = vst [vmem:[%s6421_s24 + $0x100] ss:$32 sm:$0x8] %v493_v32  ;;  %v513_v29 = vpop.f32.mrf.mxu0  ;;  %v614_v30 = vpop.f32.mrf.mxu1 }
  0xf4   : > { %4193 = vst [vmem:[%s6421_s24 + $0x100] ss:$32 sm:$0x10] %v493_v32  ;;  %4194 = vst [vmem:[%s6421_s24 + $0x100] ss:$32 sm:$0x20] %v493_v32 }
  0xf5   : > { %4195 = vst [vmem:[%s6421_s24 + $0x100] ss:$32 sm:$0x40] %v493_v32  ;;  %4196 = vst [vmem:[%s6421_s24 + $0x100] ss:$32 sm:$0x80] %v493_v32  ;;  %v517_v31 = vpop.f32.mrf.mxu0  ;;  %v618_v33 = vpop.f32.mrf.mxu1 }
  0xf6   : > { %4285 = vst [vmem:[%s6421_s24 + $0x102] ss:$32 sm:$0x1] %v594_v37  ;;  %4286 = vst [vmem:[%s6421_s24 + $0x102] ss:$32 sm:$0x2] %v594_v37 }
  0xf7   : > { %4287 = vst [vmem:[%s6421_s24 + $0x102] ss:$32 sm:$0x4] %v594_v37  ;;  %4288 = vst [vmem:[%s6421_s24 + $0x102] ss:$32 sm:$0x8] %v594_v37  ;;  %v519_v34 = vpop.f32.mrf.mxu0  ;;  %v620_v35 = vpop.f32.mrf.mxu1 }
  0xf8   : > { %4289 = vst [vmem:[%s6421_s24 + $0x102] ss:$32 sm:$0x10] %v594_v37  ;;  %4290 = vst [vmem:[%s6421_s24 + $0x102] ss:$32 sm:$0x20] %v594_v37 }
  0xf9   : > { %4291 = vst [vmem:[%s6421_s24 + $0x102] ss:$32 sm:$0x40] %v594_v37  ;;  %4292 = vst [vmem:[%s6421_s24 + $0x102] ss:$32 sm:$0x80] %v594_v37  ;;  %v689_v36 = vpop.f32.mrf.mxu0  ;;  %v790_v38 = vpop.f32.mrf.mxu1 }
  0xfa   : > { %4237 = vst [vmem:[%s6421_s24 + $0x101] ss:$32 sm:$0x1] %v495_v40  ;;  %4238 = vst [vmem:[%s6421_s24 + $0x101] ss:$32 sm:$0x2] %v495_v40 }
  0xfb   : > { %4239 = vst [vmem:[%s6421_s24 + $0x101] ss:$32 sm:$0x4] %v495_v40  ;;  %4240 = vst [vmem:[%s6421_s24 + $0x101] ss:$32 sm:$0x8] %v495_v40  ;;  %v691_v39 = vpop.f32.mrf.mxu0  ;;  %v792_v41 = vpop.f32.mrf.mxu1 }
  0xfc   : > { %4241 = vst [vmem:[%s6421_s24 + $0x101] ss:$32 sm:$0x10] %v495_v40  ;;  %4242 = vst [vmem:[%s6421_s24 + $0x101] ss:$32 sm:$0x20] %v495_v40 }
  0xfd   : > { %4243 = vst [vmem:[%s6421_s24 + $0x101] ss:$32 sm:$0x40] %v495_v40  ;;  %4244 = vst [vmem:[%s6421_s24 + $0x101] ss:$32 sm:$0x80] %v495_v40  ;;  %v695_v42 = vpop.f32.mrf.mxu0  ;;  %v796_v43 = vpop.f32.mrf.mxu1 }
  0xfe   : > { %4333 = vst [vmem:[%s6421_s24 + $0x103] ss:$32 sm:$0x1] %v596_v15  ;;  %4334 = vst [vmem:[%s6421_s24 + $0x103] ss:$32 sm:$0x2] %v596_v15 }
  0xff   : > { %4335 = vst [vmem:[%s6421_s24 + $0x103] ss:$32 sm:$0x4] %v596_v15  ;;  %4336 = vst [vmem:[%s6421_s24 + $0x103] ss:$32 sm:$0x8] %v596_v15  ;;  %v697_v44 = vpop.f32.mrf.mxu0  ;;  %v798_v45 = vpop.f32.mrf.mxu1 }
 0x100   : > { %4337 = vst [vmem:[%s6421_s24 + $0x103] ss:$32 sm:$0x10] %v596_v15  ;;  %4338 = vst [vmem:[%s6421_s24 + $0x103] ss:$32 sm:$0x20] %v596_v15 }
 0x101   : > { %4339 = vst [vmem:[%s6421_s24 + $0x103] ss:$32 sm:$0x40] %v596_v15  ;;  %4340 = vst [vmem:[%s6421_s24 + $0x103] ss:$32 sm:$0x80] %v596_v15  ;;  %v701_v46 = vpop.f32.mrf.mxu0  ;;  %v802_v47 = vpop.f32.mrf.mxu1 }
 0x102   : > { %4197 = vst [vmem:[%s6421_s24 + $0x200] ss:$32 sm:$0x1] %v499_v16  ;;  %4198 = vst [vmem:[%s6421_s24 + $0x200] ss:$32 sm:$0x2] %v499_v16 }
 0x103   : > { %4199 = vst [vmem:[%s6421_s24 + $0x200] ss:$32 sm:$0x4] %v499_v16  ;;  %4200 = vst [vmem:[%s6421_s24 + $0x200] ss:$32 sm:$0x8] %v499_v16  ;;  %v703_v48 = vpop.f32.mrf.mxu0  ;;  %v804_v49 = vpop.f32.mrf.mxu1 }
 0x104   : > { %4201 = vst [vmem:[%s6421_s24 + $0x200] ss:$32 sm:$0x10] %v499_v16  ;;  %4202 = vst [vmem:[%s6421_s24 + $0x200] ss:$32 sm:$0x20] %v499_v16 }
 0x105   : > { %4203 = vst [vmem:[%s6421_s24 + $0x200] ss:$32 sm:$0x40] %v499_v16  ;;  %4204 = vst [vmem:[%s6421_s24 + $0x200] ss:$32 sm:$0x80] %v499_v16  ;;  %v707_v50 = vpop.f32.mrf.mxu0  ;;  %v808_v51 = vpop.f32.mrf.mxu1 }
 0x106   : > { %4293 = vst [vmem:[%s6421_s24 + $0x202] ss:$32 sm:$0x1] %v600_v18  ;;  %4294 = vst [vmem:[%s6421_s24 + $0x202] ss:$32 sm:$0x2] %v600_v18 }
 0x107   : > { %4295 = vst [vmem:[%s6421_s24 + $0x202] ss:$32 sm:$0x4] %v600_v18  ;;  %4296 = vst [vmem:[%s6421_s24 + $0x202] ss:$32 sm:$0x8] %v600_v18  ;;  %v709_v52 = vpop.f32.mrf.mxu0  ;;  %v810_v53 = vpop.f32.mrf.mxu1 }
 0x108   : > { %4297 = vst [vmem:[%s6421_s24 + $0x202] ss:$32 sm:$0x10] %v600_v18  ;;  %4298 = vst [vmem:[%s6421_s24 + $0x202] ss:$32 sm:$0x20] %v600_v18 }
 0x109   : > { %4299 = vst [vmem:[%s6421_s24 + $0x202] ss:$32 sm:$0x40] %v600_v18  ;;  %4300 = vst [vmem:[%s6421_s24 + $0x202] ss:$32 sm:$0x80] %v600_v18  ;;  %v713_v54 = vpop.f32.mrf.mxu0  ;;  %v814_v55 = vpop.f32.mrf.mxu1 }
 0x10a   : > { %4245 = vst [vmem:[%s6421_s24 + $0x201] ss:$32 sm:$0x1] %v501_v19  ;;  %4246 = vst [vmem:[%s6421_s24 + $0x201] ss:$32 sm:$0x2] %v501_v19 }
 0x10b   : > { %4247 = vst [vmem:[%s6421_s24 + $0x201] ss:$32 sm:$0x4] %v501_v19  ;;  %4248 = vst [vmem:[%s6421_s24 + $0x201] ss:$32 sm:$0x8] %v501_v19  ;;  %v715_v56 = vpop.f32.mrf.mxu0  ;;  %v816_v57 = vpop.f32.mrf.mxu1 }
 0x10c   : > { %4249 = vst [vmem:[%s6421_s24 + $0x201] ss:$32 sm:$0x10] %v501_v19  ;;  %4250 = vst [vmem:[%s6421_s24 + $0x201] ss:$32 sm:$0x20] %v501_v19 }
 0x10d   : > { %4251 = vst [vmem:[%s6421_s24 + $0x201] ss:$32 sm:$0x40] %v501_v19  ;;  %4252 = vst [vmem:[%s6421_s24 + $0x201] ss:$32 sm:$0x80] %v501_v19  ;;  %v719_v58 = vpop.f32.mrf.mxu0  ;;  %v820_v59 = vpop.f32.mrf.mxu1 }
 0x10e   : > { %4341 = vst [vmem:[%s6421_s24 + $0x203] ss:$32 sm:$0x1] %v602_v20  ;;  %4342 = vst [vmem:[%s6421_s24 + $0x203] ss:$32 sm:$0x2] %v602_v20 }
 0x10f   : > { %4343 = vst [vmem:[%s6421_s24 + $0x203] ss:$32 sm:$0x4] %v602_v20  ;;  %4344 = vst [vmem:[%s6421_s24 + $0x203] ss:$32 sm:$0x8] %v602_v20  ;;  %v721_v60 = vpop.f32.mrf.mxu0  ;;  %v822_v61 = vpop.f32.mrf.mxu1 }
 0x110   : > { %4345 = vst [vmem:[%s6421_s24 + $0x203] ss:$32 sm:$0x10] %v602_v20  ;;  %4346 = vst [vmem:[%s6421_s24 + $0x203] ss:$32 sm:$0x20] %v602_v20 }
 0x111   : > { %4347 = vst [vmem:[%s6421_s24 + $0x203] ss:$32 sm:$0x40] %v602_v20  ;;  %4348 = vst [vmem:[%s6421_s24 + $0x203] ss:$32 sm:$0x80] %v602_v20  ;;  %v891_v62 = vpop.f32.mrf.mxu0  ;;  %v992_v63 = vpop.f32.mrf.mxu1 }
 0x112   : > { %4205 = vst [vmem:[%s6421_s24 + $0x300] ss:$32 sm:$0x1] %v505_v21  ;;  %4206 = vst [vmem:[%s6421_s24 + $0x300] ss:$32 sm:$0x2] %v505_v21 }
 0x113   : > { %4207 = vst [vmem:[%s6421_s24 + $0x300] ss:$32 sm:$0x4] %v505_v21  ;;  %4208 = vst [vmem:[%s6421_s24 + $0x300] ss:$32 sm:$0x8] %v505_v21  ;;  %v893_v1 = vpop.f32.mrf.mxu0  ;;  %v994_v2 = vpop.f32.mrf.mxu1 }
 0x114   : > { %4209 = vst [vmem:[%s6421_s24 + $0x300] ss:$32 sm:$0x10] %v505_v21  ;;  %4210 = vst [vmem:[%s6421_s24 + $0x300] ss:$32 sm:$0x20] %v505_v21 }
 0x115   : > { %4211 = vst [vmem:[%s6421_s24 + $0x300] ss:$32 sm:$0x40] %v505_v21  ;;  %4212 = vst [vmem:[%s6421_s24 + $0x300] ss:$32 sm:$0x80] %v505_v21  ;;  %v897_v3 = vpop.f32.mrf.mxu0  ;;  %v998_v4 = vpop.f32.mrf.mxu1 }
 0x116   : > { %4301 = vst [vmem:[%s6421_s24 + $0x302] ss:$32 sm:$0x1] %v606_v23  ;;  %4302 = vst [vmem:[%s6421_s24 + $0x302] ss:$32 sm:$0x2] %v606_v23 }
 0x117   : > { %4303 = vst [vmem:[%s6421_s24 + $0x302] ss:$32 sm:$0x4] %v606_v23  ;;  %4304 = vst [vmem:[%s6421_s24 + $0x302] ss:$32 sm:$0x8] %v606_v23  ;;  %v899_v5 = vpop.f32.mrf.mxu0  ;;  %v1000_v6 = vpop.f32.mrf.mxu1 }
 0x118   : > { %4305 = vst [vmem:[%s6421_s24 + $0x302] ss:$32 sm:$0x10] %v606_v23  ;;  %4306 = vst [vmem:[%s6421_s24 + $0x302] ss:$32 sm:$0x20] %v606_v23 }
 0x119   : > { %4307 = vst [vmem:[%s6421_s24 + $0x302] ss:$32 sm:$0x40] %v606_v23  ;;  %4308 = vst [vmem:[%s6421_s24 + $0x302] ss:$32 sm:$0x80] %v606_v23  ;;  %v903_v7 = vpop.f32.mrf.mxu0  ;;  %v1004_v8 = vpop.f32.mrf.mxu1 }
 0x11a   : > { %4253 = vst [vmem:[%s6421_s24 + $0x301] ss:$32 sm:$0x1] %v507_v24  ;;  %4254 = vst [vmem:[%s6421_s24 + $0x301] ss:$32 sm:$0x2] %v507_v24 }
 0x11b   : > { %4255 = vst [vmem:[%s6421_s24 + $0x301] ss:$32 sm:$0x4] %v507_v24  ;;  %4256 = vst [vmem:[%s6421_s24 + $0x301] ss:$32 sm:$0x8] %v507_v24  ;;  %v905_v9 = vpop.f32.mrf.mxu0  ;;  %v1006_v10 = vpop.f32.mrf.mxu1 }
 0x11c   : > { %4257 = vst [vmem:[%s6421_s24 + $0x301] ss:$32 sm:$0x10] %v507_v24  ;;  %4258 = vst [vmem:[%s6421_s24 + $0x301] ss:$32 sm:$0x20] %v507_v24 }
 0x11d   : > { %4259 = vst [vmem:[%s6421_s24 + $0x301] ss:$32 sm:$0x40] %v507_v24  ;;  %4260 = vst [vmem:[%s6421_s24 + $0x301] ss:$32 sm:$0x80] %v507_v24  ;;  %v909_v11 = vpop.f32.mrf.mxu0  ;;  %v1010_v12 = vpop.f32.mrf.mxu1 }
 0x11e   : > { %4349 = vst [vmem:[%s6421_s24 + $0x303] ss:$32 sm:$0x1] %v608_v25  ;;  %4350 = vst [vmem:[%s6421_s24 + $0x303] ss:$32 sm:$0x2] %v608_v25 }
 0x11f   : > { %4351 = vst [vmem:[%s6421_s24 + $0x303] ss:$32 sm:$0x4] %v608_v25  ;;  %4352 = vst [vmem:[%s6421_s24 + $0x303] ss:$32 sm:$0x8] %v608_v25  ;;  %v911_v13 = vpop.f32.mrf.mxu0  ;;  %v1012_v14 = vpop.f32.mrf.mxu1 }
 0x120   : > { %4353 = vst [vmem:[%s6421_s24 + $0x303] ss:$32 sm:$0x10] %v608_v25  ;;  %4354 = vst [vmem:[%s6421_s24 + $0x303] ss:$32 sm:$0x20] %v608_v25 }
 0x121   : > { %4355 = vst [vmem:[%s6421_s24 + $0x303] ss:$32 sm:$0x40] %v608_v25  ;;  %4356 = vst [vmem:[%s6421_s24 + $0x303] ss:$32 sm:$0x80] %v608_v25  ;;  %v915_v17 = vpop.f32.mrf.mxu0  ;;  %v1016_v22 = vpop.f32.mrf.mxu1 }
 0x122   : > { %4213 = vst [vmem:[%s6421_s24 + $0x400] ss:$32 sm:$0x1] %v511_v26  ;;  %4214 = vst [vmem:[%s6421_s24 + $0x400] ss:$32 sm:$0x2] %v511_v26 }
 0x123   : > { %4215 = vst [vmem:[%s6421_s24 + $0x400] ss:$32 sm:$0x4] %v511_v26  ;;  %4216 = vst [vmem:[%s6421_s24 + $0x400] ss:$32 sm:$0x8] %v511_v26  ;;  %v917_v0 = vpop.f32.mrf.mxu0  ;;  %v1018_v27 = vpop.f32.mrf.mxu1 }
 0x124   : > { %4217 = vst [vmem:[%s6421_s24 + $0x400] ss:$32 sm:$0x10] %v511_v26  ;;  %4218 = vst [vmem:[%s6421_s24 + $0x400] ss:$32 sm:$0x20] %v511_v26 }
 0x125   : > { %4219 = vst [vmem:[%s6421_s24 + $0x400] ss:$32 sm:$0x40] %v511_v26  ;;  %4220 = vst [vmem:[%s6421_s24 + $0x400] ss:$32 sm:$0x80] %v511_v26  ;;  %v921_v32 = vpop.f32.mrf.mxu0  ;;  %v1022_v37 = vpop.f32.mrf.mxu1 }
 0x126   : > { %4309 = vst [vmem:[%s6421_s24 + $0x402] ss:$32 sm:$0x1] %v612_v28  ;;  %4310 = vst [vmem:[%s6421_s24 + $0x402] ss:$32 sm:$0x2] %v612_v28 }
 0x127   : > { %4311 = vst [vmem:[%s6421_s24 + $0x402] ss:$32 sm:$0x4] %v612_v28  ;;  %4312 = vst [vmem:[%s6421_s24 + $0x402] ss:$32 sm:$0x8] %v612_v28  ;;  %v923_v40 = vpop.f32.mrf.mxu0  ;;  %v1024_v15 = vpop.f32.mrf.mxu1 }
 0x128   : > { %4313 = vst [vmem:[%s6421_s24 + $0x402] ss:$32 sm:$0x10] %v612_v28  ;;  %4314 = vst [vmem:[%s6421_s24 + $0x402] ss:$32 sm:$0x20] %v612_v28 }
 0x129   : > { %4315 = vst [vmem:[%s6421_s24 + $0x402] ss:$32 sm:$0x40] %v612_v28  ;;  %4316 = vst [vmem:[%s6421_s24 + $0x402] ss:$32 sm:$0x80] %v612_v28  ;;  %v1093_v16 = vpop.f32.mrf.mxu0  ;;  %v1194_v18 = vpop.f32.mrf.mxu1 }
 0x12a   : > { %4261 = vst [vmem:[%s6421_s24 + $0x401] ss:$32 sm:$0x1] %v513_v29  ;;  %4262 = vst [vmem:[%s6421_s24 + $0x401] ss:$32 sm:$0x2] %v513_v29 }
 0x12b   : > { %4263 = vst [vmem:[%s6421_s24 + $0x401] ss:$32 sm:$0x4] %v513_v29  ;;  %4264 = vst [vmem:[%s6421_s24 + $0x401] ss:$32 sm:$0x8] %v513_v29  ;;  %v1095_v19 = vpop.f32.mrf.mxu0  ;;  %v1196_v20 = vpop.f32.mrf.mxu1 }
 0x12c   : > { %4265 = vst [vmem:[%s6421_s24 + $0x401] ss:$32 sm:$0x10] %v513_v29  ;;  %4266 = vst [vmem:[%s6421_s24 + $0x401] ss:$32 sm:$0x20] %v513_v29 }
 0x12d   : > { %4267 = vst [vmem:[%s6421_s24 + $0x401] ss:$32 sm:$0x40] %v513_v29  ;;  %4268 = vst [vmem:[%s6421_s24 + $0x401] ss:$32 sm:$0x80] %v513_v29  ;;  %v1099_v21 = vpop.f32.mrf.mxu0  ;;  %v1200_v23 = vpop.f32.mrf.mxu1 }
 0x12e   : > { %4357 = vst [vmem:[%s6421_s24 + $0x403] ss:$32 sm:$0x1] %v614_v30  ;;  %4358 = vst [vmem:[%s6421_s24 + $0x403] ss:$32 sm:$0x2] %v614_v30 }
 0x12f   : > { %4359 = vst [vmem:[%s6421_s24 + $0x403] ss:$32 sm:$0x4] %v614_v30  ;;  %4360 = vst [vmem:[%s6421_s24 + $0x403] ss:$32 sm:$0x8] %v614_v30  ;;  %v1101_v24 = vpop.f32.mrf.mxu0  ;;  %v1202_v25 = vpop.f32.mrf.mxu1 }
 0x130   : > { %4361 = vst [vmem:[%s6421_s24 + $0x403] ss:$32 sm:$0x10] %v614_v30  ;;  %4362 = vst [vmem:[%s6421_s24 + $0x403] ss:$32 sm:$0x20] %v614_v30 }
 0x131   : > { %4363 = vst [vmem:[%s6421_s24 + $0x403] ss:$32 sm:$0x40] %v614_v30  ;;  %4364 = vst [vmem:[%s6421_s24 + $0x403] ss:$32 sm:$0x80] %v614_v30  ;;  %v1105_v26 = vpop.f32.mrf.mxu0  ;;  %v1206_v28 = vpop.f32.mrf.mxu1 }
 0x132   : > { %4221 = vst [vmem:[%s6421_s24 + $0x500] ss:$32 sm:$0x1] %v517_v31  ;;  %4222 = vst [vmem:[%s6421_s24 + $0x500] ss:$32 sm:$0x2] %v517_v31 }
 0x133   : > { %4223 = vst [vmem:[%s6421_s24 + $0x500] ss:$32 sm:$0x4] %v517_v31  ;;  %4224 = vst [vmem:[%s6421_s24 + $0x500] ss:$32 sm:$0x8] %v517_v31  ;;  %v1107_v29 = vpop.f32.mrf.mxu0  ;;  %v1208_v30 = vpop.f32.mrf.mxu1 }
 0x134   : > { %4225 = vst [vmem:[%s6421_s24 + $0x500] ss:$32 sm:$0x10] %v517_v31  ;;  %4226 = vst [vmem:[%s6421_s24 + $0x500] ss:$32 sm:$0x20] %v517_v31 }
 0x135   : > { %4227 = vst [vmem:[%s6421_s24 + $0x500] ss:$32 sm:$0x40] %v517_v31  ;;  %4228 = vst [vmem:[%s6421_s24 + $0x500] ss:$32 sm:$0x80] %v517_v31  ;;  %v1111_v31 = vpop.f32.mrf.mxu0 }
 0x136   : > { %4317 = vst [vmem:[%s6421_s24 + $0x502] ss:$32 sm:$0x1] %v618_v33  ;;  %4318 = vst [vmem:[%s6421_s24 + $0x502] ss:$32 sm:$0x2] %v618_v33 }
 0x137   : > { %4319 = vst [vmem:[%s6421_s24 + $0x502] ss:$32 sm:$0x4] %v618_v33  ;;  %4320 = vst [vmem:[%s6421_s24 + $0x502] ss:$32 sm:$0x8] %v618_v33 }
 0x138   : > { %4321 = vst [vmem:[%s6421_s24 + $0x502] ss:$32 sm:$0x10] %v618_v33  ;;  %4322 = vst [vmem:[%s6421_s24 + $0x502] ss:$32 sm:$0x20] %v618_v33 }
 0x139   : > { %4323 = vst [vmem:[%s6421_s24 + $0x502] ss:$32 sm:$0x40] %v618_v33  ;;  %4324 = vst [vmem:[%s6421_s24 + $0x502] ss:$32 sm:$0x80] %v618_v33  ;;  %v1212_v33 = vpop.f32.mrf.mxu1 }
 0x13a   : > { %4269 = vst [vmem:[%s6421_s24 + $0x501] ss:$32 sm:$0x1] %v519_v34  ;;  %4270 = vst [vmem:[%s6421_s24 + $0x501] ss:$32 sm:$0x2] %v519_v34 }
 0x13b   : > { %4271 = vst [vmem:[%s6421_s24 + $0x501] ss:$32 sm:$0x4] %v519_v34  ;;  %4272 = vst [vmem:[%s6421_s24 + $0x501] ss:$32 sm:$0x8] %v519_v34 }
 0x13c   : > { %4273 = vst [vmem:[%s6421_s24 + $0x501] ss:$32 sm:$0x10] %v519_v34  ;;  %4274 = vst [vmem:[%s6421_s24 + $0x501] ss:$32 sm:$0x20] %v519_v34 }
 0x13d   : > { %4275 = vst [vmem:[%s6421_s24 + $0x501] ss:$32 sm:$0x40] %v519_v34  ;;  %4276 = vst [vmem:[%s6421_s24 + $0x501] ss:$32 sm:$0x80] %v519_v34  ;;  %v1113_v34 = vpop.f32.mrf.mxu0 }
 0x13e   : > { %4365 = vst [vmem:[%s6421_s24 + $0x503] ss:$32 sm:$0x1] %v620_v35  ;;  %4366 = vst [vmem:[%s6421_s24 + $0x503] ss:$32 sm:$0x2] %v620_v35 }
 0x13f   : > { %4367 = vst [vmem:[%s6421_s24 + $0x503] ss:$32 sm:$0x4] %v620_v35  ;;  %4368 = vst [vmem:[%s6421_s24 + $0x503] ss:$32 sm:$0x8] %v620_v35 }
 0x140   : > { %4369 = vst [vmem:[%s6421_s24 + $0x503] ss:$32 sm:$0x10] %v620_v35  ;;  %4370 = vst [vmem:[%s6421_s24 + $0x503] ss:$32 sm:$0x20] %v620_v35 }
 0x141   : > { %4371 = vst [vmem:[%s6421_s24 + $0x503] ss:$32 sm:$0x40] %v620_v35  ;;  %4372 = vst [vmem:[%s6421_s24 + $0x503] ss:$32 sm:$0x80] %v620_v35  ;;  %v1214_v35 = vpop.f32.mrf.mxu1 }
 0x142   : > { %4373 = vst [vmem:[%s6421_s24 + $0x4] ss:$32 sm:$0x1] %v689_v36  ;;  %4374 = vst [vmem:[%s6421_s24 + $0x4] ss:$32 sm:$0x2] %v689_v36 }
 0x143   : > { %4375 = vst [vmem:[%s6421_s24 + $0x4] ss:$32 sm:$0x4] %v689_v36  ;;  %4376 = vst [vmem:[%s6421_s24 + $0x4] ss:$32 sm:$0x8] %v689_v36 }
 0x144   : > { %4377 = vst [vmem:[%s6421_s24 + $0x4] ss:$32 sm:$0x10] %v689_v36  ;;  %4378 = vst [vmem:[%s6421_s24 + $0x4] ss:$32 sm:$0x20] %v689_v36 }
 0x145   : > { %4379 = vst [vmem:[%s6421_s24 + $0x4] ss:$32 sm:$0x40] %v689_v36  ;;  %4380 = vst [vmem:[%s6421_s24 + $0x4] ss:$32 sm:$0x80] %v689_v36  ;;  %v1117_v36 = vpop.f32.mrf.mxu0 }
 0x146   : > { %4469 = vst [vmem:[%s6421_s24 + $0x6] ss:$32 sm:$0x1] %v790_v38  ;;  %4470 = vst [vmem:[%s6421_s24 + $0x6] ss:$32 sm:$0x2] %v790_v38 }
 0x147   : > { %4471 = vst [vmem:[%s6421_s24 + $0x6] ss:$32 sm:$0x4] %v790_v38  ;;  %4472 = vst [vmem:[%s6421_s24 + $0x6] ss:$32 sm:$0x8] %v790_v38 }
 0x148   : > { %4473 = vst [vmem:[%s6421_s24 + $0x6] ss:$32 sm:$0x10] %v790_v38  ;;  %4474 = vst [vmem:[%s6421_s24 + $0x6] ss:$32 sm:$0x20] %v790_v38 }
 0x149   : > { %4475 = vst [vmem:[%s6421_s24 + $0x6] ss:$32 sm:$0x40] %v790_v38  ;;  %4476 = vst [vmem:[%s6421_s24 + $0x6] ss:$32 sm:$0x80] %v790_v38  ;;  %v1218_v38 = vpop.f32.mrf.mxu1 }
 0x14a   : > { %4421 = vst [vmem:[%s6421_s24 + $0x5] ss:$32 sm:$0x1] %v691_v39  ;;  %4422 = vst [vmem:[%s6421_s24 + $0x5] ss:$32 sm:$0x2] %v691_v39 }
 0x14b   : > { %4423 = vst [vmem:[%s6421_s24 + $0x5] ss:$32 sm:$0x4] %v691_v39  ;;  %4424 = vst [vmem:[%s6421_s24 + $0x5] ss:$32 sm:$0x8] %v691_v39 }
 0x14c   : > { %4425 = vst [vmem:[%s6421_s24 + $0x5] ss:$32 sm:$0x10] %v691_v39  ;;  %4426 = vst [vmem:[%s6421_s24 + $0x5] ss:$32 sm:$0x20] %v691_v39 }
 0x14d   : > { %4427 = vst [vmem:[%s6421_s24 + $0x5] ss:$32 sm:$0x40] %v691_v39  ;;  %4428 = vst [vmem:[%s6421_s24 + $0x5] ss:$32 sm:$0x80] %v691_v39  ;;  %v1119_v39 = vpop.f32.mrf.mxu0 }
 0x14e   : > { %4517 = vst [vmem:[%s6421_s24 + $0x7] ss:$32 sm:$0x1] %v792_v41  ;;  %4518 = vst [vmem:[%s6421_s24 + $0x7] ss:$32 sm:$0x2] %v792_v41 }
 0x14f   : > { %4519 = vst [vmem:[%s6421_s24 + $0x7] ss:$32 sm:$0x4] %v792_v41  ;;  %4520 = vst [vmem:[%s6421_s24 + $0x7] ss:$32 sm:$0x8] %v792_v41 }
 0x150   : > { %4521 = vst [vmem:[%s6421_s24 + $0x7] ss:$32 sm:$0x10] %v792_v41  ;;  %4522 = vst [vmem:[%s6421_s24 + $0x7] ss:$32 sm:$0x20] %v792_v41 }
 0x151   : > { %4523 = vst [vmem:[%s6421_s24 + $0x7] ss:$32 sm:$0x40] %v792_v41  ;;  %4524 = vst [vmem:[%s6421_s24 + $0x7] ss:$32 sm:$0x80] %v792_v41  ;;  %v1220_v41 = vpop.f32.mrf.mxu1 }
 0x152   : > { %4381 = vst [vmem:[%s6421_s24 + $0x104] ss:$32 sm:$0x1] %v695_v42  ;;  %4382 = vst [vmem:[%s6421_s24 + $0x104] ss:$32 sm:$0x2] %v695_v42 }
 0x153   : > { %4383 = vst [vmem:[%s6421_s24 + $0x104] ss:$32 sm:$0x4] %v695_v42  ;;  %4384 = vst [vmem:[%s6421_s24 + $0x104] ss:$32 sm:$0x8] %v695_v42 }
 0x154   : > { %4385 = vst [vmem:[%s6421_s24 + $0x104] ss:$32 sm:$0x10] %v695_v42  ;;  %4386 = vst [vmem:[%s6421_s24 + $0x104] ss:$32 sm:$0x20] %v695_v42 }
 0x155   : > { %4387 = vst [vmem:[%s6421_s24 + $0x104] ss:$32 sm:$0x40] %v695_v42  ;;  %4388 = vst [vmem:[%s6421_s24 + $0x104] ss:$32 sm:$0x80] %v695_v42  ;;  %v1123_v42 = vpop.f32.mrf.mxu0 }
 0x156   : > { %4477 = vst [vmem:[%s6421_s24 + $0x106] ss:$32 sm:$0x1] %v796_v43  ;;  %4478 = vst [vmem:[%s6421_s24 + $0x106] ss:$32 sm:$0x2] %v796_v43 }
 0x157   : > { %4479 = vst [vmem:[%s6421_s24 + $0x106] ss:$32 sm:$0x4] %v796_v43  ;;  %4480 = vst [vmem:[%s6421_s24 + $0x106] ss:$32 sm:$0x8] %v796_v43 }
 0x158   : > { %4481 = vst [vmem:[%s6421_s24 + $0x106] ss:$32 sm:$0x10] %v796_v43  ;;  %4482 = vst [vmem:[%s6421_s24 + $0x106] ss:$32 sm:$0x20] %v796_v43 }
 0x159   : > { %4483 = vst [vmem:[%s6421_s24 + $0x106] ss:$32 sm:$0x40] %v796_v43  ;;  %4484 = vst [vmem:[%s6421_s24 + $0x106] ss:$32 sm:$0x80] %v796_v43  ;;  %v1224_v43 = vpop.f32.mrf.mxu1 }
 0x15a   : > { %4429 = vst [vmem:[%s6421_s24 + $0x105] ss:$32 sm:$0x1] %v697_v44  ;;  %4430 = vst [vmem:[%s6421_s24 + $0x105] ss:$32 sm:$0x2] %v697_v44 }
 0x15b   : > { %4431 = vst [vmem:[%s6421_s24 + $0x105] ss:$32 sm:$0x4] %v697_v44  ;;  %4432 = vst [vmem:[%s6421_s24 + $0x105] ss:$32 sm:$0x8] %v697_v44 }
 0x15c   : > { %4433 = vst [vmem:[%s6421_s24 + $0x105] ss:$32 sm:$0x10] %v697_v44  ;;  %4434 = vst [vmem:[%s6421_s24 + $0x105] ss:$32 sm:$0x20] %v697_v44 }
 0x15d   : > { %4435 = vst [vmem:[%s6421_s24 + $0x105] ss:$32 sm:$0x40] %v697_v44  ;;  %4436 = vst [vmem:[%s6421_s24 + $0x105] ss:$32 sm:$0x80] %v697_v44  ;;  %v1125_v44 = vpop.f32.mrf.mxu0 }
 0x15e   : > { %4525 = vst [vmem:[%s6421_s24 + $0x107] ss:$32 sm:$0x1] %v798_v45  ;;  %4526 = vst [vmem:[%s6421_s24 + $0x107] ss:$32 sm:$0x2] %v798_v45 }
 0x15f   : > { %4527 = vst [vmem:[%s6421_s24 + $0x107] ss:$32 sm:$0x4] %v798_v45  ;;  %4528 = vst [vmem:[%s6421_s24 + $0x107] ss:$32 sm:$0x8] %v798_v45 }
 0x160   : > { %4529 = vst [vmem:[%s6421_s24 + $0x107] ss:$32 sm:$0x10] %v798_v45  ;;  %4530 = vst [vmem:[%s6421_s24 + $0x107] ss:$32 sm:$0x20] %v798_v45 }
 0x161   : > { %4531 = vst [vmem:[%s6421_s24 + $0x107] ss:$32 sm:$0x40] %v798_v45  ;;  %4532 = vst [vmem:[%s6421_s24 + $0x107] ss:$32 sm:$0x80] %v798_v45  ;;  %v1226_v45 = vpop.f32.mrf.mxu1 }
 0x162   : > { %4389 = vst [vmem:[%s6421_s24 + $0x204] ss:$32 sm:$0x1] %v701_v46  ;;  %4390 = vst [vmem:[%s6421_s24 + $0x204] ss:$32 sm:$0x2] %v701_v46 }
 0x163   : > { %4391 = vst [vmem:[%s6421_s24 + $0x204] ss:$32 sm:$0x4] %v701_v46  ;;  %4392 = vst [vmem:[%s6421_s24 + $0x204] ss:$32 sm:$0x8] %v701_v46 }
 0x164   : > { %4393 = vst [vmem:[%s6421_s24 + $0x204] ss:$32 sm:$0x10] %v701_v46  ;;  %4394 = vst [vmem:[%s6421_s24 + $0x204] ss:$32 sm:$0x20] %v701_v46 }
 0x165   : > { %4395 = vst [vmem:[%s6421_s24 + $0x204] ss:$32 sm:$0x40] %v701_v46  ;;  %4396 = vst [vmem:[%s6421_s24 + $0x204] ss:$32 sm:$0x80] %v701_v46  ;;  %v1295_v46 = vpop.f32.mrf.mxu0 }
 0x166   : > { %4485 = vst [vmem:[%s6421_s24 + $0x206] ss:$32 sm:$0x1] %v802_v47  ;;  %4486 = vst [vmem:[%s6421_s24 + $0x206] ss:$32 sm:$0x2] %v802_v47 }
 0x167   : > { %4487 = vst [vmem:[%s6421_s24 + $0x206] ss:$32 sm:$0x4] %v802_v47  ;;  %4488 = vst [vmem:[%s6421_s24 + $0x206] ss:$32 sm:$0x8] %v802_v47 }
 0x168   : > { %4489 = vst [vmem:[%s6421_s24 + $0x206] ss:$32 sm:$0x10] %v802_v47  ;;  %4490 = vst [vmem:[%s6421_s24 + $0x206] ss:$32 sm:$0x20] %v802_v47 }
 0x169   : > { %4491 = vst [vmem:[%s6421_s24 + $0x206] ss:$32 sm:$0x40] %v802_v47  ;;  %4492 = vst [vmem:[%s6421_s24 + $0x206] ss:$32 sm:$0x80] %v802_v47  ;;  %v1396_v47 = vpop.f32.mrf.mxu1 }
 0x16a   : > { %4437 = vst [vmem:[%s6421_s24 + $0x205] ss:$32 sm:$0x1] %v703_v48  ;;  %4438 = vst [vmem:[%s6421_s24 + $0x205] ss:$32 sm:$0x2] %v703_v48 }
 0x16b   : > { %4439 = vst [vmem:[%s6421_s24 + $0x205] ss:$32 sm:$0x4] %v703_v48  ;;  %4440 = vst [vmem:[%s6421_s24 + $0x205] ss:$32 sm:$0x8] %v703_v48 }
 0x16c   : > { %4441 = vst [vmem:[%s6421_s24 + $0x205] ss:$32 sm:$0x10] %v703_v48  ;;  %4442 = vst [vmem:[%s6421_s24 + $0x205] ss:$32 sm:$0x20] %v703_v48 }
 0x16d   : > { %4443 = vst [vmem:[%s6421_s24 + $0x205] ss:$32 sm:$0x40] %v703_v48  ;;  %4444 = vst [vmem:[%s6421_s24 + $0x205] ss:$32 sm:$0x80] %v703_v48  ;;  %v1297_v48 = vpop.f32.mrf.mxu0 }
 0x16e   : > { %4533 = vst [vmem:[%s6421_s24 + $0x207] ss:$32 sm:$0x1] %v804_v49  ;;  %4534 = vst [vmem:[%s6421_s24 + $0x207] ss:$32 sm:$0x2] %v804_v49 }
 0x16f   : > { %4535 = vst [vmem:[%s6421_s24 + $0x207] ss:$32 sm:$0x4] %v804_v49  ;;  %4536 = vst [vmem:[%s6421_s24 + $0x207] ss:$32 sm:$0x8] %v804_v49 }
 0x170   : > { %4537 = vst [vmem:[%s6421_s24 + $0x207] ss:$32 sm:$0x10] %v804_v49  ;;  %4538 = vst [vmem:[%s6421_s24 + $0x207] ss:$32 sm:$0x20] %v804_v49 }
 0x171   : > { %4539 = vst [vmem:[%s6421_s24 + $0x207] ss:$32 sm:$0x40] %v804_v49  ;;  %4540 = vst [vmem:[%s6421_s24 + $0x207] ss:$32 sm:$0x80] %v804_v49  ;;  %v1398_v49 = vpop.f32.mrf.mxu1 }
 0x172   : > { %4397 = vst [vmem:[%s6421_s24 + $0x304] ss:$32 sm:$0x1] %v707_v50  ;;  %4398 = vst [vmem:[%s6421_s24 + $0x304] ss:$32 sm:$0x2] %v707_v50 }
 0x173   : > { %4399 = vst [vmem:[%s6421_s24 + $0x304] ss:$32 sm:$0x4] %v707_v50  ;;  %4400 = vst [vmem:[%s6421_s24 + $0x304] ss:$32 sm:$0x8] %v707_v50 }
 0x174   : > { %4401 = vst [vmem:[%s6421_s24 + $0x304] ss:$32 sm:$0x10] %v707_v50  ;;  %4402 = vst [vmem:[%s6421_s24 + $0x304] ss:$32 sm:$0x20] %v707_v50 }
 0x175   : > { %4403 = vst [vmem:[%s6421_s24 + $0x304] ss:$32 sm:$0x40] %v707_v50  ;;  %4404 = vst [vmem:[%s6421_s24 + $0x304] ss:$32 sm:$0x80] %v707_v50  ;;  %v1301_v50 = vpop.f32.mrf.mxu0 }
 0x176   : > { %4493 = vst [vmem:[%s6421_s24 + $0x306] ss:$32 sm:$0x1] %v808_v51  ;;  %4494 = vst [vmem:[%s6421_s24 + $0x306] ss:$32 sm:$0x2] %v808_v51 }
 0x177   : > { %4495 = vst [vmem:[%s6421_s24 + $0x306] ss:$32 sm:$0x4] %v808_v51  ;;  %4496 = vst [vmem:[%s6421_s24 + $0x306] ss:$32 sm:$0x8] %v808_v51 }
 0x178   : > { %4497 = vst [vmem:[%s6421_s24 + $0x306] ss:$32 sm:$0x10] %v808_v51  ;;  %4498 = vst [vmem:[%s6421_s24 + $0x306] ss:$32 sm:$0x20] %v808_v51 }
 0x179   : > { %4499 = vst [vmem:[%s6421_s24 + $0x306] ss:$32 sm:$0x40] %v808_v51  ;;  %4500 = vst [vmem:[%s6421_s24 + $0x306] ss:$32 sm:$0x80] %v808_v51  ;;  %v1402_v51 = vpop.f32.mrf.mxu1 }
 0x17a   : > { %4445 = vst [vmem:[%s6421_s24 + $0x305] ss:$32 sm:$0x1] %v709_v52  ;;  %4446 = vst [vmem:[%s6421_s24 + $0x305] ss:$32 sm:$0x2] %v709_v52 }
 0x17b   : > { %4447 = vst [vmem:[%s6421_s24 + $0x305] ss:$32 sm:$0x4] %v709_v52  ;;  %4448 = vst [vmem:[%s6421_s24 + $0x305] ss:$32 sm:$0x8] %v709_v52 }
 0x17c   : > { %4449 = vst [vmem:[%s6421_s24 + $0x305] ss:$32 sm:$0x10] %v709_v52  ;;  %4450 = vst [vmem:[%s6421_s24 + $0x305] ss:$32 sm:$0x20] %v709_v52 }
 0x17d   : > { %4451 = vst [vmem:[%s6421_s24 + $0x305] ss:$32 sm:$0x40] %v709_v52  ;;  %4452 = vst [vmem:[%s6421_s24 + $0x305] ss:$32 sm:$0x80] %v709_v52  ;;  %v1303_v52 = vpop.f32.mrf.mxu0 }
 0x17e   : > { %4541 = vst [vmem:[%s6421_s24 + $0x307] ss:$32 sm:$0x1] %v810_v53  ;;  %4542 = vst [vmem:[%s6421_s24 + $0x307] ss:$32 sm:$0x2] %v810_v53 }
 0x17f   : > { %4543 = vst [vmem:[%s6421_s24 + $0x307] ss:$32 sm:$0x4] %v810_v53  ;;  %4544 = vst [vmem:[%s6421_s24 + $0x307] ss:$32 sm:$0x8] %v810_v53 }
 0x180   : > { %4545 = vst [vmem:[%s6421_s24 + $0x307] ss:$32 sm:$0x10] %v810_v53  ;;  %4546 = vst [vmem:[%s6421_s24 + $0x307] ss:$32 sm:$0x20] %v810_v53 }
 0x181   : > { %4547 = vst [vmem:[%s6421_s24 + $0x307] ss:$32 sm:$0x40] %v810_v53  ;;  %4548 = vst [vmem:[%s6421_s24 + $0x307] ss:$32 sm:$0x80] %v810_v53  ;;  %v1404_v53 = vpop.f32.mrf.mxu1 }
 0x182   : > { %4405 = vst [vmem:[%s6421_s24 + $0x404] ss:$32 sm:$0x1] %v713_v54  ;;  %4406 = vst [vmem:[%s6421_s24 + $0x404] ss:$32 sm:$0x2] %v713_v54 }
 0x183   : > { %4407 = vst [vmem:[%s6421_s24 + $0x404] ss:$32 sm:$0x4] %v713_v54  ;;  %4408 = vst [vmem:[%s6421_s24 + $0x404] ss:$32 sm:$0x8] %v713_v54 }
 0x184   : > { %4409 = vst [vmem:[%s6421_s24 + $0x404] ss:$32 sm:$0x10] %v713_v54  ;;  %4410 = vst [vmem:[%s6421_s24 + $0x404] ss:$32 sm:$0x20] %v713_v54 }
 0x185   : > { %4411 = vst [vmem:[%s6421_s24 + $0x404] ss:$32 sm:$0x40] %v713_v54  ;;  %4412 = vst [vmem:[%s6421_s24 + $0x404] ss:$32 sm:$0x80] %v713_v54  ;;  %v1307_v54 = vpop.f32.mrf.mxu0 }
 0x186   : > { %4501 = vst [vmem:[%s6421_s24 + $0x406] ss:$32 sm:$0x1] %v814_v55  ;;  %4502 = vst [vmem:[%s6421_s24 + $0x406] ss:$32 sm:$0x2] %v814_v55 }
 0x187   : > { %4503 = vst [vmem:[%s6421_s24 + $0x406] ss:$32 sm:$0x4] %v814_v55  ;;  %4504 = vst [vmem:[%s6421_s24 + $0x406] ss:$32 sm:$0x8] %v814_v55 }
 0x188   : > { %4505 = vst [vmem:[%s6421_s24 + $0x406] ss:$32 sm:$0x10] %v814_v55  ;;  %4506 = vst [vmem:[%s6421_s24 + $0x406] ss:$32 sm:$0x20] %v814_v55 }
 0x189   : > { %4507 = vst [vmem:[%s6421_s24 + $0x406] ss:$32 sm:$0x40] %v814_v55  ;;  %4508 = vst [vmem:[%s6421_s24 + $0x406] ss:$32 sm:$0x80] %v814_v55  ;;  %v1408_v55 = vpop.f32.mrf.mxu1 }
 0x18a   : > { %4453 = vst [vmem:[%s6421_s24 + $0x405] ss:$32 sm:$0x1] %v715_v56  ;;  %4454 = vst [vmem:[%s6421_s24 + $0x405] ss:$32 sm:$0x2] %v715_v56 }
 0x18b   : > { %4455 = vst [vmem:[%s6421_s24 + $0x405] ss:$32 sm:$0x4] %v715_v56  ;;  %4456 = vst [vmem:[%s6421_s24 + $0x405] ss:$32 sm:$0x8] %v715_v56 }
 0x18c   : > { %4457 = vst [vmem:[%s6421_s24 + $0x405] ss:$32 sm:$0x10] %v715_v56  ;;  %4458 = vst [vmem:[%s6421_s24 + $0x405] ss:$32 sm:$0x20] %v715_v56 }
 0x18d   : > { %4459 = vst [vmem:[%s6421_s24 + $0x405] ss:$32 sm:$0x40] %v715_v56  ;;  %4460 = vst [vmem:[%s6421_s24 + $0x405] ss:$32 sm:$0x80] %v715_v56  ;;  %v1309_v56 = vpop.f32.mrf.mxu0 }
 0x18e   : > { %4549 = vst [vmem:[%s6421_s24 + $0x407] ss:$32 sm:$0x1] %v816_v57  ;;  %4550 = vst [vmem:[%s6421_s24 + $0x407] ss:$32 sm:$0x2] %v816_v57 }
 0x18f   : > { %4551 = vst [vmem:[%s6421_s24 + $0x407] ss:$32 sm:$0x4] %v816_v57  ;;  %4552 = vst [vmem:[%s6421_s24 + $0x407] ss:$32 sm:$0x8] %v816_v57 }
 0x190   : > { %4553 = vst [vmem:[%s6421_s24 + $0x407] ss:$32 sm:$0x10] %v816_v57  ;;  %4554 = vst [vmem:[%s6421_s24 + $0x407] ss:$32 sm:$0x20] %v816_v57 }
 0x191   : > { %4555 = vst [vmem:[%s6421_s24 + $0x407] ss:$32 sm:$0x40] %v816_v57  ;;  %4556 = vst [vmem:[%s6421_s24 + $0x407] ss:$32 sm:$0x80] %v816_v57  ;;  %v1410_v57 = vpop.f32.mrf.mxu1 }
 0x192   : > { %4413 = vst [vmem:[%s6421_s24 + $0x504] ss:$32 sm:$0x1] %v719_v58  ;;  %4414 = vst [vmem:[%s6421_s24 + $0x504] ss:$32 sm:$0x2] %v719_v58 }
 0x193   : > { %4415 = vst [vmem:[%s6421_s24 + $0x504] ss:$32 sm:$0x4] %v719_v58  ;;  %4416 = vst [vmem:[%s6421_s24 + $0x504] ss:$32 sm:$0x8] %v719_v58 }
 0x194   : > { %4417 = vst [vmem:[%s6421_s24 + $0x504] ss:$32 sm:$0x10] %v719_v58  ;;  %4418 = vst [vmem:[%s6421_s24 + $0x504] ss:$32 sm:$0x20] %v719_v58 }
 0x195   : > { %4419 = vst [vmem:[%s6421_s24 + $0x504] ss:$32 sm:$0x40] %v719_v58  ;;  %4420 = vst [vmem:[%s6421_s24 + $0x504] ss:$32 sm:$0x80] %v719_v58  ;;  %v1313_v58 = vpop.f32.mrf.mxu0 }
 0x196   : > { %4509 = vst [vmem:[%s6421_s24 + $0x506] ss:$32 sm:$0x1] %v820_v59  ;;  %4510 = vst [vmem:[%s6421_s24 + $0x506] ss:$32 sm:$0x2] %v820_v59 }
 0x197   : > { %4511 = vst [vmem:[%s6421_s24 + $0x506] ss:$32 sm:$0x4] %v820_v59  ;;  %4512 = vst [vmem:[%s6421_s24 + $0x506] ss:$32 sm:$0x8] %v820_v59 }
 0x198   : > { %4513 = vst [vmem:[%s6421_s24 + $0x506] ss:$32 sm:$0x10] %v820_v59  ;;  %4514 = vst [vmem:[%s6421_s24 + $0x506] ss:$32 sm:$0x20] %v820_v59 }
 0x199   : > { %4515 = vst [vmem:[%s6421_s24 + $0x506] ss:$32 sm:$0x40] %v820_v59  ;;  %4516 = vst [vmem:[%s6421_s24 + $0x506] ss:$32 sm:$0x80] %v820_v59  ;;  %v1414_v59 = vpop.f32.mrf.mxu1 }
 0x19a   : > { %4461 = vst [vmem:[%s6421_s24 + $0x505] ss:$32 sm:$0x1] %v721_v60  ;;  %4462 = vst [vmem:[%s6421_s24 + $0x505] ss:$32 sm:$0x2] %v721_v60 }
 0x19b   : > { %4463 = vst [vmem:[%s6421_s24 + $0x505] ss:$32 sm:$0x4] %v721_v60  ;;  %4464 = vst [vmem:[%s6421_s24 + $0x505] ss:$32 sm:$0x8] %v721_v60 }
 0x19c   : > { %4465 = vst [vmem:[%s6421_s24 + $0x505] ss:$32 sm:$0x10] %v721_v60  ;;  %4466 = vst [vmem:[%s6421_s24 + $0x505] ss:$32 sm:$0x20] %v721_v60 }
 0x19d   : > { %4467 = vst [vmem:[%s6421_s24 + $0x505] ss:$32 sm:$0x40] %v721_v60  ;;  %4468 = vst [vmem:[%s6421_s24 + $0x505] ss:$32 sm:$0x80] %v721_v60  ;;  %v1315_v60 = vpop.f32.mrf.mxu0 }
 0x19e   : > { %4557 = vst [vmem:[%s6421_s24 + $0x507] ss:$32 sm:$0x1] %v822_v61  ;;  %4558 = vst [vmem:[%s6421_s24 + $0x507] ss:$32 sm:$0x2] %v822_v61 }
 0x19f   : > { %4559 = vst [vmem:[%s6421_s24 + $0x507] ss:$32 sm:$0x4] %v822_v61  ;;  %4560 = vst [vmem:[%s6421_s24 + $0x507] ss:$32 sm:$0x8] %v822_v61 }
 0x1a0   : > { %4561 = vst [vmem:[%s6421_s24 + $0x507] ss:$32 sm:$0x10] %v822_v61  ;;  %4562 = vst [vmem:[%s6421_s24 + $0x507] ss:$32 sm:$0x20] %v822_v61 }
 0x1a1   : > { %4563 = vst [vmem:[%s6421_s24 + $0x507] ss:$32 sm:$0x40] %v822_v61  ;;  %4564 = vst [vmem:[%s6421_s24 + $0x507] ss:$32 sm:$0x80] %v822_v61  ;;  %v1416_v61 = vpop.f32.mrf.mxu1 }
 0x1a2   : > { %4565 = vst [vmem:[%s6421_s24 + $0x8] ss:$32 sm:$0x1] %v891_v62  ;;  %4566 = vst [vmem:[%s6421_s24 + $0x8] ss:$32 sm:$0x2] %v891_v62 }
 0x1a3   : > { %4567 = vst [vmem:[%s6421_s24 + $0x8] ss:$32 sm:$0x4] %v891_v62  ;;  %4568 = vst [vmem:[%s6421_s24 + $0x8] ss:$32 sm:$0x8] %v891_v62 }
 0x1a4   : > { %4569 = vst [vmem:[%s6421_s24 + $0x8] ss:$32 sm:$0x10] %v891_v62  ;;  %4570 = vst [vmem:[%s6421_s24 + $0x8] ss:$32 sm:$0x20] %v891_v62 }
 0x1a5   : > { %4571 = vst [vmem:[%s6421_s24 + $0x8] ss:$32 sm:$0x40] %v891_v62  ;;  %4572 = vst [vmem:[%s6421_s24 + $0x8] ss:$32 sm:$0x80] %v891_v62  ;;  %v1319_v62 = vpop.f32.mrf.mxu0 }
 0x1a6   : > { %4661 = vst [vmem:[%s6421_s24 + $0xa] ss:$32 sm:$0x1] %v992_v63  ;;  %4662 = vst [vmem:[%s6421_s24 + $0xa] ss:$32 sm:$0x2] %v992_v63 }
 0x1a7   : > { %4663 = vst [vmem:[%s6421_s24 + $0xa] ss:$32 sm:$0x4] %v992_v63  ;;  %4664 = vst [vmem:[%s6421_s24 + $0xa] ss:$32 sm:$0x8] %v992_v63 }
 0x1a8   : > { %4665 = vst [vmem:[%s6421_s24 + $0xa] ss:$32 sm:$0x10] %v992_v63  ;;  %4666 = vst [vmem:[%s6421_s24 + $0xa] ss:$32 sm:$0x20] %v992_v63 }
 0x1a9   : > { %4667 = vst [vmem:[%s6421_s24 + $0xa] ss:$32 sm:$0x40] %v992_v63  ;;  %4668 = vst [vmem:[%s6421_s24 + $0xa] ss:$32 sm:$0x80] %v992_v63  ;;  %v1420_v63 = vpop.f32.mrf.mxu1 }
 0x1aa   : > { %4613 = vst [vmem:[%s6421_s24 + $0x9] ss:$32 sm:$0x1] %v893_v1  ;;  %4614 = vst [vmem:[%s6421_s24 + $0x9] ss:$32 sm:$0x2] %v893_v1 }
 0x1ab   : > { %4615 = vst [vmem:[%s6421_s24 + $0x9] ss:$32 sm:$0x4] %v893_v1  ;;  %4616 = vst [vmem:[%s6421_s24 + $0x9] ss:$32 sm:$0x8] %v893_v1 }
 0x1ac   : > { %4617 = vst [vmem:[%s6421_s24 + $0x9] ss:$32 sm:$0x10] %v893_v1  ;;  %4618 = vst [vmem:[%s6421_s24 + $0x9] ss:$32 sm:$0x20] %v893_v1 }
 0x1ad   : > { %4619 = vst [vmem:[%s6421_s24 + $0x9] ss:$32 sm:$0x40] %v893_v1  ;;  %4620 = vst [vmem:[%s6421_s24 + $0x9] ss:$32 sm:$0x80] %v893_v1  ;;  %v1321_v1 = vpop.f32.mrf.mxu0 }
 0x1ae   : > { %4709 = vst [vmem:[%s6421_s24 + $0xb] ss:$32 sm:$0x1] %v994_v2  ;;  %4710 = vst [vmem:[%s6421_s24 + $0xb] ss:$32 sm:$0x2] %v994_v2 }
 0x1af   : > { %4711 = vst [vmem:[%s6421_s24 + $0xb] ss:$32 sm:$0x4] %v994_v2  ;;  %4712 = vst [vmem:[%s6421_s24 + $0xb] ss:$32 sm:$0x8] %v994_v2 }
 0x1b0   : > { %4713 = vst [vmem:[%s6421_s24 + $0xb] ss:$32 sm:$0x10] %v994_v2  ;;  %4714 = vst [vmem:[%s6421_s24 + $0xb] ss:$32 sm:$0x20] %v994_v2 }
 0x1b1   : > { %4715 = vst [vmem:[%s6421_s24 + $0xb] ss:$32 sm:$0x40] %v994_v2  ;;  %4716 = vst [vmem:[%s6421_s24 + $0xb] ss:$32 sm:$0x80] %v994_v2  ;;  %v1422_v2 = vpop.f32.mrf.mxu1 }
 0x1b2   : > { %4573 = vst [vmem:[%s6421_s24 + $0x108] ss:$32 sm:$0x1] %v897_v3  ;;  %4574 = vst [vmem:[%s6421_s24 + $0x108] ss:$32 sm:$0x2] %v897_v3 }
 0x1b3   : > { %4575 = vst [vmem:[%s6421_s24 + $0x108] ss:$32 sm:$0x4] %v897_v3  ;;  %4576 = vst [vmem:[%s6421_s24 + $0x108] ss:$32 sm:$0x8] %v897_v3 }
 0x1b4   : > { %4577 = vst [vmem:[%s6421_s24 + $0x108] ss:$32 sm:$0x10] %v897_v3  ;;  %4578 = vst [vmem:[%s6421_s24 + $0x108] ss:$32 sm:$0x20] %v897_v3 }
 0x1b5   : > { %4579 = vst [vmem:[%s6421_s24 + $0x108] ss:$32 sm:$0x40] %v897_v3  ;;  %4580 = vst [vmem:[%s6421_s24 + $0x108] ss:$32 sm:$0x80] %v897_v3  ;;  %v1325_v3 = vpop.f32.mrf.mxu0 }
 0x1b6   : > { %4669 = vst [vmem:[%s6421_s24 + $0x10a] ss:$32 sm:$0x1] %v998_v4  ;;  %4670 = vst [vmem:[%s6421_s24 + $0x10a] ss:$32 sm:$0x2] %v998_v4 }
 0x1b7   : > { %4671 = vst [vmem:[%s6421_s24 + $0x10a] ss:$32 sm:$0x4] %v998_v4  ;;  %4672 = vst [vmem:[%s6421_s24 + $0x10a] ss:$32 sm:$0x8] %v998_v4 }
 0x1b8   : > { %4673 = vst [vmem:[%s6421_s24 + $0x10a] ss:$32 sm:$0x10] %v998_v4  ;;  %4674 = vst [vmem:[%s6421_s24 + $0x10a] ss:$32 sm:$0x20] %v998_v4 }
 0x1b9   : > { %4675 = vst [vmem:[%s6421_s24 + $0x10a] ss:$32 sm:$0x40] %v998_v4  ;;  %4676 = vst [vmem:[%s6421_s24 + $0x10a] ss:$32 sm:$0x80] %v998_v4  ;;  %v1426_v4 = vpop.f32.mrf.mxu1 }
 0x1ba   : > { %4621 = vst [vmem:[%s6421_s24 + $0x109] ss:$32 sm:$0x1] %v899_v5  ;;  %4622 = vst [vmem:[%s6421_s24 + $0x109] ss:$32 sm:$0x2] %v899_v5 }
 0x1bb   : > { %4623 = vst [vmem:[%s6421_s24 + $0x109] ss:$32 sm:$0x4] %v899_v5  ;;  %4624 = vst [vmem:[%s6421_s24 + $0x109] ss:$32 sm:$0x8] %v899_v5 }
 0x1bc   : > { %4625 = vst [vmem:[%s6421_s24 + $0x109] ss:$32 sm:$0x10] %v899_v5  ;;  %4626 = vst [vmem:[%s6421_s24 + $0x109] ss:$32 sm:$0x20] %v899_v5 }
 0x1bd   : > { %4627 = vst [vmem:[%s6421_s24 + $0x109] ss:$32 sm:$0x40] %v899_v5  ;;  %4628 = vst [vmem:[%s6421_s24 + $0x109] ss:$32 sm:$0x80] %v899_v5  ;;  %v1327_v5 = vpop.f32.mrf.mxu0 }
 0x1be   : > { %4717 = vst [vmem:[%s6421_s24 + $0x10b] ss:$32 sm:$0x1] %v1000_v6  ;;  %4718 = vst [vmem:[%s6421_s24 + $0x10b] ss:$32 sm:$0x2] %v1000_v6 }
 0x1bf   : > { %4719 = vst [vmem:[%s6421_s24 + $0x10b] ss:$32 sm:$0x4] %v1000_v6  ;;  %4720 = vst [vmem:[%s6421_s24 + $0x10b] ss:$32 sm:$0x8] %v1000_v6 }
 0x1c0   : > { %4721 = vst [vmem:[%s6421_s24 + $0x10b] ss:$32 sm:$0x10] %v1000_v6  ;;  %4722 = vst [vmem:[%s6421_s24 + $0x10b] ss:$32 sm:$0x20] %v1000_v6 }
 0x1c1   : > { %4723 = vst [vmem:[%s6421_s24 + $0x10b] ss:$32 sm:$0x40] %v1000_v6  ;;  %4724 = vst [vmem:[%s6421_s24 + $0x10b] ss:$32 sm:$0x80] %v1000_v6  ;;  %v1428_v6 = vpop.f32.mrf.mxu1 }
 0x1c2   : > { %4581 = vst [vmem:[%s6421_s24 + $0x208] ss:$32 sm:$0x1] %v903_v7  ;;  %4582 = vst [vmem:[%s6421_s24 + $0x208] ss:$32 sm:$0x2] %v903_v7 }
 0x1c3   : > { %4583 = vst [vmem:[%s6421_s24 + $0x208] ss:$32 sm:$0x4] %v903_v7  ;;  %4584 = vst [vmem:[%s6421_s24 + $0x208] ss:$32 sm:$0x8] %v903_v7 }
 0x1c4   : > { %4585 = vst [vmem:[%s6421_s24 + $0x208] ss:$32 sm:$0x10] %v903_v7  ;;  %4586 = vst [vmem:[%s6421_s24 + $0x208] ss:$32 sm:$0x20] %v903_v7 }
 0x1c5   : > { %4587 = vst [vmem:[%s6421_s24 + $0x208] ss:$32 sm:$0x40] %v903_v7  ;;  %4588 = vst [vmem:[%s6421_s24 + $0x208] ss:$32 sm:$0x80] %v903_v7  ;;  %v1497_v7 = vpop.f32.mrf.mxu0 }
 0x1c6   : > { %4677 = vst [vmem:[%s6421_s24 + $0x20a] ss:$32 sm:$0x1] %v1004_v8  ;;  %4678 = vst [vmem:[%s6421_s24 + $0x20a] ss:$32 sm:$0x2] %v1004_v8 }
 0x1c7   : > { %4679 = vst [vmem:[%s6421_s24 + $0x20a] ss:$32 sm:$0x4] %v1004_v8  ;;  %4680 = vst [vmem:[%s6421_s24 + $0x20a] ss:$32 sm:$0x8] %v1004_v8 }
 0x1c8   : > { %4681 = vst [vmem:[%s6421_s24 + $0x20a] ss:$32 sm:$0x10] %v1004_v8  ;;  %4682 = vst [vmem:[%s6421_s24 + $0x20a] ss:$32 sm:$0x20] %v1004_v8 }
 0x1c9   : > { %4683 = vst [vmem:[%s6421_s24 + $0x20a] ss:$32 sm:$0x40] %v1004_v8  ;;  %4684 = vst [vmem:[%s6421_s24 + $0x20a] ss:$32 sm:$0x80] %v1004_v8  ;;  %v1598_v8 = vpop.f32.mrf.mxu1 }
 0x1ca   : > { %4629 = vst [vmem:[%s6421_s24 + $0x209] ss:$32 sm:$0x1] %v905_v9  ;;  %4630 = vst [vmem:[%s6421_s24 + $0x209] ss:$32 sm:$0x2] %v905_v9 }
 0x1cb   : > { %4631 = vst [vmem:[%s6421_s24 + $0x209] ss:$32 sm:$0x4] %v905_v9  ;;  %4632 = vst [vmem:[%s6421_s24 + $0x209] ss:$32 sm:$0x8] %v905_v9 }
 0x1cc   : > { %4633 = vst [vmem:[%s6421_s24 + $0x209] ss:$32 sm:$0x10] %v905_v9  ;;  %4634 = vst [vmem:[%s6421_s24 + $0x209] ss:$32 sm:$0x20] %v905_v9 }
 0x1cd   : > { %4635 = vst [vmem:[%s6421_s24 + $0x209] ss:$32 sm:$0x40] %v905_v9  ;;  %4636 = vst [vmem:[%s6421_s24 + $0x209] ss:$32 sm:$0x80] %v905_v9  ;;  %v1499_v9 = vpop.f32.mrf.mxu0 }
 0x1ce   : > { %4725 = vst [vmem:[%s6421_s24 + $0x20b] ss:$32 sm:$0x1] %v1006_v10  ;;  %4726 = vst [vmem:[%s6421_s24 + $0x20b] ss:$32 sm:$0x2] %v1006_v10 }
 0x1cf   : > { %4727 = vst [vmem:[%s6421_s24 + $0x20b] ss:$32 sm:$0x4] %v1006_v10  ;;  %4728 = vst [vmem:[%s6421_s24 + $0x20b] ss:$32 sm:$0x8] %v1006_v10 }
 0x1d0   : > { %4729 = vst [vmem:[%s6421_s24 + $0x20b] ss:$32 sm:$0x10] %v1006_v10  ;;  %4730 = vst [vmem:[%s6421_s24 + $0x20b] ss:$32 sm:$0x20] %v1006_v10 }
 0x1d1   : > { %4731 = vst [vmem:[%s6421_s24 + $0x20b] ss:$32 sm:$0x40] %v1006_v10  ;;  %4732 = vst [vmem:[%s6421_s24 + $0x20b] ss:$32 sm:$0x80] %v1006_v10  ;;  %v1600_v10 = vpop.f32.mrf.mxu1 }
 0x1d2   : > { %4589 = vst [vmem:[%s6421_s24 + $0x308] ss:$32 sm:$0x1] %v909_v11  ;;  %4590 = vst [vmem:[%s6421_s24 + $0x308] ss:$32 sm:$0x2] %v909_v11 }
 0x1d3   : > { %4591 = vst [vmem:[%s6421_s24 + $0x308] ss:$32 sm:$0x4] %v909_v11  ;;  %4592 = vst [vmem:[%s6421_s24 + $0x308] ss:$32 sm:$0x8] %v909_v11 }
 0x1d4   : > { %4593 = vst [vmem:[%s6421_s24 + $0x308] ss:$32 sm:$0x10] %v909_v11  ;;  %4594 = vst [vmem:[%s6421_s24 + $0x308] ss:$32 sm:$0x20] %v909_v11 }
 0x1d5   : > { %4595 = vst [vmem:[%s6421_s24 + $0x308] ss:$32 sm:$0x40] %v909_v11  ;;  %4596 = vst [vmem:[%s6421_s24 + $0x308] ss:$32 sm:$0x80] %v909_v11  ;;  %v1503_v11 = vpop.f32.mrf.mxu0 }
 0x1d6   : > { %4685 = vst [vmem:[%s6421_s24 + $0x30a] ss:$32 sm:$0x1] %v1010_v12  ;;  %4686 = vst [vmem:[%s6421_s24 + $0x30a] ss:$32 sm:$0x2] %v1010_v12 }
 0x1d7   : > { %4687 = vst [vmem:[%s6421_s24 + $0x30a] ss:$32 sm:$0x4] %v1010_v12  ;;  %4688 = vst [vmem:[%s6421_s24 + $0x30a] ss:$32 sm:$0x8] %v1010_v12 }
 0x1d8   : > { %4689 = vst [vmem:[%s6421_s24 + $0x30a] ss:$32 sm:$0x10] %v1010_v12  ;;  %4690 = vst [vmem:[%s6421_s24 + $0x30a] ss:$32 sm:$0x20] %v1010_v12 }
 0x1d9   : > { %4691 = vst [vmem:[%s6421_s24 + $0x30a] ss:$32 sm:$0x40] %v1010_v12  ;;  %4692 = vst [vmem:[%s6421_s24 + $0x30a] ss:$32 sm:$0x80] %v1010_v12  ;;  %v1604_v12 = vpop.f32.mrf.mxu1 }
 0x1da   : > { %4637 = vst [vmem:[%s6421_s24 + $0x309] ss:$32 sm:$0x1] %v911_v13  ;;  %4638 = vst [vmem:[%s6421_s24 + $0x309] ss:$32 sm:$0x2] %v911_v13 }
 0x1db   : > { %4639 = vst [vmem:[%s6421_s24 + $0x309] ss:$32 sm:$0x4] %v911_v13  ;;  %4640 = vst [vmem:[%s6421_s24 + $0x309] ss:$32 sm:$0x8] %v911_v13 }
 0x1dc   : > { %4641 = vst [vmem:[%s6421_s24 + $0x309] ss:$32 sm:$0x10] %v911_v13  ;;  %4642 = vst [vmem:[%s6421_s24 + $0x309] ss:$32 sm:$0x20] %v911_v13 }
 0x1dd   : > { %4643 = vst [vmem:[%s6421_s24 + $0x309] ss:$32 sm:$0x40] %v911_v13  ;;  %4644 = vst [vmem:[%s6421_s24 + $0x309] ss:$32 sm:$0x80] %v911_v13  ;;  %v1505_v13 = vpop.f32.mrf.mxu0 }
 0x1de   : > { %4733 = vst [vmem:[%s6421_s24 + $0x30b] ss:$32 sm:$0x1] %v1012_v14  ;;  %4734 = vst [vmem:[%s6421_s24 + $0x30b] ss:$32 sm:$0x2] %v1012_v14 }
 0x1df   : > { %4735 = vst [vmem:[%s6421_s24 + $0x30b] ss:$32 sm:$0x4] %v1012_v14  ;;  %4736 = vst [vmem:[%s6421_s24 + $0x30b] ss:$32 sm:$0x8] %v1012_v14 }
 0x1e0   : > { %4737 = vst [vmem:[%s6421_s24 + $0x30b] ss:$32 sm:$0x10] %v1012_v14  ;;  %4738 = vst [vmem:[%s6421_s24 + $0x30b] ss:$32 sm:$0x20] %v1012_v14 }
 0x1e1   : > { %4739 = vst [vmem:[%s6421_s24 + $0x30b] ss:$32 sm:$0x40] %v1012_v14  ;;  %4740 = vst [vmem:[%s6421_s24 + $0x30b] ss:$32 sm:$0x80] %v1012_v14  ;;  %v1606_v14 = vpop.f32.mrf.mxu1 }
 0x1e2   : > { %4597 = vst [vmem:[%s6421_s24 + $0x408] ss:$32 sm:$0x1] %v915_v17  ;;  %4598 = vst [vmem:[%s6421_s24 + $0x408] ss:$32 sm:$0x2] %v915_v17 }
 0x1e3   : > { %4599 = vst [vmem:[%s6421_s24 + $0x408] ss:$32 sm:$0x4] %v915_v17  ;;  %4600 = vst [vmem:[%s6421_s24 + $0x408] ss:$32 sm:$0x8] %v915_v17 }
 0x1e4   : > { %4601 = vst [vmem:[%s6421_s24 + $0x408] ss:$32 sm:$0x10] %v915_v17  ;;  %4602 = vst [vmem:[%s6421_s24 + $0x408] ss:$32 sm:$0x20] %v915_v17 }
 0x1e5   : > { %4603 = vst [vmem:[%s6421_s24 + $0x408] ss:$32 sm:$0x40] %v915_v17  ;;  %4604 = vst [vmem:[%s6421_s24 + $0x408] ss:$32 sm:$0x80] %v915_v17  ;;  %v1509_v17 = vpop.f32.mrf.mxu0 }
 0x1e6   : > { %4693 = vst [vmem:[%s6421_s24 + $0x40a] ss:$32 sm:$0x1] %v1016_v22  ;;  %4694 = vst [vmem:[%s6421_s24 + $0x40a] ss:$32 sm:$0x2] %v1016_v22 }
 0x1e7   : > { %4695 = vst [vmem:[%s6421_s24 + $0x40a] ss:$32 sm:$0x4] %v1016_v22  ;;  %4696 = vst [vmem:[%s6421_s24 + $0x40a] ss:$32 sm:$0x8] %v1016_v22 }
 0x1e8   : > { %4697 = vst [vmem:[%s6421_s24 + $0x40a] ss:$32 sm:$0x10] %v1016_v22  ;;  %4698 = vst [vmem:[%s6421_s24 + $0x40a] ss:$32 sm:$0x20] %v1016_v22 }
 0x1e9   : > { %4699 = vst [vmem:[%s6421_s24 + $0x40a] ss:$32 sm:$0x40] %v1016_v22  ;;  %4700 = vst [vmem:[%s6421_s24 + $0x40a] ss:$32 sm:$0x80] %v1016_v22  ;;  %v1610_v22 = vpop.f32.mrf.mxu1 }
 0x1ea   : > { %4645 = vst [vmem:[%s6421_s24 + $0x409] ss:$32 sm:$0x1] %v917_v0  ;;  %4646 = vst [vmem:[%s6421_s24 + $0x409] ss:$32 sm:$0x2] %v917_v0 }
 0x1eb   : > { %4647 = vst [vmem:[%s6421_s24 + $0x409] ss:$32 sm:$0x4] %v917_v0  ;;  %4648 = vst [vmem:[%s6421_s24 + $0x409] ss:$32 sm:$0x8] %v917_v0 }
 0x1ec   : > { %4649 = vst [vmem:[%s6421_s24 + $0x409] ss:$32 sm:$0x10] %v917_v0  ;;  %4650 = vst [vmem:[%s6421_s24 + $0x409] ss:$32 sm:$0x20] %v917_v0 }
 0x1ed   : > { %4651 = vst [vmem:[%s6421_s24 + $0x409] ss:$32 sm:$0x40] %v917_v0  ;;  %4652 = vst [vmem:[%s6421_s24 + $0x409] ss:$32 sm:$0x80] %v917_v0  ;;  %v1511_v0 = vpop.f32.mrf.mxu0 }
 0x1ee   : > { %4741 = vst [vmem:[%s6421_s24 + $0x40b] ss:$32 sm:$0x1] %v1018_v27  ;;  %4742 = vst [vmem:[%s6421_s24 + $0x40b] ss:$32 sm:$0x2] %v1018_v27 }
 0x1ef   : > { %4743 = vst [vmem:[%s6421_s24 + $0x40b] ss:$32 sm:$0x4] %v1018_v27  ;;  %4744 = vst [vmem:[%s6421_s24 + $0x40b] ss:$32 sm:$0x8] %v1018_v27 }
 0x1f0   : > { %4745 = vst [vmem:[%s6421_s24 + $0x40b] ss:$32 sm:$0x10] %v1018_v27  ;;  %4746 = vst [vmem:[%s6421_s24 + $0x40b] ss:$32 sm:$0x20] %v1018_v27 }
 0x1f1   : > { %4747 = vst [vmem:[%s6421_s24 + $0x40b] ss:$32 sm:$0x40] %v1018_v27  ;;  %4748 = vst [vmem:[%s6421_s24 + $0x40b] ss:$32 sm:$0x80] %v1018_v27  ;;  %v1612_v27 = vpop.f32.mrf.mxu1 }
 0x1f2   : > { %4605 = vst [vmem:[%s6421_s24 + $0x508] ss:$32 sm:$0x1] %v921_v32  ;;  %4606 = vst [vmem:[%s6421_s24 + $0x508] ss:$32 sm:$0x2] %v921_v32 }
 0x1f3   : > { %4607 = vst [vmem:[%s6421_s24 + $0x508] ss:$32 sm:$0x4] %v921_v32  ;;  %4608 = vst [vmem:[%s6421_s24 + $0x508] ss:$32 sm:$0x8] %v921_v32 }
 0x1f4   : > { %4609 = vst [vmem:[%s6421_s24 + $0x508] ss:$32 sm:$0x10] %v921_v32  ;;  %4610 = vst [vmem:[%s6421_s24 + $0x508] ss:$32 sm:$0x20] %v921_v32 }
 0x1f5   : > { %4611 = vst [vmem:[%s6421_s24 + $0x508] ss:$32 sm:$0x40] %v921_v32  ;;  %4612 = vst [vmem:[%s6421_s24 + $0x508] ss:$32 sm:$0x80] %v921_v32  ;;  %v1515_v32 = vpop.f32.mrf.mxu0 }
 0x1f6   : > { %4701 = vst [vmem:[%s6421_s24 + $0x50a] ss:$32 sm:$0x1] %v1022_v37  ;;  %4702 = vst [vmem:[%s6421_s24 + $0x50a] ss:$32 sm:$0x2] %v1022_v37 }
 0x1f7   : > { %4703 = vst [vmem:[%s6421_s24 + $0x50a] ss:$32 sm:$0x4] %v1022_v37  ;;  %4704 = vst [vmem:[%s6421_s24 + $0x50a] ss:$32 sm:$0x8] %v1022_v37 }
 0x1f8   : > { %4705 = vst [vmem:[%s6421_s24 + $0x50a] ss:$32 sm:$0x10] %v1022_v37  ;;  %4706 = vst [vmem:[%s6421_s24 + $0x50a] ss:$32 sm:$0x20] %v1022_v37 }
 0x1f9   : > { %4707 = vst [vmem:[%s6421_s24 + $0x50a] ss:$32 sm:$0x40] %v1022_v37  ;;  %4708 = vst [vmem:[%s6421_s24 + $0x50a] ss:$32 sm:$0x80] %v1022_v37  ;;  %v1616_v37 = vpop.f32.mrf.mxu1 }
 0x1fa   : > { %4653 = vst [vmem:[%s6421_s24 + $0x509] ss:$32 sm:$0x1] %v923_v40  ;;  %4654 = vst [vmem:[%s6421_s24 + $0x509] ss:$32 sm:$0x2] %v923_v40 }
 0x1fb   : > { %4655 = vst [vmem:[%s6421_s24 + $0x509] ss:$32 sm:$0x4] %v923_v40  ;;  %4656 = vst [vmem:[%s6421_s24 + $0x509] ss:$32 sm:$0x8] %v923_v40 }
 0x1fc   : > { %4657 = vst [vmem:[%s6421_s24 + $0x509] ss:$32 sm:$0x10] %v923_v40  ;;  %4658 = vst [vmem:[%s6421_s24 + $0x509] ss:$32 sm:$0x20] %v923_v40 }
 0x1fd   : > { %4659 = vst [vmem:[%s6421_s24 + $0x509] ss:$32 sm:$0x40] %v923_v40  ;;  %4660 = vst [vmem:[%s6421_s24 + $0x509] ss:$32 sm:$0x80] %v923_v40  ;;  %v1517_v40 = vpop.f32.mrf.mxu0 }
 0x1fe   : > { %4749 = vst [vmem:[%s6421_s24 + $0x50b] ss:$32 sm:$0x1] %v1024_v15  ;;  %4750 = vst [vmem:[%s6421_s24 + $0x50b] ss:$32 sm:$0x2] %v1024_v15 }
 0x1ff   : > { %4751 = vst [vmem:[%s6421_s24 + $0x50b] ss:$32 sm:$0x4] %v1024_v15  ;;  %4752 = vst [vmem:[%s6421_s24 + $0x50b] ss:$32 sm:$0x8] %v1024_v15 }
 0x200   : > { %4753 = vst [vmem:[%s6421_s24 + $0x50b] ss:$32 sm:$0x10] %v1024_v15  ;;  %4754 = vst [vmem:[%s6421_s24 + $0x50b] ss:$32 sm:$0x20] %v1024_v15 }
 0x201   : > { %4755 = vst [vmem:[%s6421_s24 + $0x50b] ss:$32 sm:$0x40] %v1024_v15  ;;  %4756 = vst [vmem:[%s6421_s24 + $0x50b] ss:$32 sm:$0x80] %v1024_v15  ;;  %v1618_v15 = vpop.f32.mrf.mxu1 }
 0x202   : > { %4757 = vst [vmem:[%s6421_s24 + $0xc] ss:$32 sm:$0x1] %v1093_v16  ;;  %4758 = vst [vmem:[%s6421_s24 + $0xc] ss:$32 sm:$0x2] %v1093_v16 }
 0x203   : > { %4759 = vst [vmem:[%s6421_s24 + $0xc] ss:$32 sm:$0x4] %v1093_v16  ;;  %4760 = vst [vmem:[%s6421_s24 + $0xc] ss:$32 sm:$0x8] %v1093_v16 }
 0x204   : > { %4761 = vst [vmem:[%s6421_s24 + $0xc] ss:$32 sm:$0x10] %v1093_v16  ;;  %4762 = vst [vmem:[%s6421_s24 + $0xc] ss:$32 sm:$0x20] %v1093_v16 }
 0x205   : > { %4763 = vst [vmem:[%s6421_s24 + $0xc] ss:$32 sm:$0x40] %v1093_v16  ;;  %4764 = vst [vmem:[%s6421_s24 + $0xc] ss:$32 sm:$0x80] %v1093_v16  ;;  %v1521_v16 = vpop.f32.mrf.mxu0 }
 0x206   : > { %4853 = vst [vmem:[%s6421_s24 + $0xe] ss:$32 sm:$0x1] %v1194_v18  ;;  %4854 = vst [vmem:[%s6421_s24 + $0xe] ss:$32 sm:$0x2] %v1194_v18 }
 0x207   : > { %4855 = vst [vmem:[%s6421_s24 + $0xe] ss:$32 sm:$0x4] %v1194_v18  ;;  %4856 = vst [vmem:[%s6421_s24 + $0xe] ss:$32 sm:$0x8] %v1194_v18 }
 0x208   : > { %4857 = vst [vmem:[%s6421_s24 + $0xe] ss:$32 sm:$0x10] %v1194_v18  ;;  %4858 = vst [vmem:[%s6421_s24 + $0xe] ss:$32 sm:$0x20] %v1194_v18 }
 0x209   : > { %4859 = vst [vmem:[%s6421_s24 + $0xe] ss:$32 sm:$0x40] %v1194_v18  ;;  %4860 = vst [vmem:[%s6421_s24 + $0xe] ss:$32 sm:$0x80] %v1194_v18  ;;  %v1622_v18 = vpop.f32.mrf.mxu1 }
 0x20a   : > { %4805 = vst [vmem:[%s6421_s24 + $0xd] ss:$32 sm:$0x1] %v1095_v19  ;;  %4806 = vst [vmem:[%s6421_s24 + $0xd] ss:$32 sm:$0x2] %v1095_v19 }
 0x20b   : > { %4807 = vst [vmem:[%s6421_s24 + $0xd] ss:$32 sm:$0x4] %v1095_v19  ;;  %4808 = vst [vmem:[%s6421_s24 + $0xd] ss:$32 sm:$0x8] %v1095_v19 }
 0x20c   : > { %4809 = vst [vmem:[%s6421_s24 + $0xd] ss:$32 sm:$0x10] %v1095_v19  ;;  %4810 = vst [vmem:[%s6421_s24 + $0xd] ss:$32 sm:$0x20] %v1095_v19 }
 0x20d   : > { %4811 = vst [vmem:[%s6421_s24 + $0xd] ss:$32 sm:$0x40] %v1095_v19  ;;  %4812 = vst [vmem:[%s6421_s24 + $0xd] ss:$32 sm:$0x80] %v1095_v19  ;;  %v1523_v19 = vpop.f32.mrf.mxu0 }
 0x20e   : > { %4901 = vst [vmem:[%s6421_s24 + $0xf] ss:$32 sm:$0x1] %v1196_v20  ;;  %4902 = vst [vmem:[%s6421_s24 + $0xf] ss:$32 sm:$0x2] %v1196_v20 }
 0x20f   : > { %4903 = vst [vmem:[%s6421_s24 + $0xf] ss:$32 sm:$0x4] %v1196_v20  ;;  %4904 = vst [vmem:[%s6421_s24 + $0xf] ss:$32 sm:$0x8] %v1196_v20 }
 0x210   : > { %4905 = vst [vmem:[%s6421_s24 + $0xf] ss:$32 sm:$0x10] %v1196_v20  ;;  %4906 = vst [vmem:[%s6421_s24 + $0xf] ss:$32 sm:$0x20] %v1196_v20 }
 0x211   : > { %4907 = vst [vmem:[%s6421_s24 + $0xf] ss:$32 sm:$0x40] %v1196_v20  ;;  %4908 = vst [vmem:[%s6421_s24 + $0xf] ss:$32 sm:$0x80] %v1196_v20  ;;  %v1624_v20 = vpop.f32.mrf.mxu1 }
 0x212   : > { %4765 = vst [vmem:[%s6421_s24 + $0x10c] ss:$32 sm:$0x1] %v1099_v21  ;;  %4766 = vst [vmem:[%s6421_s24 + $0x10c] ss:$32 sm:$0x2] %v1099_v21 }
 0x213   : > { %4767 = vst [vmem:[%s6421_s24 + $0x10c] ss:$32 sm:$0x4] %v1099_v21  ;;  %4768 = vst [vmem:[%s6421_s24 + $0x10c] ss:$32 sm:$0x8] %v1099_v21 }
 0x214   : > { %4769 = vst [vmem:[%s6421_s24 + $0x10c] ss:$32 sm:$0x10] %v1099_v21  ;;  %4770 = vst [vmem:[%s6421_s24 + $0x10c] ss:$32 sm:$0x20] %v1099_v21 }
 0x215   : > { %4771 = vst [vmem:[%s6421_s24 + $0x10c] ss:$32 sm:$0x40] %v1099_v21  ;;  %4772 = vst [vmem:[%s6421_s24 + $0x10c] ss:$32 sm:$0x80] %v1099_v21  ;;  %v1527_v21 = vpop.f32.mrf.mxu0 }
 0x216   : > { %4861 = vst [vmem:[%s6421_s24 + $0x10e] ss:$32 sm:$0x1] %v1200_v23  ;;  %4862 = vst [vmem:[%s6421_s24 + $0x10e] ss:$32 sm:$0x2] %v1200_v23 }
 0x217   : > { %4863 = vst [vmem:[%s6421_s24 + $0x10e] ss:$32 sm:$0x4] %v1200_v23  ;;  %4864 = vst [vmem:[%s6421_s24 + $0x10e] ss:$32 sm:$0x8] %v1200_v23 }
 0x218   : > { %4865 = vst [vmem:[%s6421_s24 + $0x10e] ss:$32 sm:$0x10] %v1200_v23  ;;  %4866 = vst [vmem:[%s6421_s24 + $0x10e] ss:$32 sm:$0x20] %v1200_v23 }
 0x219   : > { %4867 = vst [vmem:[%s6421_s24 + $0x10e] ss:$32 sm:$0x40] %v1200_v23  ;;  %4868 = vst [vmem:[%s6421_s24 + $0x10e] ss:$32 sm:$0x80] %v1200_v23  ;;  %v1628_v23 = vpop.f32.mrf.mxu1 }
 0x21a   : > { %4813 = vst [vmem:[%s6421_s24 + $0x10d] ss:$32 sm:$0x1] %v1101_v24  ;;  %4814 = vst [vmem:[%s6421_s24 + $0x10d] ss:$32 sm:$0x2] %v1101_v24 }
 0x21b   : > { %4815 = vst [vmem:[%s6421_s24 + $0x10d] ss:$32 sm:$0x4] %v1101_v24  ;;  %4816 = vst [vmem:[%s6421_s24 + $0x10d] ss:$32 sm:$0x8] %v1101_v24 }
 0x21c   : > { %4817 = vst [vmem:[%s6421_s24 + $0x10d] ss:$32 sm:$0x10] %v1101_v24  ;;  %4818 = vst [vmem:[%s6421_s24 + $0x10d] ss:$32 sm:$0x20] %v1101_v24 }
 0x21d   : > { %4819 = vst [vmem:[%s6421_s24 + $0x10d] ss:$32 sm:$0x40] %v1101_v24  ;;  %4820 = vst [vmem:[%s6421_s24 + $0x10d] ss:$32 sm:$0x80] %v1101_v24  ;;  %v1529_v24 = vpop.f32.mrf.mxu0 }
 0x21e   : > { %4909 = vst [vmem:[%s6421_s24 + $0x10f] ss:$32 sm:$0x1] %v1202_v25  ;;  %4910 = vst [vmem:[%s6421_s24 + $0x10f] ss:$32 sm:$0x2] %v1202_v25 }
 0x21f   : > { %4911 = vst [vmem:[%s6421_s24 + $0x10f] ss:$32 sm:$0x4] %v1202_v25  ;;  %4912 = vst [vmem:[%s6421_s24 + $0x10f] ss:$32 sm:$0x8] %v1202_v25 }
 0x220   : > { %4913 = vst [vmem:[%s6421_s24 + $0x10f] ss:$32 sm:$0x10] %v1202_v25  ;;  %4914 = vst [vmem:[%s6421_s24 + $0x10f] ss:$32 sm:$0x20] %v1202_v25 }
 0x221   : > { %4915 = vst [vmem:[%s6421_s24 + $0x10f] ss:$32 sm:$0x40] %v1202_v25  ;;  %4916 = vst [vmem:[%s6421_s24 + $0x10f] ss:$32 sm:$0x80] %v1202_v25  ;;  %v1630_v25 = vpop.f32.mrf.mxu1 }
 0x222   : > { %4773 = vst [vmem:[%s6421_s24 + $0x20c] ss:$32 sm:$0x1] %v1105_v26  ;;  %4774 = vst [vmem:[%s6421_s24 + $0x20c] ss:$32 sm:$0x2] %v1105_v26 }
 0x223   : > { %4775 = vst [vmem:[%s6421_s24 + $0x20c] ss:$32 sm:$0x4] %v1105_v26  ;;  %4776 = vst [vmem:[%s6421_s24 + $0x20c] ss:$32 sm:$0x8] %v1105_v26 }
 0x224   : > { %4777 = vst [vmem:[%s6421_s24 + $0x20c] ss:$32 sm:$0x10] %v1105_v26  ;;  %4778 = vst [vmem:[%s6421_s24 + $0x20c] ss:$32 sm:$0x20] %v1105_v26 }
 0x225   : > { %4779 = vst [vmem:[%s6421_s24 + $0x20c] ss:$32 sm:$0x40] %v1105_v26  ;;  %4780 = vst [vmem:[%s6421_s24 + $0x20c] ss:$32 sm:$0x80] %v1105_v26  ;;  %v1699_v26 = vpop.f32.mrf.mxu0 }
 0x226   : > { %4869 = vst [vmem:[%s6421_s24 + $0x20e] ss:$32 sm:$0x1] %v1206_v28  ;;  %4870 = vst [vmem:[%s6421_s24 + $0x20e] ss:$32 sm:$0x2] %v1206_v28 }
 0x227   : > { %4871 = vst [vmem:[%s6421_s24 + $0x20e] ss:$32 sm:$0x4] %v1206_v28  ;;  %4872 = vst [vmem:[%s6421_s24 + $0x20e] ss:$32 sm:$0x8] %v1206_v28 }
 0x228   : > { %4873 = vst [vmem:[%s6421_s24 + $0x20e] ss:$32 sm:$0x10] %v1206_v28  ;;  %4874 = vst [vmem:[%s6421_s24 + $0x20e] ss:$32 sm:$0x20] %v1206_v28 }
 0x229   : > { %4875 = vst [vmem:[%s6421_s24 + $0x20e] ss:$32 sm:$0x40] %v1206_v28  ;;  %4876 = vst [vmem:[%s6421_s24 + $0x20e] ss:$32 sm:$0x80] %v1206_v28  ;;  %v1800_v28 = vpop.f32.mrf.mxu1 }
 0x22a   : > { %4821 = vst [vmem:[%s6421_s24 + $0x20d] ss:$32 sm:$0x1] %v1107_v29  ;;  %4822 = vst [vmem:[%s6421_s24 + $0x20d] ss:$32 sm:$0x2] %v1107_v29 }
 0x22b   : > { %4823 = vst [vmem:[%s6421_s24 + $0x20d] ss:$32 sm:$0x4] %v1107_v29  ;;  %4824 = vst [vmem:[%s6421_s24 + $0x20d] ss:$32 sm:$0x8] %v1107_v29 }
 0x22c   : > { %4825 = vst [vmem:[%s6421_s24 + $0x20d] ss:$32 sm:$0x10] %v1107_v29  ;;  %4826 = vst [vmem:[%s6421_s24 + $0x20d] ss:$32 sm:$0x20] %v1107_v29 }
 0x22d   : > { %4827 = vst [vmem:[%s6421_s24 + $0x20d] ss:$32 sm:$0x40] %v1107_v29  ;;  %4828 = vst [vmem:[%s6421_s24 + $0x20d] ss:$32 sm:$0x80] %v1107_v29  ;;  %v1701_v29 = vpop.f32.mrf.mxu0 }
 0x22e   : > { %4917 = vst [vmem:[%s6421_s24 + $0x20f] ss:$32 sm:$0x1] %v1208_v30  ;;  %4918 = vst [vmem:[%s6421_s24 + $0x20f] ss:$32 sm:$0x2] %v1208_v30 }
 0x22f   : > { %4919 = vst [vmem:[%s6421_s24 + $0x20f] ss:$32 sm:$0x4] %v1208_v30  ;;  %4920 = vst [vmem:[%s6421_s24 + $0x20f] ss:$32 sm:$0x8] %v1208_v30 }
 0x230   : > { %4921 = vst [vmem:[%s6421_s24 + $0x20f] ss:$32 sm:$0x10] %v1208_v30  ;;  %4922 = vst [vmem:[%s6421_s24 + $0x20f] ss:$32 sm:$0x20] %v1208_v30 }
 0x231   : > { %4923 = vst [vmem:[%s6421_s24 + $0x20f] ss:$32 sm:$0x40] %v1208_v30  ;;  %4924 = vst [vmem:[%s6421_s24 + $0x20f] ss:$32 sm:$0x80] %v1208_v30  ;;  %v1802_v30 = vpop.f32.mrf.mxu1 }
 0x232   : > { %4781 = vst [vmem:[%s6421_s24 + $0x30c] ss:$32 sm:$0x1] %v1111_v31  ;;  %4782 = vst [vmem:[%s6421_s24 + $0x30c] ss:$32 sm:$0x2] %v1111_v31 }
 0x233   : > { %4783 = vst [vmem:[%s6421_s24 + $0x30c] ss:$32 sm:$0x4] %v1111_v31  ;;  %4784 = vst [vmem:[%s6421_s24 + $0x30c] ss:$32 sm:$0x8] %v1111_v31 }
 0x234   : > { %4785 = vst [vmem:[%s6421_s24 + $0x30c] ss:$32 sm:$0x10] %v1111_v31  ;;  %4786 = vst [vmem:[%s6421_s24 + $0x30c] ss:$32 sm:$0x20] %v1111_v31 }
 0x235   : > { %4787 = vst [vmem:[%s6421_s24 + $0x30c] ss:$32 sm:$0x40] %v1111_v31  ;;  %4788 = vst [vmem:[%s6421_s24 + $0x30c] ss:$32 sm:$0x80] %v1111_v31  ;;  %v1705_v31 = vpop.f32.mrf.mxu0 }
 0x236   : > { %4877 = vst [vmem:[%s6421_s24 + $0x30e] ss:$32 sm:$0x1] %v1212_v33  ;;  %4878 = vst [vmem:[%s6421_s24 + $0x30e] ss:$32 sm:$0x2] %v1212_v33 }
 0x237   : > { %4879 = vst [vmem:[%s6421_s24 + $0x30e] ss:$32 sm:$0x4] %v1212_v33  ;;  %4880 = vst [vmem:[%s6421_s24 + $0x30e] ss:$32 sm:$0x8] %v1212_v33 }
 0x238   : > { %4881 = vst [vmem:[%s6421_s24 + $0x30e] ss:$32 sm:$0x10] %v1212_v33  ;;  %4882 = vst [vmem:[%s6421_s24 + $0x30e] ss:$32 sm:$0x20] %v1212_v33 }
 0x239   : > { %4883 = vst [vmem:[%s6421_s24 + $0x30e] ss:$32 sm:$0x40] %v1212_v33  ;;  %4884 = vst [vmem:[%s6421_s24 + $0x30e] ss:$32 sm:$0x80] %v1212_v33  ;;  %v1806_v33 = vpop.f32.mrf.mxu1 }
 0x23a   : > { %4829 = vst [vmem:[%s6421_s24 + $0x30d] ss:$32 sm:$0x1] %v1113_v34  ;;  %4830 = vst [vmem:[%s6421_s24 + $0x30d] ss:$32 sm:$0x2] %v1113_v34 }
 0x23b   : > { %4831 = vst [vmem:[%s6421_s24 + $0x30d] ss:$32 sm:$0x4] %v1113_v34  ;;  %4832 = vst [vmem:[%s6421_s24 + $0x30d] ss:$32 sm:$0x8] %v1113_v34 }
 0x23c   : > { %4833 = vst [vmem:[%s6421_s24 + $0x30d] ss:$32 sm:$0x10] %v1113_v34  ;;  %4834 = vst [vmem:[%s6421_s24 + $0x30d] ss:$32 sm:$0x20] %v1113_v34 }
 0x23d   : > { %4835 = vst [vmem:[%s6421_s24 + $0x30d] ss:$32 sm:$0x40] %v1113_v34  ;;  %4836 = vst [vmem:[%s6421_s24 + $0x30d] ss:$32 sm:$0x80] %v1113_v34  ;;  %v1707_v34 = vpop.f32.mrf.mxu0 }
 0x23e   : > { %4925 = vst [vmem:[%s6421_s24 + $0x30f] ss:$32 sm:$0x1] %v1214_v35  ;;  %4926 = vst [vmem:[%s6421_s24 + $0x30f] ss:$32 sm:$0x2] %v1214_v35 }
 0x23f   : > { %4927 = vst [vmem:[%s6421_s24 + $0x30f] ss:$32 sm:$0x4] %v1214_v35  ;;  %4928 = vst [vmem:[%s6421_s24 + $0x30f] ss:$32 sm:$0x8] %v1214_v35 }
 0x240   : > { %4929 = vst [vmem:[%s6421_s24 + $0x30f] ss:$32 sm:$0x10] %v1214_v35  ;;  %4930 = vst [vmem:[%s6421_s24 + $0x30f] ss:$32 sm:$0x20] %v1214_v35 }
 0x241   : > { %4931 = vst [vmem:[%s6421_s24 + $0x30f] ss:$32 sm:$0x40] %v1214_v35  ;;  %4932 = vst [vmem:[%s6421_s24 + $0x30f] ss:$32 sm:$0x80] %v1214_v35  ;;  %v1808_v35 = vpop.f32.mrf.mxu1 }
 0x242   : > { %4789 = vst [vmem:[%s6421_s24 + $0x40c] ss:$32 sm:$0x1] %v1117_v36  ;;  %4790 = vst [vmem:[%s6421_s24 + $0x40c] ss:$32 sm:$0x2] %v1117_v36 }
 0x243   : > { %4791 = vst [vmem:[%s6421_s24 + $0x40c] ss:$32 sm:$0x4] %v1117_v36  ;;  %4792 = vst [vmem:[%s6421_s24 + $0x40c] ss:$32 sm:$0x8] %v1117_v36 }
 0x244   : > { %4793 = vst [vmem:[%s6421_s24 + $0x40c] ss:$32 sm:$0x10] %v1117_v36  ;;  %4794 = vst [vmem:[%s6421_s24 + $0x40c] ss:$32 sm:$0x20] %v1117_v36 }
 0x245   : > { %4795 = vst [vmem:[%s6421_s24 + $0x40c] ss:$32 sm:$0x40] %v1117_v36  ;;  %4796 = vst [vmem:[%s6421_s24 + $0x40c] ss:$32 sm:$0x80] %v1117_v36  ;;  %v1711_v36 = vpop.f32.mrf.mxu0 }
 0x246   : > { %4885 = vst [vmem:[%s6421_s24 + $0x40e] ss:$32 sm:$0x1] %v1218_v38  ;;  %4886 = vst [vmem:[%s6421_s24 + $0x40e] ss:$32 sm:$0x2] %v1218_v38 }
 0x247   : > { %4887 = vst [vmem:[%s6421_s24 + $0x40e] ss:$32 sm:$0x4] %v1218_v38  ;;  %4888 = vst [vmem:[%s6421_s24 + $0x40e] ss:$32 sm:$0x8] %v1218_v38 }
 0x248   : > { %4889 = vst [vmem:[%s6421_s24 + $0x40e] ss:$32 sm:$0x10] %v1218_v38  ;;  %4890 = vst [vmem:[%s6421_s24 + $0x40e] ss:$32 sm:$0x20] %v1218_v38 }
 0x249   : > { %4891 = vst [vmem:[%s6421_s24 + $0x40e] ss:$32 sm:$0x40] %v1218_v38  ;;  %4892 = vst [vmem:[%s6421_s24 + $0x40e] ss:$32 sm:$0x80] %v1218_v38  ;;  %v1812_v38 = vpop.f32.mrf.mxu1 }
 0x24a   : > { %4837 = vst [vmem:[%s6421_s24 + $0x40d] ss:$32 sm:$0x1] %v1119_v39  ;;  %4838 = vst [vmem:[%s6421_s24 + $0x40d] ss:$32 sm:$0x2] %v1119_v39 }
 0x24b   : > { %4839 = vst [vmem:[%s6421_s24 + $0x40d] ss:$32 sm:$0x4] %v1119_v39  ;;  %4840 = vst [vmem:[%s6421_s24 + $0x40d] ss:$32 sm:$0x8] %v1119_v39 }
 0x24c   : > { %4841 = vst [vmem:[%s6421_s24 + $0x40d] ss:$32 sm:$0x10] %v1119_v39  ;;  %4842 = vst [vmem:[%s6421_s24 + $0x40d] ss:$32 sm:$0x20] %v1119_v39 }
 0x24d   : > { %4843 = vst [vmem:[%s6421_s24 + $0x40d] ss:$32 sm:$0x40] %v1119_v39  ;;  %4844 = vst [vmem:[%s6421_s24 + $0x40d] ss:$32 sm:$0x80] %v1119_v39  ;;  %v1713_v39 = vpop.f32.mrf.mxu0 }
 0x24e   : > { %4933 = vst [vmem:[%s6421_s24 + $0x40f] ss:$32 sm:$0x1] %v1220_v41  ;;  %4934 = vst [vmem:[%s6421_s24 + $0x40f] ss:$32 sm:$0x2] %v1220_v41 }
 0x24f   : > { %4935 = vst [vmem:[%s6421_s24 + $0x40f] ss:$32 sm:$0x4] %v1220_v41  ;;  %4936 = vst [vmem:[%s6421_s24 + $0x40f] ss:$32 sm:$0x8] %v1220_v41 }
 0x250   : > { %4937 = vst [vmem:[%s6421_s24 + $0x40f] ss:$32 sm:$0x10] %v1220_v41  ;;  %4938 = vst [vmem:[%s6421_s24 + $0x40f] ss:$32 sm:$0x20] %v1220_v41 }
 0x251   : > { %4939 = vst [vmem:[%s6421_s24 + $0x40f] ss:$32 sm:$0x40] %v1220_v41  ;;  %4940 = vst [vmem:[%s6421_s24 + $0x40f] ss:$32 sm:$0x80] %v1220_v41  ;;  %v1814_v41 = vpop.f32.mrf.mxu1 }
 0x252   : > { %4797 = vst [vmem:[%s6421_s24 + $0x50c] ss:$32 sm:$0x1] %v1123_v42  ;;  %4798 = vst [vmem:[%s6421_s24 + $0x50c] ss:$32 sm:$0x2] %v1123_v42 }
 0x253   : > { %4799 = vst [vmem:[%s6421_s24 + $0x50c] ss:$32 sm:$0x4] %v1123_v42  ;;  %4800 = vst [vmem:[%s6421_s24 + $0x50c] ss:$32 sm:$0x8] %v1123_v42 }
 0x254   : > { %4801 = vst [vmem:[%s6421_s24 + $0x50c] ss:$32 sm:$0x10] %v1123_v42  ;;  %4802 = vst [vmem:[%s6421_s24 + $0x50c] ss:$32 sm:$0x20] %v1123_v42 }
 0x255   : > { %4803 = vst [vmem:[%s6421_s24 + $0x50c] ss:$32 sm:$0x40] %v1123_v42  ;;  %4804 = vst [vmem:[%s6421_s24 + $0x50c] ss:$32 sm:$0x80] %v1123_v42  ;;  %v1717_v42 = vpop.f32.mrf.mxu0 }
 0x256   : > { %4893 = vst [vmem:[%s6421_s24 + $0x50e] ss:$32 sm:$0x1] %v1224_v43  ;;  %4894 = vst [vmem:[%s6421_s24 + $0x50e] ss:$32 sm:$0x2] %v1224_v43 }
 0x257   : > { %4895 = vst [vmem:[%s6421_s24 + $0x50e] ss:$32 sm:$0x4] %v1224_v43  ;;  %4896 = vst [vmem:[%s6421_s24 + $0x50e] ss:$32 sm:$0x8] %v1224_v43 }
 0x258   : > { %4897 = vst [vmem:[%s6421_s24 + $0x50e] ss:$32 sm:$0x10] %v1224_v43  ;;  %4898 = vst [vmem:[%s6421_s24 + $0x50e] ss:$32 sm:$0x20] %v1224_v43 }
 0x259   : > { %4899 = vst [vmem:[%s6421_s24 + $0x50e] ss:$32 sm:$0x40] %v1224_v43  ;;  %4900 = vst [vmem:[%s6421_s24 + $0x50e] ss:$32 sm:$0x80] %v1224_v43  ;;  %v1818_v43 = vpop.f32.mrf.mxu1 }
 0x25a   : > { %4845 = vst [vmem:[%s6421_s24 + $0x50d] ss:$32 sm:$0x1] %v1125_v44  ;;  %4846 = vst [vmem:[%s6421_s24 + $0x50d] ss:$32 sm:$0x2] %v1125_v44 }
 0x25b   : > { %4847 = vst [vmem:[%s6421_s24 + $0x50d] ss:$32 sm:$0x4] %v1125_v44  ;;  %4848 = vst [vmem:[%s6421_s24 + $0x50d] ss:$32 sm:$0x8] %v1125_v44 }
 0x25c   : > { %4849 = vst [vmem:[%s6421_s24 + $0x50d] ss:$32 sm:$0x10] %v1125_v44  ;;  %4850 = vst [vmem:[%s6421_s24 + $0x50d] ss:$32 sm:$0x20] %v1125_v44 }
 0x25d   : > { %4851 = vst [vmem:[%s6421_s24 + $0x50d] ss:$32 sm:$0x40] %v1125_v44  ;;  %4852 = vst [vmem:[%s6421_s24 + $0x50d] ss:$32 sm:$0x80] %v1125_v44  ;;  %v1719_v44 = vpop.f32.mrf.mxu0 }
 0x25e   : > { %4941 = vst [vmem:[%s6421_s24 + $0x50f] ss:$32 sm:$0x1] %v1226_v45  ;;  %4942 = vst [vmem:[%s6421_s24 + $0x50f] ss:$32 sm:$0x2] %v1226_v45 }
 0x25f   : > { %4943 = vst [vmem:[%s6421_s24 + $0x50f] ss:$32 sm:$0x4] %v1226_v45  ;;  %4944 = vst [vmem:[%s6421_s24 + $0x50f] ss:$32 sm:$0x8] %v1226_v45 }
 0x260   : > { %4945 = vst [vmem:[%s6421_s24 + $0x50f] ss:$32 sm:$0x10] %v1226_v45  ;;  %4946 = vst [vmem:[%s6421_s24 + $0x50f] ss:$32 sm:$0x20] %v1226_v45 }
 0x261   : > { %4947 = vst [vmem:[%s6421_s24 + $0x50f] ss:$32 sm:$0x40] %v1226_v45  ;;  %4948 = vst [vmem:[%s6421_s24 + $0x50f] ss:$32 sm:$0x80] %v1226_v45  ;;  %v1820_v45 = vpop.f32.mrf.mxu1 }
 0x262   : > { %4949 = vst [vmem:[%s6421_s24 + $0x10] ss:$32 sm:$0x1] %v1295_v46  ;;  %4950 = vst [vmem:[%s6421_s24 + $0x10] ss:$32 sm:$0x2] %v1295_v46 }
 0x263   : > { %4951 = vst [vmem:[%s6421_s24 + $0x10] ss:$32 sm:$0x4] %v1295_v46  ;;  %4952 = vst [vmem:[%s6421_s24 + $0x10] ss:$32 sm:$0x8] %v1295_v46 }
 0x264   : > { %4953 = vst [vmem:[%s6421_s24 + $0x10] ss:$32 sm:$0x10] %v1295_v46  ;;  %4954 = vst [vmem:[%s6421_s24 + $0x10] ss:$32 sm:$0x20] %v1295_v46 }
 0x265   : > { %4955 = vst [vmem:[%s6421_s24 + $0x10] ss:$32 sm:$0x40] %v1295_v46  ;;  %4956 = vst [vmem:[%s6421_s24 + $0x10] ss:$32 sm:$0x80] %v1295_v46  ;;  %v1723_v46 = vpop.f32.mrf.mxu0 }
 0x266   : > { %5045 = vst [vmem:[%s6421_s24 + $0x12] ss:$32 sm:$0x1] %v1396_v47  ;;  %5046 = vst [vmem:[%s6421_s24 + $0x12] ss:$32 sm:$0x2] %v1396_v47 }
 0x267   : > { %5047 = vst [vmem:[%s6421_s24 + $0x12] ss:$32 sm:$0x4] %v1396_v47  ;;  %5048 = vst [vmem:[%s6421_s24 + $0x12] ss:$32 sm:$0x8] %v1396_v47 }
 0x268   : > { %5049 = vst [vmem:[%s6421_s24 + $0x12] ss:$32 sm:$0x10] %v1396_v47  ;;  %5050 = vst [vmem:[%s6421_s24 + $0x12] ss:$32 sm:$0x20] %v1396_v47 }
 0x269   : > { %5051 = vst [vmem:[%s6421_s24 + $0x12] ss:$32 sm:$0x40] %v1396_v47  ;;  %5052 = vst [vmem:[%s6421_s24 + $0x12] ss:$32 sm:$0x80] %v1396_v47  ;;  %v1824_v47 = vpop.f32.mrf.mxu1 }
 0x26a   : > { %4997 = vst [vmem:[%s6421_s24 + $0x11] ss:$32 sm:$0x1] %v1297_v48  ;;  %4998 = vst [vmem:[%s6421_s24 + $0x11] ss:$32 sm:$0x2] %v1297_v48 }
 0x26b   : > { %4999 = vst [vmem:[%s6421_s24 + $0x11] ss:$32 sm:$0x4] %v1297_v48  ;;  %5000 = vst [vmem:[%s6421_s24 + $0x11] ss:$32 sm:$0x8] %v1297_v48 }
 0x26c   : > { %5001 = vst [vmem:[%s6421_s24 + $0x11] ss:$32 sm:$0x10] %v1297_v48  ;;  %5002 = vst [vmem:[%s6421_s24 + $0x11] ss:$32 sm:$0x20] %v1297_v48 }
 0x26d   : > { %5003 = vst [vmem:[%s6421_s24 + $0x11] ss:$32 sm:$0x40] %v1297_v48  ;;  %5004 = vst [vmem:[%s6421_s24 + $0x11] ss:$32 sm:$0x80] %v1297_v48  ;;  %v1725_v48 = vpop.f32.mrf.mxu0 }
 0x26e   : > { %5093 = vst [vmem:[%s6421_s24 + $0x13] ss:$32 sm:$0x1] %v1398_v49  ;;  %5094 = vst [vmem:[%s6421_s24 + $0x13] ss:$32 sm:$0x2] %v1398_v49 }
 0x26f   : > { %5095 = vst [vmem:[%s6421_s24 + $0x13] ss:$32 sm:$0x4] %v1398_v49  ;;  %5096 = vst [vmem:[%s6421_s24 + $0x13] ss:$32 sm:$0x8] %v1398_v49 }
 0x270   : > { %5097 = vst [vmem:[%s6421_s24 + $0x13] ss:$32 sm:$0x10] %v1398_v49  ;;  %5098 = vst [vmem:[%s6421_s24 + $0x13] ss:$32 sm:$0x20] %v1398_v49 }
 0x271   : > { %5099 = vst [vmem:[%s6421_s24 + $0x13] ss:$32 sm:$0x40] %v1398_v49  ;;  %5100 = vst [vmem:[%s6421_s24 + $0x13] ss:$32 sm:$0x80] %v1398_v49  ;;  %v1826_v49 = vpop.f32.mrf.mxu1 }
 0x272   : > { %4957 = vst [vmem:[%s6421_s24 + $0x110] ss:$32 sm:$0x1] %v1301_v50  ;;  %4958 = vst [vmem:[%s6421_s24 + $0x110] ss:$32 sm:$0x2] %v1301_v50 }
 0x273   : > { %4959 = vst [vmem:[%s6421_s24 + $0x110] ss:$32 sm:$0x4] %v1301_v50  ;;  %4960 = vst [vmem:[%s6421_s24 + $0x110] ss:$32 sm:$0x8] %v1301_v50 }
 0x274   : > { %4961 = vst [vmem:[%s6421_s24 + $0x110] ss:$32 sm:$0x10] %v1301_v50  ;;  %4962 = vst [vmem:[%s6421_s24 + $0x110] ss:$32 sm:$0x20] %v1301_v50 }
 0x275   : > { %4963 = vst [vmem:[%s6421_s24 + $0x110] ss:$32 sm:$0x40] %v1301_v50  ;;  %4964 = vst [vmem:[%s6421_s24 + $0x110] ss:$32 sm:$0x80] %v1301_v50  ;;  %v1729_v50 = vpop.f32.mrf.mxu0 }
 0x276   : > { %5053 = vst [vmem:[%s6421_s24 + $0x112] ss:$32 sm:$0x1] %v1402_v51  ;;  %5054 = vst [vmem:[%s6421_s24 + $0x112] ss:$32 sm:$0x2] %v1402_v51 }
 0x277   : > { %5055 = vst [vmem:[%s6421_s24 + $0x112] ss:$32 sm:$0x4] %v1402_v51  ;;  %5056 = vst [vmem:[%s6421_s24 + $0x112] ss:$32 sm:$0x8] %v1402_v51 }
 0x278   : > { %5057 = vst [vmem:[%s6421_s24 + $0x112] ss:$32 sm:$0x10] %v1402_v51  ;;  %5058 = vst [vmem:[%s6421_s24 + $0x112] ss:$32 sm:$0x20] %v1402_v51 }
 0x279   : > { %5059 = vst [vmem:[%s6421_s24 + $0x112] ss:$32 sm:$0x40] %v1402_v51  ;;  %5060 = vst [vmem:[%s6421_s24 + $0x112] ss:$32 sm:$0x80] %v1402_v51  ;;  %v1830_v51 = vpop.f32.mrf.mxu1 }
 0x27a   : > { %5005 = vst [vmem:[%s6421_s24 + $0x111] ss:$32 sm:$0x1] %v1303_v52  ;;  %5006 = vst [vmem:[%s6421_s24 + $0x111] ss:$32 sm:$0x2] %v1303_v52 }
 0x27b   : > { %5007 = vst [vmem:[%s6421_s24 + $0x111] ss:$32 sm:$0x4] %v1303_v52  ;;  %5008 = vst [vmem:[%s6421_s24 + $0x111] ss:$32 sm:$0x8] %v1303_v52 }
 0x27c   : > { %5009 = vst [vmem:[%s6421_s24 + $0x111] ss:$32 sm:$0x10] %v1303_v52  ;;  %5010 = vst [vmem:[%s6421_s24 + $0x111] ss:$32 sm:$0x20] %v1303_v52 }
 0x27d   : > { %5011 = vst [vmem:[%s6421_s24 + $0x111] ss:$32 sm:$0x40] %v1303_v52  ;;  %5012 = vst [vmem:[%s6421_s24 + $0x111] ss:$32 sm:$0x80] %v1303_v52  ;;  %v1731_v52 = vpop.f32.mrf.mxu0 }
 0x27e   : > { %5101 = vst [vmem:[%s6421_s24 + $0x113] ss:$32 sm:$0x1] %v1404_v53  ;;  %5102 = vst [vmem:[%s6421_s24 + $0x113] ss:$32 sm:$0x2] %v1404_v53 }
 0x27f   : > { %5103 = vst [vmem:[%s6421_s24 + $0x113] ss:$32 sm:$0x4] %v1404_v53  ;;  %5104 = vst [vmem:[%s6421_s24 + $0x113] ss:$32 sm:$0x8] %v1404_v53 }
 0x280   : > { %5105 = vst [vmem:[%s6421_s24 + $0x113] ss:$32 sm:$0x10] %v1404_v53  ;;  %5106 = vst [vmem:[%s6421_s24 + $0x113] ss:$32 sm:$0x20] %v1404_v53 }
 0x281   : > { %5107 = vst [vmem:[%s6421_s24 + $0x113] ss:$32 sm:$0x40] %v1404_v53  ;;  %5108 = vst [vmem:[%s6421_s24 + $0x113] ss:$32 sm:$0x80] %v1404_v53  ;;  %v1832_v53 = vpop.f32.mrf.mxu1 }
 0x282   : > { %4965 = vst [vmem:[%s6421_s24 + $0x210] ss:$32 sm:$0x1] %v1307_v54  ;;  %4966 = vst [vmem:[%s6421_s24 + $0x210] ss:$32 sm:$0x2] %v1307_v54 }
 0x283   : > { %4967 = vst [vmem:[%s6421_s24 + $0x210] ss:$32 sm:$0x4] %v1307_v54  ;;  %4968 = vst [vmem:[%s6421_s24 + $0x210] ss:$32 sm:$0x8] %v1307_v54 }
 0x284   : > { %4969 = vst [vmem:[%s6421_s24 + $0x210] ss:$32 sm:$0x10] %v1307_v54  ;;  %4970 = vst [vmem:[%s6421_s24 + $0x210] ss:$32 sm:$0x20] %v1307_v54 }
 0x285   : > { %4971 = vst [vmem:[%s6421_s24 + $0x210] ss:$32 sm:$0x40] %v1307_v54  ;;  %4972 = vst [vmem:[%s6421_s24 + $0x210] ss:$32 sm:$0x80] %v1307_v54  ;;  %v1901_v54 = vpop.f32.mrf.mxu0 }
 0x286   : > { %5061 = vst [vmem:[%s6421_s24 + $0x212] ss:$32 sm:$0x1] %v1408_v55  ;;  %5062 = vst [vmem:[%s6421_s24 + $0x212] ss:$32 sm:$0x2] %v1408_v55 }
 0x287   : > { %5063 = vst [vmem:[%s6421_s24 + $0x212] ss:$32 sm:$0x4] %v1408_v55  ;;  %5064 = vst [vmem:[%s6421_s24 + $0x212] ss:$32 sm:$0x8] %v1408_v55 }
 0x288   : > { %5065 = vst [vmem:[%s6421_s24 + $0x212] ss:$32 sm:$0x10] %v1408_v55  ;;  %5066 = vst [vmem:[%s6421_s24 + $0x212] ss:$32 sm:$0x20] %v1408_v55 }
 0x289   : > { %5067 = vst [vmem:[%s6421_s24 + $0x212] ss:$32 sm:$0x40] %v1408_v55  ;;  %5068 = vst [vmem:[%s6421_s24 + $0x212] ss:$32 sm:$0x80] %v1408_v55  ;;  %v2002_v55 = vpop.f32.mrf.mxu1 }
 0x28a   : > { %5013 = vst [vmem:[%s6421_s24 + $0x211] ss:$32 sm:$0x1] %v1309_v56  ;;  %5014 = vst [vmem:[%s6421_s24 + $0x211] ss:$32 sm:$0x2] %v1309_v56 }
 0x28b   : > { %5015 = vst [vmem:[%s6421_s24 + $0x211] ss:$32 sm:$0x4] %v1309_v56  ;;  %5016 = vst [vmem:[%s6421_s24 + $0x211] ss:$32 sm:$0x8] %v1309_v56 }
 0x28c   : > { %5017 = vst [vmem:[%s6421_s24 + $0x211] ss:$32 sm:$0x10] %v1309_v56  ;;  %5018 = vst [vmem:[%s6421_s24 + $0x211] ss:$32 sm:$0x20] %v1309_v56 }
 0x28d   : > { %5019 = vst [vmem:[%s6421_s24 + $0x211] ss:$32 sm:$0x40] %v1309_v56  ;;  %5020 = vst [vmem:[%s6421_s24 + $0x211] ss:$32 sm:$0x80] %v1309_v56  ;;  %v1903_v56 = vpop.f32.mrf.mxu0 }
 0x28e   : > { %5109 = vst [vmem:[%s6421_s24 + $0x213] ss:$32 sm:$0x1] %v1410_v57  ;;  %5110 = vst [vmem:[%s6421_s24 + $0x213] ss:$32 sm:$0x2] %v1410_v57 }
 0x28f   : > { %5111 = vst [vmem:[%s6421_s24 + $0x213] ss:$32 sm:$0x4] %v1410_v57  ;;  %5112 = vst [vmem:[%s6421_s24 + $0x213] ss:$32 sm:$0x8] %v1410_v57 }
 0x290   : > { %5113 = vst [vmem:[%s6421_s24 + $0x213] ss:$32 sm:$0x10] %v1410_v57  ;;  %5114 = vst [vmem:[%s6421_s24 + $0x213] ss:$32 sm:$0x20] %v1410_v57 }
 0x291   : > { %5115 = vst [vmem:[%s6421_s24 + $0x213] ss:$32 sm:$0x40] %v1410_v57  ;;  %5116 = vst [vmem:[%s6421_s24 + $0x213] ss:$32 sm:$0x80] %v1410_v57  ;;  %v2004_v57 = vpop.f32.mrf.mxu1 }
 0x292   : > { %4973 = vst [vmem:[%s6421_s24 + $0x310] ss:$32 sm:$0x1] %v1313_v58  ;;  %4974 = vst [vmem:[%s6421_s24 + $0x310] ss:$32 sm:$0x2] %v1313_v58 }
 0x293   : > { %4975 = vst [vmem:[%s6421_s24 + $0x310] ss:$32 sm:$0x4] %v1313_v58  ;;  %4976 = vst [vmem:[%s6421_s24 + $0x310] ss:$32 sm:$0x8] %v1313_v58 }
 0x294   : > { %4977 = vst [vmem:[%s6421_s24 + $0x310] ss:$32 sm:$0x10] %v1313_v58  ;;  %4978 = vst [vmem:[%s6421_s24 + $0x310] ss:$32 sm:$0x20] %v1313_v58 }
 0x295   : > { %4979 = vst [vmem:[%s6421_s24 + $0x310] ss:$32 sm:$0x40] %v1313_v58  ;;  %4980 = vst [vmem:[%s6421_s24 + $0x310] ss:$32 sm:$0x80] %v1313_v58  ;;  %v1907_v58 = vpop.f32.mrf.mxu0 }
 0x296   : > { %5069 = vst [vmem:[%s6421_s24 + $0x312] ss:$32 sm:$0x1] %v1414_v59  ;;  %5070 = vst [vmem:[%s6421_s24 + $0x312] ss:$32 sm:$0x2] %v1414_v59 }
 0x297   : > { %5071 = vst [vmem:[%s6421_s24 + $0x312] ss:$32 sm:$0x4] %v1414_v59  ;;  %5072 = vst [vmem:[%s6421_s24 + $0x312] ss:$32 sm:$0x8] %v1414_v59 }
 0x298   : > { %5073 = vst [vmem:[%s6421_s24 + $0x312] ss:$32 sm:$0x10] %v1414_v59  ;;  %5074 = vst [vmem:[%s6421_s24 + $0x312] ss:$32 sm:$0x20] %v1414_v59 }
 0x299   : > { %5075 = vst [vmem:[%s6421_s24 + $0x312] ss:$32 sm:$0x40] %v1414_v59  ;;  %5076 = vst [vmem:[%s6421_s24 + $0x312] ss:$32 sm:$0x80] %v1414_v59  ;;  %v2008_v59 = vpop.f32.mrf.mxu1 }
 0x29a   : > { %5021 = vst [vmem:[%s6421_s24 + $0x311] ss:$32 sm:$0x1] %v1315_v60  ;;  %5022 = vst [vmem:[%s6421_s24 + $0x311] ss:$32 sm:$0x2] %v1315_v60 }
 0x29b   : > { %5023 = vst [vmem:[%s6421_s24 + $0x311] ss:$32 sm:$0x4] %v1315_v60  ;;  %5024 = vst [vmem:[%s6421_s24 + $0x311] ss:$32 sm:$0x8] %v1315_v60 }
 0x29c   : > { %5025 = vst [vmem:[%s6421_s24 + $0x311] ss:$32 sm:$0x10] %v1315_v60  ;;  %5026 = vst [vmem:[%s6421_s24 + $0x311] ss:$32 sm:$0x20] %v1315_v60 }
 0x29d   : > { %5027 = vst [vmem:[%s6421_s24 + $0x311] ss:$32 sm:$0x40] %v1315_v60  ;;  %5028 = vst [vmem:[%s6421_s24 + $0x311] ss:$32 sm:$0x80] %v1315_v60  ;;  %v1909_v60 = vpop.f32.mrf.mxu0 }
 0x29e   : > { %5117 = vst [vmem:[%s6421_s24 + $0x313] ss:$32 sm:$0x1] %v1416_v61  ;;  %5118 = vst [vmem:[%s6421_s24 + $0x313] ss:$32 sm:$0x2] %v1416_v61 }
 0x29f   : > { %5119 = vst [vmem:[%s6421_s24 + $0x313] ss:$32 sm:$0x4] %v1416_v61  ;;  %5120 = vst [vmem:[%s6421_s24 + $0x313] ss:$32 sm:$0x8] %v1416_v61 }
 0x2a0   : > { %5121 = vst [vmem:[%s6421_s24 + $0x313] ss:$32 sm:$0x10] %v1416_v61  ;;  %5122 = vst [vmem:[%s6421_s24 + $0x313] ss:$32 sm:$0x20] %v1416_v61 }
 0x2a1   : > { %5123 = vst [vmem:[%s6421_s24 + $0x313] ss:$32 sm:$0x40] %v1416_v61  ;;  %5124 = vst [vmem:[%s6421_s24 + $0x313] ss:$32 sm:$0x80] %v1416_v61  ;;  %v2010_v61 = vpop.f32.mrf.mxu1 }
 0x2a2   : > { %4981 = vst [vmem:[%s6421_s24 + $0x410] ss:$32 sm:$0x1] %v1319_v62  ;;  %4982 = vst [vmem:[%s6421_s24 + $0x410] ss:$32 sm:$0x2] %v1319_v62 }
 0x2a3   : > { %4983 = vst [vmem:[%s6421_s24 + $0x410] ss:$32 sm:$0x4] %v1319_v62  ;;  %4984 = vst [vmem:[%s6421_s24 + $0x410] ss:$32 sm:$0x8] %v1319_v62 }
 0x2a4   : > { %4985 = vst [vmem:[%s6421_s24 + $0x410] ss:$32 sm:$0x10] %v1319_v62  ;;  %4986 = vst [vmem:[%s6421_s24 + $0x410] ss:$32 sm:$0x20] %v1319_v62 }
 0x2a5   : > { %4987 = vst [vmem:[%s6421_s24 + $0x410] ss:$32 sm:$0x40] %v1319_v62  ;;  %4988 = vst [vmem:[%s6421_s24 + $0x410] ss:$32 sm:$0x80] %v1319_v62  ;;  %v1913_v62 = vpop.f32.mrf.mxu0 }
 0x2a6   : > { %5077 = vst [vmem:[%s6421_s24 + $0x412] ss:$32 sm:$0x1] %v1420_v63  ;;  %5078 = vst [vmem:[%s6421_s24 + $0x412] ss:$32 sm:$0x2] %v1420_v63 }
 0x2a7   : > { %5079 = vst [vmem:[%s6421_s24 + $0x412] ss:$32 sm:$0x4] %v1420_v63  ;;  %5080 = vst [vmem:[%s6421_s24 + $0x412] ss:$32 sm:$0x8] %v1420_v63 }
 0x2a8   : > { %5081 = vst [vmem:[%s6421_s24 + $0x412] ss:$32 sm:$0x10] %v1420_v63  ;;  %5082 = vst [vmem:[%s6421_s24 + $0x412] ss:$32 sm:$0x20] %v1420_v63 }
 0x2a9   : > { %5083 = vst [vmem:[%s6421_s24 + $0x412] ss:$32 sm:$0x40] %v1420_v63  ;;  %5084 = vst [vmem:[%s6421_s24 + $0x412] ss:$32 sm:$0x80] %v1420_v63  ;;  %v2014_v63 = vpop.f32.mrf.mxu1 }
 0x2aa   : > { %5029 = vst [vmem:[%s6421_s24 + $0x411] ss:$32 sm:$0x1] %v1321_v1  ;;  %5030 = vst [vmem:[%s6421_s24 + $0x411] ss:$32 sm:$0x2] %v1321_v1 }
 0x2ab   : > { %5031 = vst [vmem:[%s6421_s24 + $0x411] ss:$32 sm:$0x4] %v1321_v1  ;;  %5032 = vst [vmem:[%s6421_s24 + $0x411] ss:$32 sm:$0x8] %v1321_v1 }
 0x2ac   : > { %5033 = vst [vmem:[%s6421_s24 + $0x411] ss:$32 sm:$0x10] %v1321_v1  ;;  %5034 = vst [vmem:[%s6421_s24 + $0x411] ss:$32 sm:$0x20] %v1321_v1 }
 0x2ad   : > { %5035 = vst [vmem:[%s6421_s24 + $0x411] ss:$32 sm:$0x40] %v1321_v1  ;;  %5036 = vst [vmem:[%s6421_s24 + $0x411] ss:$32 sm:$0x80] %v1321_v1  ;;  %v1915_v1 = vpop.f32.mrf.mxu0 }
 0x2ae   : > { %5125 = vst [vmem:[%s6421_s24 + $0x413] ss:$32 sm:$0x1] %v1422_v2  ;;  %5126 = vst [vmem:[%s6421_s24 + $0x413] ss:$32 sm:$0x2] %v1422_v2 }
 0x2af   : > { %5127 = vst [vmem:[%s6421_s24 + $0x413] ss:$32 sm:$0x4] %v1422_v2  ;;  %5128 = vst [vmem:[%s6421_s24 + $0x413] ss:$32 sm:$0x8] %v1422_v2 }
 0x2b0   : > { %5129 = vst [vmem:[%s6421_s24 + $0x413] ss:$32 sm:$0x10] %v1422_v2  ;;  %5130 = vst [vmem:[%s6421_s24 + $0x413] ss:$32 sm:$0x20] %v1422_v2 }
 0x2b1   : > { %5131 = vst [vmem:[%s6421_s24 + $0x413] ss:$32 sm:$0x40] %v1422_v2  ;;  %5132 = vst [vmem:[%s6421_s24 + $0x413] ss:$32 sm:$0x80] %v1422_v2  ;;  %v2016_v2 = vpop.f32.mrf.mxu1 }
 0x2b2   : > { %4989 = vst [vmem:[%s6421_s24 + $0x510] ss:$32 sm:$0x1] %v1325_v3  ;;  %4990 = vst [vmem:[%s6421_s24 + $0x510] ss:$32 sm:$0x2] %v1325_v3 }
 0x2b3   : > { %4991 = vst [vmem:[%s6421_s24 + $0x510] ss:$32 sm:$0x4] %v1325_v3  ;;  %4992 = vst [vmem:[%s6421_s24 + $0x510] ss:$32 sm:$0x8] %v1325_v3 }
 0x2b4   : > { %4993 = vst [vmem:[%s6421_s24 + $0x510] ss:$32 sm:$0x10] %v1325_v3  ;;  %4994 = vst [vmem:[%s6421_s24 + $0x510] ss:$32 sm:$0x20] %v1325_v3 }
 0x2b5   : > { %4995 = vst [vmem:[%s6421_s24 + $0x510] ss:$32 sm:$0x40] %v1325_v3  ;;  %4996 = vst [vmem:[%s6421_s24 + $0x510] ss:$32 sm:$0x80] %v1325_v3  ;;  %v1919_v3 = vpop.f32.mrf.mxu0 }
 0x2b6   : > { %5085 = vst [vmem:[%s6421_s24 + $0x512] ss:$32 sm:$0x1] %v1426_v4  ;;  %5086 = vst [vmem:[%s6421_s24 + $0x512] ss:$32 sm:$0x2] %v1426_v4 }
 0x2b7   : > { %5087 = vst [vmem:[%s6421_s24 + $0x512] ss:$32 sm:$0x4] %v1426_v4  ;;  %5088 = vst [vmem:[%s6421_s24 + $0x512] ss:$32 sm:$0x8] %v1426_v4 }
 0x2b8   : > { %5089 = vst [vmem:[%s6421_s24 + $0x512] ss:$32 sm:$0x10] %v1426_v4  ;;  %5090 = vst [vmem:[%s6421_s24 + $0x512] ss:$32 sm:$0x20] %v1426_v4 }
 0x2b9   : > { %5091 = vst [vmem:[%s6421_s24 + $0x512] ss:$32 sm:$0x40] %v1426_v4  ;;  %5092 = vst [vmem:[%s6421_s24 + $0x512] ss:$32 sm:$0x80] %v1426_v4  ;;  %v2020_v4 = vpop.f32.mrf.mxu1 }
 0x2ba   : > { %5037 = vst [vmem:[%s6421_s24 + $0x511] ss:$32 sm:$0x1] %v1327_v5  ;;  %5038 = vst [vmem:[%s6421_s24 + $0x511] ss:$32 sm:$0x2] %v1327_v5 }
 0x2bb   : > { %5039 = vst [vmem:[%s6421_s24 + $0x511] ss:$32 sm:$0x4] %v1327_v5  ;;  %5040 = vst [vmem:[%s6421_s24 + $0x511] ss:$32 sm:$0x8] %v1327_v5 }
 0x2bc   : > { %5041 = vst [vmem:[%s6421_s24 + $0x511] ss:$32 sm:$0x10] %v1327_v5  ;;  %5042 = vst [vmem:[%s6421_s24 + $0x511] ss:$32 sm:$0x20] %v1327_v5 }
 0x2bd   : > { %5043 = vst [vmem:[%s6421_s24 + $0x511] ss:$32 sm:$0x40] %v1327_v5  ;;  %5044 = vst [vmem:[%s6421_s24 + $0x511] ss:$32 sm:$0x80] %v1327_v5  ;;  %v1921_v5 = vpop.f32.mrf.mxu0 }
 0x2be   : > { %5133 = vst [vmem:[%s6421_s24 + $0x513] ss:$32 sm:$0x1] %v1428_v6  ;;  %5134 = vst [vmem:[%s6421_s24 + $0x513] ss:$32 sm:$0x2] %v1428_v6 }
 0x2bf   : > { %5135 = vst [vmem:[%s6421_s24 + $0x513] ss:$32 sm:$0x4] %v1428_v6  ;;  %5136 = vst [vmem:[%s6421_s24 + $0x513] ss:$32 sm:$0x8] %v1428_v6 }
 0x2c0   : > { %5137 = vst [vmem:[%s6421_s24 + $0x513] ss:$32 sm:$0x10] %v1428_v6  ;;  %5138 = vst [vmem:[%s6421_s24 + $0x513] ss:$32 sm:$0x20] %v1428_v6 }
 0x2c1   : > { %5139 = vst [vmem:[%s6421_s24 + $0x513] ss:$32 sm:$0x40] %v1428_v6  ;;  %5140 = vst [vmem:[%s6421_s24 + $0x513] ss:$32 sm:$0x80] %v1428_v6  ;;  %v2022_v6 = vpop.f32.mrf.mxu1 }
 0x2c2   : > { %5141 = vst [vmem:[%s6421_s24 + $0x14] ss:$32 sm:$0x1] %v1497_v7  ;;  %5142 = vst [vmem:[%s6421_s24 + $0x14] ss:$32 sm:$0x2] %v1497_v7 }
 0x2c3   : > { %5143 = vst [vmem:[%s6421_s24 + $0x14] ss:$32 sm:$0x4] %v1497_v7  ;;  %5144 = vst [vmem:[%s6421_s24 + $0x14] ss:$32 sm:$0x8] %v1497_v7 }
 0x2c4   : > { %5145 = vst [vmem:[%s6421_s24 + $0x14] ss:$32 sm:$0x10] %v1497_v7  ;;  %5146 = vst [vmem:[%s6421_s24 + $0x14] ss:$32 sm:$0x20] %v1497_v7 }
 0x2c5   : > { %5147 = vst [vmem:[%s6421_s24 + $0x14] ss:$32 sm:$0x40] %v1497_v7  ;;  %5148 = vst [vmem:[%s6421_s24 + $0x14] ss:$32 sm:$0x80] %v1497_v7  ;;  %v1925_v7 = vpop.f32.mrf.mxu0 }
 0x2c6   : > { %5237 = vst [vmem:[%s6421_s24 + $0x16] ss:$32 sm:$0x1] %v1598_v8  ;;  %5238 = vst [vmem:[%s6421_s24 + $0x16] ss:$32 sm:$0x2] %v1598_v8 }
 0x2c7   : > { %5239 = vst [vmem:[%s6421_s24 + $0x16] ss:$32 sm:$0x4] %v1598_v8  ;;  %5240 = vst [vmem:[%s6421_s24 + $0x16] ss:$32 sm:$0x8] %v1598_v8 }
 0x2c8   : > { %5241 = vst [vmem:[%s6421_s24 + $0x16] ss:$32 sm:$0x10] %v1598_v8  ;;  %5242 = vst [vmem:[%s6421_s24 + $0x16] ss:$32 sm:$0x20] %v1598_v8 }
 0x2c9   : > { %5243 = vst [vmem:[%s6421_s24 + $0x16] ss:$32 sm:$0x40] %v1598_v8  ;;  %5244 = vst [vmem:[%s6421_s24 + $0x16] ss:$32 sm:$0x80] %v1598_v8  ;;  %v2026_v8 = vpop.f32.mrf.mxu1 }
 0x2ca   : > { %5189 = vst [vmem:[%s6421_s24 + $0x15] ss:$32 sm:$0x1] %v1499_v9  ;;  %5190 = vst [vmem:[%s6421_s24 + $0x15] ss:$32 sm:$0x2] %v1499_v9 }
 0x2cb   : > { %5191 = vst [vmem:[%s6421_s24 + $0x15] ss:$32 sm:$0x4] %v1499_v9  ;;  %5192 = vst [vmem:[%s6421_s24 + $0x15] ss:$32 sm:$0x8] %v1499_v9 }
 0x2cc   : > { %5193 = vst [vmem:[%s6421_s24 + $0x15] ss:$32 sm:$0x10] %v1499_v9  ;;  %5194 = vst [vmem:[%s6421_s24 + $0x15] ss:$32 sm:$0x20] %v1499_v9 }
 0x2cd   : > { %5195 = vst [vmem:[%s6421_s24 + $0x15] ss:$32 sm:$0x40] %v1499_v9  ;;  %5196 = vst [vmem:[%s6421_s24 + $0x15] ss:$32 sm:$0x80] %v1499_v9  ;;  %v1927_v9 = vpop.f32.mrf.mxu0 }
 0x2ce   : > { %5285 = vst [vmem:[%s6421_s24 + $0x17] ss:$32 sm:$0x1] %v1600_v10  ;;  %5286 = vst [vmem:[%s6421_s24 + $0x17] ss:$32 sm:$0x2] %v1600_v10 }
 0x2cf   : > { %5287 = vst [vmem:[%s6421_s24 + $0x17] ss:$32 sm:$0x4] %v1600_v10  ;;  %5288 = vst [vmem:[%s6421_s24 + $0x17] ss:$32 sm:$0x8] %v1600_v10 }
 0x2d0   : > { %5289 = vst [vmem:[%s6421_s24 + $0x17] ss:$32 sm:$0x10] %v1600_v10  ;;  %5290 = vst [vmem:[%s6421_s24 + $0x17] ss:$32 sm:$0x20] %v1600_v10 }
 0x2d1   : > { %5291 = vst [vmem:[%s6421_s24 + $0x17] ss:$32 sm:$0x40] %v1600_v10  ;;  %5292 = vst [vmem:[%s6421_s24 + $0x17] ss:$32 sm:$0x80] %v1600_v10  ;;  %v2028_v10 = vpop.f32.mrf.mxu1 }
 0x2d2   : > { %5149 = vst [vmem:[%s6421_s24 + $0x114] ss:$32 sm:$0x1] %v1503_v11  ;;  %5150 = vst [vmem:[%s6421_s24 + $0x114] ss:$32 sm:$0x2] %v1503_v11 }
 0x2d3   : > { %5151 = vst [vmem:[%s6421_s24 + $0x114] ss:$32 sm:$0x4] %v1503_v11  ;;  %5152 = vst [vmem:[%s6421_s24 + $0x114] ss:$32 sm:$0x8] %v1503_v11 }
 0x2d4   : > { %5153 = vst [vmem:[%s6421_s24 + $0x114] ss:$32 sm:$0x10] %v1503_v11  ;;  %5154 = vst [vmem:[%s6421_s24 + $0x114] ss:$32 sm:$0x20] %v1503_v11 }
 0x2d5   : > { %5155 = vst [vmem:[%s6421_s24 + $0x114] ss:$32 sm:$0x40] %v1503_v11  ;;  %5156 = vst [vmem:[%s6421_s24 + $0x114] ss:$32 sm:$0x80] %v1503_v11  ;;  %v1931_v11 = vpop.f32.mrf.mxu0 }
 0x2d6   : > { %5245 = vst [vmem:[%s6421_s24 + $0x116] ss:$32 sm:$0x1] %v1604_v12  ;;  %5246 = vst [vmem:[%s6421_s24 + $0x116] ss:$32 sm:$0x2] %v1604_v12 }
 0x2d7   : > { %5247 = vst [vmem:[%s6421_s24 + $0x116] ss:$32 sm:$0x4] %v1604_v12  ;;  %5248 = vst [vmem:[%s6421_s24 + $0x116] ss:$32 sm:$0x8] %v1604_v12 }
 0x2d8   : > { %5249 = vst [vmem:[%s6421_s24 + $0x116] ss:$32 sm:$0x10] %v1604_v12  ;;  %5250 = vst [vmem:[%s6421_s24 + $0x116] ss:$32 sm:$0x20] %v1604_v12 }
 0x2d9   : > { %5251 = vst [vmem:[%s6421_s24 + $0x116] ss:$32 sm:$0x40] %v1604_v12  ;;  %5252 = vst [vmem:[%s6421_s24 + $0x116] ss:$32 sm:$0x80] %v1604_v12  ;;  %v2032_v12 = vpop.f32.mrf.mxu1 }
 0x2da   : > { %5197 = vst [vmem:[%s6421_s24 + $0x115] ss:$32 sm:$0x1] %v1505_v13  ;;  %5198 = vst [vmem:[%s6421_s24 + $0x115] ss:$32 sm:$0x2] %v1505_v13 }
 0x2db   : > { %5199 = vst [vmem:[%s6421_s24 + $0x115] ss:$32 sm:$0x4] %v1505_v13  ;;  %5200 = vst [vmem:[%s6421_s24 + $0x115] ss:$32 sm:$0x8] %v1505_v13 }
 0x2dc   : > { %5201 = vst [vmem:[%s6421_s24 + $0x115] ss:$32 sm:$0x10] %v1505_v13  ;;  %5202 = vst [vmem:[%s6421_s24 + $0x115] ss:$32 sm:$0x20] %v1505_v13 }
 0x2dd   : > { %5203 = vst [vmem:[%s6421_s24 + $0x115] ss:$32 sm:$0x40] %v1505_v13  ;;  %5204 = vst [vmem:[%s6421_s24 + $0x115] ss:$32 sm:$0x80] %v1505_v13  ;;  %v1933_v13 = vpop.f32.mrf.mxu0 }
 0x2de   : > { %5293 = vst [vmem:[%s6421_s24 + $0x117] ss:$32 sm:$0x1] %v1606_v14  ;;  %5294 = vst [vmem:[%s6421_s24 + $0x117] ss:$32 sm:$0x2] %v1606_v14 }
 0x2df   : > { %5295 = vst [vmem:[%s6421_s24 + $0x117] ss:$32 sm:$0x4] %v1606_v14  ;;  %5296 = vst [vmem:[%s6421_s24 + $0x117] ss:$32 sm:$0x8] %v1606_v14 }
 0x2e0   : > { %5297 = vst [vmem:[%s6421_s24 + $0x117] ss:$32 sm:$0x10] %v1606_v14  ;;  %5298 = vst [vmem:[%s6421_s24 + $0x117] ss:$32 sm:$0x20] %v1606_v14 }
 0x2e1   : > { %5299 = vst [vmem:[%s6421_s24 + $0x117] ss:$32 sm:$0x40] %v1606_v14  ;;  %5300 = vst [vmem:[%s6421_s24 + $0x117] ss:$32 sm:$0x80] %v1606_v14  ;;  %v2034_v14 = vpop.f32.mrf.mxu1 }
 0x2e2   : > { %5157 = vst [vmem:[%s6421_s24 + $0x214] ss:$32 sm:$0x1] %v1509_v17  ;;  %5158 = vst [vmem:[%s6421_s24 + $0x214] ss:$32 sm:$0x2] %v1509_v17 }
 0x2e3   : > { %5159 = vst [vmem:[%s6421_s24 + $0x214] ss:$32 sm:$0x4] %v1509_v17  ;;  %5160 = vst [vmem:[%s6421_s24 + $0x214] ss:$32 sm:$0x8] %v1509_v17 }
 0x2e4   : > { %5161 = vst [vmem:[%s6421_s24 + $0x214] ss:$32 sm:$0x10] %v1509_v17  ;;  %5162 = vst [vmem:[%s6421_s24 + $0x214] ss:$32 sm:$0x20] %v1509_v17 }
 0x2e5   : > { %5163 = vst [vmem:[%s6421_s24 + $0x214] ss:$32 sm:$0x40] %v1509_v17  ;;  %5164 = vst [vmem:[%s6421_s24 + $0x214] ss:$32 sm:$0x80] %v1509_v17 }
 0x2e6   : > { %5253 = vst [vmem:[%s6421_s24 + $0x216] ss:$32 sm:$0x1] %v1610_v22  ;;  %5254 = vst [vmem:[%s6421_s24 + $0x216] ss:$32 sm:$0x2] %v1610_v22 }
 0x2e7   : > { %5255 = vst [vmem:[%s6421_s24 + $0x216] ss:$32 sm:$0x4] %v1610_v22  ;;  %5256 = vst [vmem:[%s6421_s24 + $0x216] ss:$32 sm:$0x8] %v1610_v22 }
 0x2e8   : > { %5257 = vst [vmem:[%s6421_s24 + $0x216] ss:$32 sm:$0x10] %v1610_v22  ;;  %5258 = vst [vmem:[%s6421_s24 + $0x216] ss:$32 sm:$0x20] %v1610_v22 }
 0x2e9   : > { %5259 = vst [vmem:[%s6421_s24 + $0x216] ss:$32 sm:$0x40] %v1610_v22  ;;  %5260 = vst [vmem:[%s6421_s24 + $0x216] ss:$32 sm:$0x80] %v1610_v22 }
 0x2ea   : > { %5205 = vst [vmem:[%s6421_s24 + $0x215] ss:$32 sm:$0x1] %v1511_v0  ;;  %5206 = vst [vmem:[%s6421_s24 + $0x215] ss:$32 sm:$0x2] %v1511_v0 }
 0x2eb   : > { %5207 = vst [vmem:[%s6421_s24 + $0x215] ss:$32 sm:$0x4] %v1511_v0  ;;  %5208 = vst [vmem:[%s6421_s24 + $0x215] ss:$32 sm:$0x8] %v1511_v0 }
 0x2ec   : > { %5209 = vst [vmem:[%s6421_s24 + $0x215] ss:$32 sm:$0x10] %v1511_v0  ;;  %5210 = vst [vmem:[%s6421_s24 + $0x215] ss:$32 sm:$0x20] %v1511_v0 }
 0x2ed   : > { %5211 = vst [vmem:[%s6421_s24 + $0x215] ss:$32 sm:$0x40] %v1511_v0  ;;  %5212 = vst [vmem:[%s6421_s24 + $0x215] ss:$32 sm:$0x80] %v1511_v0 }
 0x2ee   : > { %5301 = vst [vmem:[%s6421_s24 + $0x217] ss:$32 sm:$0x1] %v1612_v27  ;;  %5302 = vst [vmem:[%s6421_s24 + $0x217] ss:$32 sm:$0x2] %v1612_v27 }
 0x2ef   : > { %5303 = vst [vmem:[%s6421_s24 + $0x217] ss:$32 sm:$0x4] %v1612_v27  ;;  %5304 = vst [vmem:[%s6421_s24 + $0x217] ss:$32 sm:$0x8] %v1612_v27 }
 0x2f0   : > { %5305 = vst [vmem:[%s6421_s24 + $0x217] ss:$32 sm:$0x10] %v1612_v27  ;;  %5306 = vst [vmem:[%s6421_s24 + $0x217] ss:$32 sm:$0x20] %v1612_v27 }
 0x2f1   : > { %5307 = vst [vmem:[%s6421_s24 + $0x217] ss:$32 sm:$0x40] %v1612_v27  ;;  %5308 = vst [vmem:[%s6421_s24 + $0x217] ss:$32 sm:$0x80] %v1612_v27 }
 0x2f2   : > { %5165 = vst [vmem:[%s6421_s24 + $0x314] ss:$32 sm:$0x1] %v1515_v32  ;;  %5166 = vst [vmem:[%s6421_s24 + $0x314] ss:$32 sm:$0x2] %v1515_v32 }
 0x2f3   : > { %5167 = vst [vmem:[%s6421_s24 + $0x314] ss:$32 sm:$0x4] %v1515_v32  ;;  %5168 = vst [vmem:[%s6421_s24 + $0x314] ss:$32 sm:$0x8] %v1515_v32 }
 0x2f4   : > { %5169 = vst [vmem:[%s6421_s24 + $0x314] ss:$32 sm:$0x10] %v1515_v32  ;;  %5170 = vst [vmem:[%s6421_s24 + $0x314] ss:$32 sm:$0x20] %v1515_v32 }
 0x2f5   : > { %5171 = vst [vmem:[%s6421_s24 + $0x314] ss:$32 sm:$0x40] %v1515_v32  ;;  %5172 = vst [vmem:[%s6421_s24 + $0x314] ss:$32 sm:$0x80] %v1515_v32 }
 0x2f6   : > { %5261 = vst [vmem:[%s6421_s24 + $0x316] ss:$32 sm:$0x1] %v1616_v37  ;;  %5262 = vst [vmem:[%s6421_s24 + $0x316] ss:$32 sm:$0x2] %v1616_v37 }
 0x2f7   : > { %5263 = vst [vmem:[%s6421_s24 + $0x316] ss:$32 sm:$0x4] %v1616_v37  ;;  %5264 = vst [vmem:[%s6421_s24 + $0x316] ss:$32 sm:$0x8] %v1616_v37 }
 0x2f8   : > { %5265 = vst [vmem:[%s6421_s24 + $0x316] ss:$32 sm:$0x10] %v1616_v37  ;;  %5266 = vst [vmem:[%s6421_s24 + $0x316] ss:$32 sm:$0x20] %v1616_v37 }
 0x2f9   : > { %5267 = vst [vmem:[%s6421_s24 + $0x316] ss:$32 sm:$0x40] %v1616_v37  ;;  %5268 = vst [vmem:[%s6421_s24 + $0x316] ss:$32 sm:$0x80] %v1616_v37 }
 0x2fa   : > { %5213 = vst [vmem:[%s6421_s24 + $0x315] ss:$32 sm:$0x1] %v1517_v40  ;;  %5214 = vst [vmem:[%s6421_s24 + $0x315] ss:$32 sm:$0x2] %v1517_v40 }
 0x2fb   : > { %5215 = vst [vmem:[%s6421_s24 + $0x315] ss:$32 sm:$0x4] %v1517_v40  ;;  %5216 = vst [vmem:[%s6421_s24 + $0x315] ss:$32 sm:$0x8] %v1517_v40 }
 0x2fc   : > { %5217 = vst [vmem:[%s6421_s24 + $0x315] ss:$32 sm:$0x10] %v1517_v40  ;;  %5218 = vst [vmem:[%s6421_s24 + $0x315] ss:$32 sm:$0x20] %v1517_v40 }
 0x2fd   : > { %5219 = vst [vmem:[%s6421_s24 + $0x315] ss:$32 sm:$0x40] %v1517_v40  ;;  %5220 = vst [vmem:[%s6421_s24 + $0x315] ss:$32 sm:$0x80] %v1517_v40 }
 0x2fe   : > { %5309 = vst [vmem:[%s6421_s24 + $0x317] ss:$32 sm:$0x1] %v1618_v15  ;;  %5310 = vst [vmem:[%s6421_s24 + $0x317] ss:$32 sm:$0x2] %v1618_v15 }
 0x2ff   : > { %5311 = vst [vmem:[%s6421_s24 + $0x317] ss:$32 sm:$0x4] %v1618_v15  ;;  %5312 = vst [vmem:[%s6421_s24 + $0x317] ss:$32 sm:$0x8] %v1618_v15 }
 0x300   : > { %5313 = vst [vmem:[%s6421_s24 + $0x317] ss:$32 sm:$0x10] %v1618_v15  ;;  %5314 = vst [vmem:[%s6421_s24 + $0x317] ss:$32 sm:$0x20] %v1618_v15 }
 0x301   : > { %5315 = vst [vmem:[%s6421_s24 + $0x317] ss:$32 sm:$0x40] %v1618_v15  ;;  %5316 = vst [vmem:[%s6421_s24 + $0x317] ss:$32 sm:$0x80] %v1618_v15 }
 0x302   : > { %5173 = vst [vmem:[%s6421_s24 + $0x414] ss:$32 sm:$0x1] %v1521_v16  ;;  %5174 = vst [vmem:[%s6421_s24 + $0x414] ss:$32 sm:$0x2] %v1521_v16 }
 0x303   : > { %5175 = vst [vmem:[%s6421_s24 + $0x414] ss:$32 sm:$0x4] %v1521_v16  ;;  %5176 = vst [vmem:[%s6421_s24 + $0x414] ss:$32 sm:$0x8] %v1521_v16 }
 0x304   : > { %5177 = vst [vmem:[%s6421_s24 + $0x414] ss:$32 sm:$0x10] %v1521_v16  ;;  %5178 = vst [vmem:[%s6421_s24 + $0x414] ss:$32 sm:$0x20] %v1521_v16 }
 0x305   : > { %5179 = vst [vmem:[%s6421_s24 + $0x414] ss:$32 sm:$0x40] %v1521_v16  ;;  %5180 = vst [vmem:[%s6421_s24 + $0x414] ss:$32 sm:$0x80] %v1521_v16 }
 0x306   : > { %5269 = vst [vmem:[%s6421_s24 + $0x416] ss:$32 sm:$0x1] %v1622_v18  ;;  %5270 = vst [vmem:[%s6421_s24 + $0x416] ss:$32 sm:$0x2] %v1622_v18 }
 0x307   : > { %5271 = vst [vmem:[%s6421_s24 + $0x416] ss:$32 sm:$0x4] %v1622_v18  ;;  %5272 = vst [vmem:[%s6421_s24 + $0x416] ss:$32 sm:$0x8] %v1622_v18 }
 0x308   : > { %5273 = vst [vmem:[%s6421_s24 + $0x416] ss:$32 sm:$0x10] %v1622_v18  ;;  %5274 = vst [vmem:[%s6421_s24 + $0x416] ss:$32 sm:$0x20] %v1622_v18 }
 0x309   : > { %5275 = vst [vmem:[%s6421_s24 + $0x416] ss:$32 sm:$0x40] %v1622_v18  ;;  %5276 = vst [vmem:[%s6421_s24 + $0x416] ss:$32 sm:$0x80] %v1622_v18 }
 0x30a   : > { %5221 = vst [vmem:[%s6421_s24 + $0x415] ss:$32 sm:$0x1] %v1523_v19  ;;  %5222 = vst [vmem:[%s6421_s24 + $0x415] ss:$32 sm:$0x2] %v1523_v19 }
 0x30b   : > { %5223 = vst [vmem:[%s6421_s24 + $0x415] ss:$32 sm:$0x4] %v1523_v19  ;;  %5224 = vst [vmem:[%s6421_s24 + $0x415] ss:$32 sm:$0x8] %v1523_v19 }
 0x30c   : > { %5225 = vst [vmem:[%s6421_s24 + $0x415] ss:$32 sm:$0x10] %v1523_v19  ;;  %5226 = vst [vmem:[%s6421_s24 + $0x415] ss:$32 sm:$0x20] %v1523_v19 }
 0x30d   : > { %5227 = vst [vmem:[%s6421_s24 + $0x415] ss:$32 sm:$0x40] %v1523_v19  ;;  %5228 = vst [vmem:[%s6421_s24 + $0x415] ss:$32 sm:$0x80] %v1523_v19 }
 0x30e   : > { %5317 = vst [vmem:[%s6421_s24 + $0x417] ss:$32 sm:$0x1] %v1624_v20  ;;  %5318 = vst [vmem:[%s6421_s24 + $0x417] ss:$32 sm:$0x2] %v1624_v20 }
 0x30f   : > { %5319 = vst [vmem:[%s6421_s24 + $0x417] ss:$32 sm:$0x4] %v1624_v20  ;;  %5320 = vst [vmem:[%s6421_s24 + $0x417] ss:$32 sm:$0x8] %v1624_v20 }
 0x310   : > { %5321 = vst [vmem:[%s6421_s24 + $0x417] ss:$32 sm:$0x10] %v1624_v20  ;;  %5322 = vst [vmem:[%s6421_s24 + $0x417] ss:$32 sm:$0x20] %v1624_v20 }
 0x311   : > { %5323 = vst [vmem:[%s6421_s24 + $0x417] ss:$32 sm:$0x40] %v1624_v20  ;;  %5324 = vst [vmem:[%s6421_s24 + $0x417] ss:$32 sm:$0x80] %v1624_v20 }
 0x312   : > { %5181 = vst [vmem:[%s6421_s24 + $0x514] ss:$32 sm:$0x1] %v1527_v21  ;;  %5182 = vst [vmem:[%s6421_s24 + $0x514] ss:$32 sm:$0x2] %v1527_v21 }
 0x313   : > { %5183 = vst [vmem:[%s6421_s24 + $0x514] ss:$32 sm:$0x4] %v1527_v21  ;;  %5184 = vst [vmem:[%s6421_s24 + $0x514] ss:$32 sm:$0x8] %v1527_v21 }
 0x314   : > { %5185 = vst [vmem:[%s6421_s24 + $0x514] ss:$32 sm:$0x10] %v1527_v21  ;;  %5186 = vst [vmem:[%s6421_s24 + $0x514] ss:$32 sm:$0x20] %v1527_v21 }
 0x315   : > { %5187 = vst [vmem:[%s6421_s24 + $0x514] ss:$32 sm:$0x40] %v1527_v21  ;;  %5188 = vst [vmem:[%s6421_s24 + $0x514] ss:$32 sm:$0x80] %v1527_v21 }
 0x316   : > { %5277 = vst [vmem:[%s6421_s24 + $0x516] ss:$32 sm:$0x1] %v1628_v23  ;;  %5278 = vst [vmem:[%s6421_s24 + $0x516] ss:$32 sm:$0x2] %v1628_v23 }
 0x317   : > { %5279 = vst [vmem:[%s6421_s24 + $0x516] ss:$32 sm:$0x4] %v1628_v23  ;;  %5280 = vst [vmem:[%s6421_s24 + $0x516] ss:$32 sm:$0x8] %v1628_v23 }
 0x318   : > { %5281 = vst [vmem:[%s6421_s24 + $0x516] ss:$32 sm:$0x10] %v1628_v23  ;;  %5282 = vst [vmem:[%s6421_s24 + $0x516] ss:$32 sm:$0x20] %v1628_v23 }
 0x319   : > { %5283 = vst [vmem:[%s6421_s24 + $0x516] ss:$32 sm:$0x40] %v1628_v23  ;;  %5284 = vst [vmem:[%s6421_s24 + $0x516] ss:$32 sm:$0x80] %v1628_v23 }
 0x31a   : > { %5229 = vst [vmem:[%s6421_s24 + $0x515] ss:$32 sm:$0x1] %v1529_v24  ;;  %5230 = vst [vmem:[%s6421_s24 + $0x515] ss:$32 sm:$0x2] %v1529_v24 }
 0x31b   : > { %5231 = vst [vmem:[%s6421_s24 + $0x515] ss:$32 sm:$0x4] %v1529_v24  ;;  %5232 = vst [vmem:[%s6421_s24 + $0x515] ss:$32 sm:$0x8] %v1529_v24 }
 0x31c   : > { %5233 = vst [vmem:[%s6421_s24 + $0x515] ss:$32 sm:$0x10] %v1529_v24  ;;  %5234 = vst [vmem:[%s6421_s24 + $0x515] ss:$32 sm:$0x20] %v1529_v24 }
 0x31d   : > { %5235 = vst [vmem:[%s6421_s24 + $0x515] ss:$32 sm:$0x40] %v1529_v24  ;;  %5236 = vst [vmem:[%s6421_s24 + $0x515] ss:$32 sm:$0x80] %v1529_v24 }
 0x31e   : > { %5325 = vst [vmem:[%s6421_s24 + $0x517] ss:$32 sm:$0x1] %v1630_v25  ;;  %5326 = vst [vmem:[%s6421_s24 + $0x517] ss:$32 sm:$0x2] %v1630_v25 }
 0x31f   : > { %5327 = vst [vmem:[%s6421_s24 + $0x517] ss:$32 sm:$0x4] %v1630_v25  ;;  %5328 = vst [vmem:[%s6421_s24 + $0x517] ss:$32 sm:$0x8] %v1630_v25 }
 0x320   : > { %5329 = vst [vmem:[%s6421_s24 + $0x517] ss:$32 sm:$0x10] %v1630_v25  ;;  %5330 = vst [vmem:[%s6421_s24 + $0x517] ss:$32 sm:$0x20] %v1630_v25 }
 0x321   : > { %5331 = vst [vmem:[%s6421_s24 + $0x517] ss:$32 sm:$0x40] %v1630_v25  ;;  %5332 = vst [vmem:[%s6421_s24 + $0x517] ss:$32 sm:$0x80] %v1630_v25 }
 0x322   : > { %5333 = vst [vmem:[%s6421_s24 + $0x18] ss:$32 sm:$0x1] %v1699_v26  ;;  %5334 = vst [vmem:[%s6421_s24 + $0x18] ss:$32 sm:$0x2] %v1699_v26 }
 0x323   : > { %5335 = vst [vmem:[%s6421_s24 + $0x18] ss:$32 sm:$0x4] %v1699_v26  ;;  %5336 = vst [vmem:[%s6421_s24 + $0x18] ss:$32 sm:$0x8] %v1699_v26 }
 0x324   : > { %5337 = vst [vmem:[%s6421_s24 + $0x18] ss:$32 sm:$0x10] %v1699_v26  ;;  %5338 = vst [vmem:[%s6421_s24 + $0x18] ss:$32 sm:$0x20] %v1699_v26 }
 0x325   : > { %5339 = vst [vmem:[%s6421_s24 + $0x18] ss:$32 sm:$0x40] %v1699_v26  ;;  %5340 = vst [vmem:[%s6421_s24 + $0x18] ss:$32 sm:$0x80] %v1699_v26 }
 0x326   : > { %5429 = vst [vmem:[%s6421_s24 + $0x1a] ss:$32 sm:$0x1] %v1800_v28  ;;  %5430 = vst [vmem:[%s6421_s24 + $0x1a] ss:$32 sm:$0x2] %v1800_v28 }
 0x327   : > { %5431 = vst [vmem:[%s6421_s24 + $0x1a] ss:$32 sm:$0x4] %v1800_v28  ;;  %5432 = vst [vmem:[%s6421_s24 + $0x1a] ss:$32 sm:$0x8] %v1800_v28 }
 0x328   : > { %5433 = vst [vmem:[%s6421_s24 + $0x1a] ss:$32 sm:$0x10] %v1800_v28  ;;  %5434 = vst [vmem:[%s6421_s24 + $0x1a] ss:$32 sm:$0x20] %v1800_v28 }
 0x329   : > { %5435 = vst [vmem:[%s6421_s24 + $0x1a] ss:$32 sm:$0x40] %v1800_v28  ;;  %5436 = vst [vmem:[%s6421_s24 + $0x1a] ss:$32 sm:$0x80] %v1800_v28 }
 0x32a   : > { %5381 = vst [vmem:[%s6421_s24 + $0x19] ss:$32 sm:$0x1] %v1701_v29  ;;  %5382 = vst [vmem:[%s6421_s24 + $0x19] ss:$32 sm:$0x2] %v1701_v29 }
 0x32b   : > { %5383 = vst [vmem:[%s6421_s24 + $0x19] ss:$32 sm:$0x4] %v1701_v29  ;;  %5384 = vst [vmem:[%s6421_s24 + $0x19] ss:$32 sm:$0x8] %v1701_v29 }
 0x32c   : > { %5385 = vst [vmem:[%s6421_s24 + $0x19] ss:$32 sm:$0x10] %v1701_v29  ;;  %5386 = vst [vmem:[%s6421_s24 + $0x19] ss:$32 sm:$0x20] %v1701_v29 }
 0x32d   : > { %5387 = vst [vmem:[%s6421_s24 + $0x19] ss:$32 sm:$0x40] %v1701_v29  ;;  %5388 = vst [vmem:[%s6421_s24 + $0x19] ss:$32 sm:$0x80] %v1701_v29 }
 0x32e   : > { %5477 = vst [vmem:[%s6421_s24 + $0x1b] ss:$32 sm:$0x1] %v1802_v30  ;;  %5478 = vst [vmem:[%s6421_s24 + $0x1b] ss:$32 sm:$0x2] %v1802_v30 }
 0x32f   : > { %5479 = vst [vmem:[%s6421_s24 + $0x1b] ss:$32 sm:$0x4] %v1802_v30  ;;  %5480 = vst [vmem:[%s6421_s24 + $0x1b] ss:$32 sm:$0x8] %v1802_v30 }
 0x330   : > { %5481 = vst [vmem:[%s6421_s24 + $0x1b] ss:$32 sm:$0x10] %v1802_v30  ;;  %5482 = vst [vmem:[%s6421_s24 + $0x1b] ss:$32 sm:$0x20] %v1802_v30 }
 0x331   : > { %5483 = vst [vmem:[%s6421_s24 + $0x1b] ss:$32 sm:$0x40] %v1802_v30  ;;  %5484 = vst [vmem:[%s6421_s24 + $0x1b] ss:$32 sm:$0x80] %v1802_v30 }
 0x332   : > { %5341 = vst [vmem:[%s6421_s24 + $0x118] ss:$32 sm:$0x1] %v1705_v31  ;;  %5342 = vst [vmem:[%s6421_s24 + $0x118] ss:$32 sm:$0x2] %v1705_v31 }
 0x333   : > { %5343 = vst [vmem:[%s6421_s24 + $0x118] ss:$32 sm:$0x4] %v1705_v31  ;;  %5344 = vst [vmem:[%s6421_s24 + $0x118] ss:$32 sm:$0x8] %v1705_v31 }
 0x334   : > { %5345 = vst [vmem:[%s6421_s24 + $0x118] ss:$32 sm:$0x10] %v1705_v31  ;;  %5346 = vst [vmem:[%s6421_s24 + $0x118] ss:$32 sm:$0x20] %v1705_v31 }
 0x335   : > { %5347 = vst [vmem:[%s6421_s24 + $0x118] ss:$32 sm:$0x40] %v1705_v31  ;;  %5348 = vst [vmem:[%s6421_s24 + $0x118] ss:$32 sm:$0x80] %v1705_v31 }
 0x336   : > { %5437 = vst [vmem:[%s6421_s24 + $0x11a] ss:$32 sm:$0x1] %v1806_v33  ;;  %5438 = vst [vmem:[%s6421_s24 + $0x11a] ss:$32 sm:$0x2] %v1806_v33 }
 0x337   : > { %5439 = vst [vmem:[%s6421_s24 + $0x11a] ss:$32 sm:$0x4] %v1806_v33  ;;  %5440 = vst [vmem:[%s6421_s24 + $0x11a] ss:$32 sm:$0x8] %v1806_v33 }
 0x338   : > { %5441 = vst [vmem:[%s6421_s24 + $0x11a] ss:$32 sm:$0x10] %v1806_v33  ;;  %5442 = vst [vmem:[%s6421_s24 + $0x11a] ss:$32 sm:$0x20] %v1806_v33 }
 0x339   : > { %5443 = vst [vmem:[%s6421_s24 + $0x11a] ss:$32 sm:$0x40] %v1806_v33  ;;  %5444 = vst [vmem:[%s6421_s24 + $0x11a] ss:$32 sm:$0x80] %v1806_v33 }
 0x33a   : > { %5389 = vst [vmem:[%s6421_s24 + $0x119] ss:$32 sm:$0x1] %v1707_v34  ;;  %5390 = vst [vmem:[%s6421_s24 + $0x119] ss:$32 sm:$0x2] %v1707_v34 }
 0x33b   : > { %5391 = vst [vmem:[%s6421_s24 + $0x119] ss:$32 sm:$0x4] %v1707_v34  ;;  %5392 = vst [vmem:[%s6421_s24 + $0x119] ss:$32 sm:$0x8] %v1707_v34 }
 0x33c   : > { %5393 = vst [vmem:[%s6421_s24 + $0x119] ss:$32 sm:$0x10] %v1707_v34  ;;  %5394 = vst [vmem:[%s6421_s24 + $0x119] ss:$32 sm:$0x20] %v1707_v34 }
 0x33d   : > { %5395 = vst [vmem:[%s6421_s24 + $0x119] ss:$32 sm:$0x40] %v1707_v34  ;;  %5396 = vst [vmem:[%s6421_s24 + $0x119] ss:$32 sm:$0x80] %v1707_v34 }
 0x33e   : > { %5485 = vst [vmem:[%s6421_s24 + $0x11b] ss:$32 sm:$0x1] %v1808_v35  ;;  %5486 = vst [vmem:[%s6421_s24 + $0x11b] ss:$32 sm:$0x2] %v1808_v35 }
 0x33f   : > { %5487 = vst [vmem:[%s6421_s24 + $0x11b] ss:$32 sm:$0x4] %v1808_v35  ;;  %5488 = vst [vmem:[%s6421_s24 + $0x11b] ss:$32 sm:$0x8] %v1808_v35 }
 0x340   : > { %5489 = vst [vmem:[%s6421_s24 + $0x11b] ss:$32 sm:$0x10] %v1808_v35  ;;  %5490 = vst [vmem:[%s6421_s24 + $0x11b] ss:$32 sm:$0x20] %v1808_v35 }
 0x341   : > { %5491 = vst [vmem:[%s6421_s24 + $0x11b] ss:$32 sm:$0x40] %v1808_v35  ;;  %5492 = vst [vmem:[%s6421_s24 + $0x11b] ss:$32 sm:$0x80] %v1808_v35 }
 0x342   : > { %5349 = vst [vmem:[%s6421_s24 + $0x218] ss:$32 sm:$0x1] %v1711_v36  ;;  %5350 = vst [vmem:[%s6421_s24 + $0x218] ss:$32 sm:$0x2] %v1711_v36 }
 0x343   : > { %5351 = vst [vmem:[%s6421_s24 + $0x218] ss:$32 sm:$0x4] %v1711_v36  ;;  %5352 = vst [vmem:[%s6421_s24 + $0x218] ss:$32 sm:$0x8] %v1711_v36 }
 0x344   : > { %5353 = vst [vmem:[%s6421_s24 + $0x218] ss:$32 sm:$0x10] %v1711_v36  ;;  %5354 = vst [vmem:[%s6421_s24 + $0x218] ss:$32 sm:$0x20] %v1711_v36 }
 0x345   : > { %5355 = vst [vmem:[%s6421_s24 + $0x218] ss:$32 sm:$0x40] %v1711_v36  ;;  %5356 = vst [vmem:[%s6421_s24 + $0x218] ss:$32 sm:$0x80] %v1711_v36 }
 0x346   : > { %5445 = vst [vmem:[%s6421_s24 + $0x21a] ss:$32 sm:$0x1] %v1812_v38  ;;  %5446 = vst [vmem:[%s6421_s24 + $0x21a] ss:$32 sm:$0x2] %v1812_v38 }
 0x347   : > { %5447 = vst [vmem:[%s6421_s24 + $0x21a] ss:$32 sm:$0x4] %v1812_v38  ;;  %5448 = vst [vmem:[%s6421_s24 + $0x21a] ss:$32 sm:$0x8] %v1812_v38 }
 0x348   : > { %5449 = vst [vmem:[%s6421_s24 + $0x21a] ss:$32 sm:$0x10] %v1812_v38  ;;  %5450 = vst [vmem:[%s6421_s24 + $0x21a] ss:$32 sm:$0x20] %v1812_v38 }
 0x349   : > { %5451 = vst [vmem:[%s6421_s24 + $0x21a] ss:$32 sm:$0x40] %v1812_v38  ;;  %5452 = vst [vmem:[%s6421_s24 + $0x21a] ss:$32 sm:$0x80] %v1812_v38 }
 0x34a   : > { %5397 = vst [vmem:[%s6421_s24 + $0x219] ss:$32 sm:$0x1] %v1713_v39  ;;  %5398 = vst [vmem:[%s6421_s24 + $0x219] ss:$32 sm:$0x2] %v1713_v39 }
 0x34b   : > { %5399 = vst [vmem:[%s6421_s24 + $0x219] ss:$32 sm:$0x4] %v1713_v39  ;;  %5400 = vst [vmem:[%s6421_s24 + $0x219] ss:$32 sm:$0x8] %v1713_v39 }
 0x34c   : > { %5401 = vst [vmem:[%s6421_s24 + $0x219] ss:$32 sm:$0x10] %v1713_v39  ;;  %5402 = vst [vmem:[%s6421_s24 + $0x219] ss:$32 sm:$0x20] %v1713_v39 }
 0x34d   : > { %5403 = vst [vmem:[%s6421_s24 + $0x219] ss:$32 sm:$0x40] %v1713_v39  ;;  %5404 = vst [vmem:[%s6421_s24 + $0x219] ss:$32 sm:$0x80] %v1713_v39 }
 0x34e   : > { %5493 = vst [vmem:[%s6421_s24 + $0x21b] ss:$32 sm:$0x1] %v1814_v41  ;;  %5494 = vst [vmem:[%s6421_s24 + $0x21b] ss:$32 sm:$0x2] %v1814_v41 }
 0x34f   : > { %5495 = vst [vmem:[%s6421_s24 + $0x21b] ss:$32 sm:$0x4] %v1814_v41  ;;  %5496 = vst [vmem:[%s6421_s24 + $0x21b] ss:$32 sm:$0x8] %v1814_v41 }
 0x350   : > { %5497 = vst [vmem:[%s6421_s24 + $0x21b] ss:$32 sm:$0x10] %v1814_v41  ;;  %5498 = vst [vmem:[%s6421_s24 + $0x21b] ss:$32 sm:$0x20] %v1814_v41 }
 0x351   : > { %5499 = vst [vmem:[%s6421_s24 + $0x21b] ss:$32 sm:$0x40] %v1814_v41  ;;  %5500 = vst [vmem:[%s6421_s24 + $0x21b] ss:$32 sm:$0x80] %v1814_v41 }
 0x352   : > { %5357 = vst [vmem:[%s6421_s24 + $0x318] ss:$32 sm:$0x1] %v1717_v42  ;;  %5358 = vst [vmem:[%s6421_s24 + $0x318] ss:$32 sm:$0x2] %v1717_v42 }
 0x353   : > { %5359 = vst [vmem:[%s6421_s24 + $0x318] ss:$32 sm:$0x4] %v1717_v42  ;;  %5360 = vst [vmem:[%s6421_s24 + $0x318] ss:$32 sm:$0x8] %v1717_v42 }
 0x354   : > { %5361 = vst [vmem:[%s6421_s24 + $0x318] ss:$32 sm:$0x10] %v1717_v42  ;;  %5362 = vst [vmem:[%s6421_s24 + $0x318] ss:$32 sm:$0x20] %v1717_v42 }
 0x355   : > { %5363 = vst [vmem:[%s6421_s24 + $0x318] ss:$32 sm:$0x40] %v1717_v42  ;;  %5364 = vst [vmem:[%s6421_s24 + $0x318] ss:$32 sm:$0x80] %v1717_v42 }
 0x356   : > { %5453 = vst [vmem:[%s6421_s24 + $0x31a] ss:$32 sm:$0x1] %v1818_v43  ;;  %5454 = vst [vmem:[%s6421_s24 + $0x31a] ss:$32 sm:$0x2] %v1818_v43 }
 0x357   : > { %5455 = vst [vmem:[%s6421_s24 + $0x31a] ss:$32 sm:$0x4] %v1818_v43  ;;  %5456 = vst [vmem:[%s6421_s24 + $0x31a] ss:$32 sm:$0x8] %v1818_v43 }
 0x358   : > { %5457 = vst [vmem:[%s6421_s24 + $0x31a] ss:$32 sm:$0x10] %v1818_v43  ;;  %5458 = vst [vmem:[%s6421_s24 + $0x31a] ss:$32 sm:$0x20] %v1818_v43 }
 0x359   : > { %5459 = vst [vmem:[%s6421_s24 + $0x31a] ss:$32 sm:$0x40] %v1818_v43  ;;  %5460 = vst [vmem:[%s6421_s24 + $0x31a] ss:$32 sm:$0x80] %v1818_v43 }
 0x35a   : > { %5405 = vst [vmem:[%s6421_s24 + $0x319] ss:$32 sm:$0x1] %v1719_v44  ;;  %5406 = vst [vmem:[%s6421_s24 + $0x319] ss:$32 sm:$0x2] %v1719_v44 }
 0x35b   : > { %5407 = vst [vmem:[%s6421_s24 + $0x319] ss:$32 sm:$0x4] %v1719_v44  ;;  %5408 = vst [vmem:[%s6421_s24 + $0x319] ss:$32 sm:$0x8] %v1719_v44 }
 0x35c   : > { %5409 = vst [vmem:[%s6421_s24 + $0x319] ss:$32 sm:$0x10] %v1719_v44  ;;  %5410 = vst [vmem:[%s6421_s24 + $0x319] ss:$32 sm:$0x20] %v1719_v44 }
 0x35d   : > { %5411 = vst [vmem:[%s6421_s24 + $0x319] ss:$32 sm:$0x40] %v1719_v44  ;;  %5412 = vst [vmem:[%s6421_s24 + $0x319] ss:$32 sm:$0x80] %v1719_v44 }
 0x35e   : > { %5501 = vst [vmem:[%s6421_s24 + $0x31b] ss:$32 sm:$0x1] %v1820_v45  ;;  %5502 = vst [vmem:[%s6421_s24 + $0x31b] ss:$32 sm:$0x2] %v1820_v45 }
 0x35f   : > { %5503 = vst [vmem:[%s6421_s24 + $0x31b] ss:$32 sm:$0x4] %v1820_v45  ;;  %5504 = vst [vmem:[%s6421_s24 + $0x31b] ss:$32 sm:$0x8] %v1820_v45 }
 0x360   : > { %5505 = vst [vmem:[%s6421_s24 + $0x31b] ss:$32 sm:$0x10] %v1820_v45  ;;  %5506 = vst [vmem:[%s6421_s24 + $0x31b] ss:$32 sm:$0x20] %v1820_v45 }
 0x361   : > { %5507 = vst [vmem:[%s6421_s24 + $0x31b] ss:$32 sm:$0x40] %v1820_v45  ;;  %5508 = vst [vmem:[%s6421_s24 + $0x31b] ss:$32 sm:$0x80] %v1820_v45 }
 0x362   : > { %5365 = vst [vmem:[%s6421_s24 + $0x418] ss:$32 sm:$0x1] %v1723_v46  ;;  %5366 = vst [vmem:[%s6421_s24 + $0x418] ss:$32 sm:$0x2] %v1723_v46 }
 0x363   : > { %5367 = vst [vmem:[%s6421_s24 + $0x418] ss:$32 sm:$0x4] %v1723_v46  ;;  %5368 = vst [vmem:[%s6421_s24 + $0x418] ss:$32 sm:$0x8] %v1723_v46 }
 0x364   : > { %5369 = vst [vmem:[%s6421_s24 + $0x418] ss:$32 sm:$0x10] %v1723_v46  ;;  %5370 = vst [vmem:[%s6421_s24 + $0x418] ss:$32 sm:$0x20] %v1723_v46 }
 0x365   : > { %5371 = vst [vmem:[%s6421_s24 + $0x418] ss:$32 sm:$0x40] %v1723_v46  ;;  %5372 = vst [vmem:[%s6421_s24 + $0x418] ss:$32 sm:$0x80] %v1723_v46 }
 0x366   : > { %5461 = vst [vmem:[%s6421_s24 + $0x41a] ss:$32 sm:$0x1] %v1824_v47  ;;  %5462 = vst [vmem:[%s6421_s24 + $0x41a] ss:$32 sm:$0x2] %v1824_v47 }
 0x367   : > { %5463 = vst [vmem:[%s6421_s24 + $0x41a] ss:$32 sm:$0x4] %v1824_v47  ;;  %5464 = vst [vmem:[%s6421_s24 + $0x41a] ss:$32 sm:$0x8] %v1824_v47 }
 0x368   : > { %5465 = vst [vmem:[%s6421_s24 + $0x41a] ss:$32 sm:$0x10] %v1824_v47  ;;  %5466 = vst [vmem:[%s6421_s24 + $0x41a] ss:$32 sm:$0x20] %v1824_v47 }
 0x369   : > { %5467 = vst [vmem:[%s6421_s24 + $0x41a] ss:$32 sm:$0x40] %v1824_v47  ;;  %5468 = vst [vmem:[%s6421_s24 + $0x41a] ss:$32 sm:$0x80] %v1824_v47 }
 0x36a   : > { %5413 = vst [vmem:[%s6421_s24 + $0x419] ss:$32 sm:$0x1] %v1725_v48  ;;  %5414 = vst [vmem:[%s6421_s24 + $0x419] ss:$32 sm:$0x2] %v1725_v48 }
 0x36b   : > { %5415 = vst [vmem:[%s6421_s24 + $0x419] ss:$32 sm:$0x4] %v1725_v48  ;;  %5416 = vst [vmem:[%s6421_s24 + $0x419] ss:$32 sm:$0x8] %v1725_v48 }
 0x36c   : > { %5417 = vst [vmem:[%s6421_s24 + $0x419] ss:$32 sm:$0x10] %v1725_v48  ;;  %5418 = vst [vmem:[%s6421_s24 + $0x419] ss:$32 sm:$0x20] %v1725_v48 }
 0x36d   : > { %5419 = vst [vmem:[%s6421_s24 + $0x419] ss:$32 sm:$0x40] %v1725_v48  ;;  %5420 = vst [vmem:[%s6421_s24 + $0x419] ss:$32 sm:$0x80] %v1725_v48 }
 0x36e   : > { %5509 = vst [vmem:[%s6421_s24 + $0x41b] ss:$32 sm:$0x1] %v1826_v49  ;;  %5510 = vst [vmem:[%s6421_s24 + $0x41b] ss:$32 sm:$0x2] %v1826_v49 }
 0x36f   : > { %5511 = vst [vmem:[%s6421_s24 + $0x41b] ss:$32 sm:$0x4] %v1826_v49  ;;  %5512 = vst [vmem:[%s6421_s24 + $0x41b] ss:$32 sm:$0x8] %v1826_v49 }
 0x370   : > { %5513 = vst [vmem:[%s6421_s24 + $0x41b] ss:$32 sm:$0x10] %v1826_v49  ;;  %5514 = vst [vmem:[%s6421_s24 + $0x41b] ss:$32 sm:$0x20] %v1826_v49 }
 0x371   : > { %5515 = vst [vmem:[%s6421_s24 + $0x41b] ss:$32 sm:$0x40] %v1826_v49  ;;  %5516 = vst [vmem:[%s6421_s24 + $0x41b] ss:$32 sm:$0x80] %v1826_v49 }
 0x372   : > { %5373 = vst [vmem:[%s6421_s24 + $0x518] ss:$32 sm:$0x1] %v1729_v50  ;;  %5374 = vst [vmem:[%s6421_s24 + $0x518] ss:$32 sm:$0x2] %v1729_v50 }
 0x373   : > { %5375 = vst [vmem:[%s6421_s24 + $0x518] ss:$32 sm:$0x4] %v1729_v50  ;;  %5376 = vst [vmem:[%s6421_s24 + $0x518] ss:$32 sm:$0x8] %v1729_v50 }
 0x374   : > { %5377 = vst [vmem:[%s6421_s24 + $0x518] ss:$32 sm:$0x10] %v1729_v50  ;;  %5378 = vst [vmem:[%s6421_s24 + $0x518] ss:$32 sm:$0x20] %v1729_v50 }
 0x375   : > { %5379 = vst [vmem:[%s6421_s24 + $0x518] ss:$32 sm:$0x40] %v1729_v50  ;;  %5380 = vst [vmem:[%s6421_s24 + $0x518] ss:$32 sm:$0x80] %v1729_v50 }
 0x376   : > { %5469 = vst [vmem:[%s6421_s24 + $0x51a] ss:$32 sm:$0x1] %v1830_v51  ;;  %5470 = vst [vmem:[%s6421_s24 + $0x51a] ss:$32 sm:$0x2] %v1830_v51 }
 0x377   : > { %5471 = vst [vmem:[%s6421_s24 + $0x51a] ss:$32 sm:$0x4] %v1830_v51  ;;  %5472 = vst [vmem:[%s6421_s24 + $0x51a] ss:$32 sm:$0x8] %v1830_v51 }
 0x378   : > { %5473 = vst [vmem:[%s6421_s24 + $0x51a] ss:$32 sm:$0x10] %v1830_v51  ;;  %5474 = vst [vmem:[%s6421_s24 + $0x51a] ss:$32 sm:$0x20] %v1830_v51 }
 0x379   : > { %5475 = vst [vmem:[%s6421_s24 + $0x51a] ss:$32 sm:$0x40] %v1830_v51  ;;  %5476 = vst [vmem:[%s6421_s24 + $0x51a] ss:$32 sm:$0x80] %v1830_v51 }
 0x37a   : > { %5421 = vst [vmem:[%s6421_s24 + $0x519] ss:$32 sm:$0x1] %v1731_v52  ;;  %5422 = vst [vmem:[%s6421_s24 + $0x519] ss:$32 sm:$0x2] %v1731_v52 }
 0x37b   : > { %5423 = vst [vmem:[%s6421_s24 + $0x519] ss:$32 sm:$0x4] %v1731_v52  ;;  %5424 = vst [vmem:[%s6421_s24 + $0x519] ss:$32 sm:$0x8] %v1731_v52 }
 0x37c   : > { %5425 = vst [vmem:[%s6421_s24 + $0x519] ss:$32 sm:$0x10] %v1731_v52  ;;  %5426 = vst [vmem:[%s6421_s24 + $0x519] ss:$32 sm:$0x20] %v1731_v52 }
 0x37d   : > { %5427 = vst [vmem:[%s6421_s24 + $0x519] ss:$32 sm:$0x40] %v1731_v52  ;;  %5428 = vst [vmem:[%s6421_s24 + $0x519] ss:$32 sm:$0x80] %v1731_v52 }
 0x37e   : > { %5517 = vst [vmem:[%s6421_s24 + $0x51b] ss:$32 sm:$0x1] %v1832_v53  ;;  %5518 = vst [vmem:[%s6421_s24 + $0x51b] ss:$32 sm:$0x2] %v1832_v53 }
 0x37f   : > { %5519 = vst [vmem:[%s6421_s24 + $0x51b] ss:$32 sm:$0x4] %v1832_v53  ;;  %5520 = vst [vmem:[%s6421_s24 + $0x51b] ss:$32 sm:$0x8] %v1832_v53 }
 0x380   : > { %5521 = vst [vmem:[%s6421_s24 + $0x51b] ss:$32 sm:$0x10] %v1832_v53  ;;  %5522 = vst [vmem:[%s6421_s24 + $0x51b] ss:$32 sm:$0x20] %v1832_v53 }
 0x381   : > { %5523 = vst [vmem:[%s6421_s24 + $0x51b] ss:$32 sm:$0x40] %v1832_v53  ;;  %5524 = vst [vmem:[%s6421_s24 + $0x51b] ss:$32 sm:$0x80] %v1832_v53 }
 0x382   : > { %5525 = vst [vmem:[%s6421_s24 + $0x1c] ss:$32 sm:$0x1] %v1901_v54  ;;  %5526 = vst [vmem:[%s6421_s24 + $0x1c] ss:$32 sm:$0x2] %v1901_v54 }
 0x383   : > { %5527 = vst [vmem:[%s6421_s24 + $0x1c] ss:$32 sm:$0x4] %v1901_v54  ;;  %5528 = vst [vmem:[%s6421_s24 + $0x1c] ss:$32 sm:$0x8] %v1901_v54 }
 0x384   : > { %5529 = vst [vmem:[%s6421_s24 + $0x1c] ss:$32 sm:$0x10] %v1901_v54  ;;  %5530 = vst [vmem:[%s6421_s24 + $0x1c] ss:$32 sm:$0x20] %v1901_v54 }
 0x385   : > { %5531 = vst [vmem:[%s6421_s24 + $0x1c] ss:$32 sm:$0x40] %v1901_v54  ;;  %5532 = vst [vmem:[%s6421_s24 + $0x1c] ss:$32 sm:$0x80] %v1901_v54 }
 0x386   : > { %5621 = vst [vmem:[%s6421_s24 + $0x1e] ss:$32 sm:$0x1] %v2002_v55  ;;  %5622 = vst [vmem:[%s6421_s24 + $0x1e] ss:$32 sm:$0x2] %v2002_v55 }
 0x387   : > { %5623 = vst [vmem:[%s6421_s24 + $0x1e] ss:$32 sm:$0x4] %v2002_v55  ;;  %5624 = vst [vmem:[%s6421_s24 + $0x1e] ss:$32 sm:$0x8] %v2002_v55 }
 0x388   : > { %5625 = vst [vmem:[%s6421_s24 + $0x1e] ss:$32 sm:$0x10] %v2002_v55  ;;  %5626 = vst [vmem:[%s6421_s24 + $0x1e] ss:$32 sm:$0x20] %v2002_v55 }
 0x389   : > { %5627 = vst [vmem:[%s6421_s24 + $0x1e] ss:$32 sm:$0x40] %v2002_v55  ;;  %5628 = vst [vmem:[%s6421_s24 + $0x1e] ss:$32 sm:$0x80] %v2002_v55 }
 0x38a   : > { %5573 = vst [vmem:[%s6421_s24 + $0x1d] ss:$32 sm:$0x1] %v1903_v56  ;;  %5574 = vst [vmem:[%s6421_s24 + $0x1d] ss:$32 sm:$0x2] %v1903_v56 }
 0x38b   : > { %5575 = vst [vmem:[%s6421_s24 + $0x1d] ss:$32 sm:$0x4] %v1903_v56  ;;  %5576 = vst [vmem:[%s6421_s24 + $0x1d] ss:$32 sm:$0x8] %v1903_v56 }
 0x38c   : > { %5577 = vst [vmem:[%s6421_s24 + $0x1d] ss:$32 sm:$0x10] %v1903_v56  ;;  %5578 = vst [vmem:[%s6421_s24 + $0x1d] ss:$32 sm:$0x20] %v1903_v56 }
 0x38d   : > { %5579 = vst [vmem:[%s6421_s24 + $0x1d] ss:$32 sm:$0x40] %v1903_v56  ;;  %5580 = vst [vmem:[%s6421_s24 + $0x1d] ss:$32 sm:$0x80] %v1903_v56 }
 0x38e   : > { %5669 = vst [vmem:[%s6421_s24 + $0x1f] ss:$32 sm:$0x1] %v2004_v57  ;;  %5670 = vst [vmem:[%s6421_s24 + $0x1f] ss:$32 sm:$0x2] %v2004_v57 }
 0x38f   : > { %5671 = vst [vmem:[%s6421_s24 + $0x1f] ss:$32 sm:$0x4] %v2004_v57  ;;  %5672 = vst [vmem:[%s6421_s24 + $0x1f] ss:$32 sm:$0x8] %v2004_v57 }
 0x390   : > { %5673 = vst [vmem:[%s6421_s24 + $0x1f] ss:$32 sm:$0x10] %v2004_v57  ;;  %5674 = vst [vmem:[%s6421_s24 + $0x1f] ss:$32 sm:$0x20] %v2004_v57 }
 0x391   : > { %5675 = vst [vmem:[%s6421_s24 + $0x1f] ss:$32 sm:$0x40] %v2004_v57  ;;  %5676 = vst [vmem:[%s6421_s24 + $0x1f] ss:$32 sm:$0x80] %v2004_v57 }
 0x392   : > { %5533 = vst [vmem:[%s6421_s24 + $0x11c] ss:$32 sm:$0x1] %v1907_v58  ;;  %5534 = vst [vmem:[%s6421_s24 + $0x11c] ss:$32 sm:$0x2] %v1907_v58 }
 0x393   : > { %5535 = vst [vmem:[%s6421_s24 + $0x11c] ss:$32 sm:$0x4] %v1907_v58  ;;  %5536 = vst [vmem:[%s6421_s24 + $0x11c] ss:$32 sm:$0x8] %v1907_v58 }
 0x394   : > { %5537 = vst [vmem:[%s6421_s24 + $0x11c] ss:$32 sm:$0x10] %v1907_v58  ;;  %5538 = vst [vmem:[%s6421_s24 + $0x11c] ss:$32 sm:$0x20] %v1907_v58 }
 0x395   : > { %5539 = vst [vmem:[%s6421_s24 + $0x11c] ss:$32 sm:$0x40] %v1907_v58  ;;  %5540 = vst [vmem:[%s6421_s24 + $0x11c] ss:$32 sm:$0x80] %v1907_v58 }
 0x396   : > { %5629 = vst [vmem:[%s6421_s24 + $0x11e] ss:$32 sm:$0x1] %v2008_v59  ;;  %5630 = vst [vmem:[%s6421_s24 + $0x11e] ss:$32 sm:$0x2] %v2008_v59 }
 0x397   : > { %5631 = vst [vmem:[%s6421_s24 + $0x11e] ss:$32 sm:$0x4] %v2008_v59  ;;  %5632 = vst [vmem:[%s6421_s24 + $0x11e] ss:$32 sm:$0x8] %v2008_v59 }
 0x398   : > { %5633 = vst [vmem:[%s6421_s24 + $0x11e] ss:$32 sm:$0x10] %v2008_v59  ;;  %5634 = vst [vmem:[%s6421_s24 + $0x11e] ss:$32 sm:$0x20] %v2008_v59 }
 0x399   : > { %5635 = vst [vmem:[%s6421_s24 + $0x11e] ss:$32 sm:$0x40] %v2008_v59  ;;  %5636 = vst [vmem:[%s6421_s24 + $0x11e] ss:$32 sm:$0x80] %v2008_v59 }
 0x39a   : > { %5581 = vst [vmem:[%s6421_s24 + $0x11d] ss:$32 sm:$0x1] %v1909_v60  ;;  %5582 = vst [vmem:[%s6421_s24 + $0x11d] ss:$32 sm:$0x2] %v1909_v60 }
 0x39b   : > { %5583 = vst [vmem:[%s6421_s24 + $0x11d] ss:$32 sm:$0x4] %v1909_v60  ;;  %5584 = vst [vmem:[%s6421_s24 + $0x11d] ss:$32 sm:$0x8] %v1909_v60 }
 0x39c   : > { %5585 = vst [vmem:[%s6421_s24 + $0x11d] ss:$32 sm:$0x10] %v1909_v60  ;;  %5586 = vst [vmem:[%s6421_s24 + $0x11d] ss:$32 sm:$0x20] %v1909_v60 }
 0x39d   : > { %5587 = vst [vmem:[%s6421_s24 + $0x11d] ss:$32 sm:$0x40] %v1909_v60  ;;  %5588 = vst [vmem:[%s6421_s24 + $0x11d] ss:$32 sm:$0x80] %v1909_v60 }
 0x39e   : > { %5677 = vst [vmem:[%s6421_s24 + $0x11f] ss:$32 sm:$0x1] %v2010_v61  ;;  %5678 = vst [vmem:[%s6421_s24 + $0x11f] ss:$32 sm:$0x2] %v2010_v61 }
 0x39f   : > { %5679 = vst [vmem:[%s6421_s24 + $0x11f] ss:$32 sm:$0x4] %v2010_v61  ;;  %5680 = vst [vmem:[%s6421_s24 + $0x11f] ss:$32 sm:$0x8] %v2010_v61 }
 0x3a0   : > { %5681 = vst [vmem:[%s6421_s24 + $0x11f] ss:$32 sm:$0x10] %v2010_v61  ;;  %5682 = vst [vmem:[%s6421_s24 + $0x11f] ss:$32 sm:$0x20] %v2010_v61 }
 0x3a1   : > { %5683 = vst [vmem:[%s6421_s24 + $0x11f] ss:$32 sm:$0x40] %v2010_v61  ;;  %5684 = vst [vmem:[%s6421_s24 + $0x11f] ss:$32 sm:$0x80] %v2010_v61 }
 0x3a2   : > { %5541 = vst [vmem:[%s6421_s24 + $0x21c] ss:$32 sm:$0x1] %v1913_v62  ;;  %5542 = vst [vmem:[%s6421_s24 + $0x21c] ss:$32 sm:$0x2] %v1913_v62 }
 0x3a3   : > { %5543 = vst [vmem:[%s6421_s24 + $0x21c] ss:$32 sm:$0x4] %v1913_v62  ;;  %5544 = vst [vmem:[%s6421_s24 + $0x21c] ss:$32 sm:$0x8] %v1913_v62 }
 0x3a4   : > { %5545 = vst [vmem:[%s6421_s24 + $0x21c] ss:$32 sm:$0x10] %v1913_v62  ;;  %5546 = vst [vmem:[%s6421_s24 + $0x21c] ss:$32 sm:$0x20] %v1913_v62 }
 0x3a5   : > { %5547 = vst [vmem:[%s6421_s24 + $0x21c] ss:$32 sm:$0x40] %v1913_v62  ;;  %5548 = vst [vmem:[%s6421_s24 + $0x21c] ss:$32 sm:$0x80] %v1913_v62 }
 0x3a6   : > { %5637 = vst [vmem:[%s6421_s24 + $0x21e] ss:$32 sm:$0x1] %v2014_v63  ;;  %5638 = vst [vmem:[%s6421_s24 + $0x21e] ss:$32 sm:$0x2] %v2014_v63 }
 0x3a7   : > { %5639 = vst [vmem:[%s6421_s24 + $0x21e] ss:$32 sm:$0x4] %v2014_v63  ;;  %5640 = vst [vmem:[%s6421_s24 + $0x21e] ss:$32 sm:$0x8] %v2014_v63 }
 0x3a8   : > { %5641 = vst [vmem:[%s6421_s24 + $0x21e] ss:$32 sm:$0x10] %v2014_v63  ;;  %5642 = vst [vmem:[%s6421_s24 + $0x21e] ss:$32 sm:$0x20] %v2014_v63 }
 0x3a9   : > { %5643 = vst [vmem:[%s6421_s24 + $0x21e] ss:$32 sm:$0x40] %v2014_v63  ;;  %5644 = vst [vmem:[%s6421_s24 + $0x21e] ss:$32 sm:$0x80] %v2014_v63 }
 0x3aa   : > { %5589 = vst [vmem:[%s6421_s24 + $0x21d] ss:$32 sm:$0x1] %v1915_v1  ;;  %5590 = vst [vmem:[%s6421_s24 + $0x21d] ss:$32 sm:$0x2] %v1915_v1 }
 0x3ab   : > { %5591 = vst [vmem:[%s6421_s24 + $0x21d] ss:$32 sm:$0x4] %v1915_v1  ;;  %5592 = vst [vmem:[%s6421_s24 + $0x21d] ss:$32 sm:$0x8] %v1915_v1 }
 0x3ac   : > { %5593 = vst [vmem:[%s6421_s24 + $0x21d] ss:$32 sm:$0x10] %v1915_v1  ;;  %5594 = vst [vmem:[%s6421_s24 + $0x21d] ss:$32 sm:$0x20] %v1915_v1 }
 0x3ad   : > { %5595 = vst [vmem:[%s6421_s24 + $0x21d] ss:$32 sm:$0x40] %v1915_v1  ;;  %5596 = vst [vmem:[%s6421_s24 + $0x21d] ss:$32 sm:$0x80] %v1915_v1 }
 0x3ae   : > { %5685 = vst [vmem:[%s6421_s24 + $0x21f] ss:$32 sm:$0x1] %v2016_v2  ;;  %5686 = vst [vmem:[%s6421_s24 + $0x21f] ss:$32 sm:$0x2] %v2016_v2 }
 0x3af   : > { %5687 = vst [vmem:[%s6421_s24 + $0x21f] ss:$32 sm:$0x4] %v2016_v2  ;;  %5688 = vst [vmem:[%s6421_s24 + $0x21f] ss:$32 sm:$0x8] %v2016_v2 }
 0x3b0   : > { %5689 = vst [vmem:[%s6421_s24 + $0x21f] ss:$32 sm:$0x10] %v2016_v2  ;;  %5690 = vst [vmem:[%s6421_s24 + $0x21f] ss:$32 sm:$0x20] %v2016_v2 }
 0x3b1   : > { %5691 = vst [vmem:[%s6421_s24 + $0x21f] ss:$32 sm:$0x40] %v2016_v2  ;;  %5692 = vst [vmem:[%s6421_s24 + $0x21f] ss:$32 sm:$0x80] %v2016_v2 }
 0x3b2   : > { %5549 = vst [vmem:[%s6421_s24 + $0x31c] ss:$32 sm:$0x1] %v1919_v3  ;;  %5550 = vst [vmem:[%s6421_s24 + $0x31c] ss:$32 sm:$0x2] %v1919_v3 }
 0x3b3   : > { %5551 = vst [vmem:[%s6421_s24 + $0x31c] ss:$32 sm:$0x4] %v1919_v3  ;;  %5552 = vst [vmem:[%s6421_s24 + $0x31c] ss:$32 sm:$0x8] %v1919_v3 }
 0x3b4   : > { %5553 = vst [vmem:[%s6421_s24 + $0x31c] ss:$32 sm:$0x10] %v1919_v3  ;;  %5554 = vst [vmem:[%s6421_s24 + $0x31c] ss:$32 sm:$0x20] %v1919_v3 }
 0x3b5   : > { %5555 = vst [vmem:[%s6421_s24 + $0x31c] ss:$32 sm:$0x40] %v1919_v3  ;;  %5556 = vst [vmem:[%s6421_s24 + $0x31c] ss:$32 sm:$0x80] %v1919_v3 }
 0x3b6   : > { %5645 = vst [vmem:[%s6421_s24 + $0x31e] ss:$32 sm:$0x1] %v2020_v4  ;;  %5646 = vst [vmem:[%s6421_s24 + $0x31e] ss:$32 sm:$0x2] %v2020_v4 }
 0x3b7   : > { %5647 = vst [vmem:[%s6421_s24 + $0x31e] ss:$32 sm:$0x4] %v2020_v4  ;;  %5648 = vst [vmem:[%s6421_s24 + $0x31e] ss:$32 sm:$0x8] %v2020_v4 }
 0x3b8   : > { %5649 = vst [vmem:[%s6421_s24 + $0x31e] ss:$32 sm:$0x10] %v2020_v4  ;;  %5650 = vst [vmem:[%s6421_s24 + $0x31e] ss:$32 sm:$0x20] %v2020_v4 }
 0x3b9   : > { %5651 = vst [vmem:[%s6421_s24 + $0x31e] ss:$32 sm:$0x40] %v2020_v4  ;;  %5652 = vst [vmem:[%s6421_s24 + $0x31e] ss:$32 sm:$0x80] %v2020_v4 }
 0x3ba   : > { %5597 = vst [vmem:[%s6421_s24 + $0x31d] ss:$32 sm:$0x1] %v1921_v5  ;;  %5598 = vst [vmem:[%s6421_s24 + $0x31d] ss:$32 sm:$0x2] %v1921_v5 }
 0x3bb   : > { %5599 = vst [vmem:[%s6421_s24 + $0x31d] ss:$32 sm:$0x4] %v1921_v5  ;;  %5600 = vst [vmem:[%s6421_s24 + $0x31d] ss:$32 sm:$0x8] %v1921_v5 }
 0x3bc   : > { %5601 = vst [vmem:[%s6421_s24 + $0x31d] ss:$32 sm:$0x10] %v1921_v5  ;;  %5602 = vst [vmem:[%s6421_s24 + $0x31d] ss:$32 sm:$0x20] %v1921_v5 }
 0x3bd   : > { %5603 = vst [vmem:[%s6421_s24 + $0x31d] ss:$32 sm:$0x40] %v1921_v5  ;;  %5604 = vst [vmem:[%s6421_s24 + $0x31d] ss:$32 sm:$0x80] %v1921_v5 }
 0x3be   : > { %5693 = vst [vmem:[%s6421_s24 + $0x31f] ss:$32 sm:$0x1] %v2022_v6  ;;  %5694 = vst [vmem:[%s6421_s24 + $0x31f] ss:$32 sm:$0x2] %v2022_v6 }
 0x3bf   : > { %5695 = vst [vmem:[%s6421_s24 + $0x31f] ss:$32 sm:$0x4] %v2022_v6  ;;  %5696 = vst [vmem:[%s6421_s24 + $0x31f] ss:$32 sm:$0x8] %v2022_v6 }
 0x3c0   : > { %5697 = vst [vmem:[%s6421_s24 + $0x31f] ss:$32 sm:$0x10] %v2022_v6  ;;  %5698 = vst [vmem:[%s6421_s24 + $0x31f] ss:$32 sm:$0x20] %v2022_v6 }
 0x3c1   : > { %5699 = vst [vmem:[%s6421_s24 + $0x31f] ss:$32 sm:$0x40] %v2022_v6  ;;  %5700 = vst [vmem:[%s6421_s24 + $0x31f] ss:$32 sm:$0x80] %v2022_v6 }
 0x3c2   : > { %5557 = vst [vmem:[%s6421_s24 + $0x41c] ss:$32 sm:$0x1] %v1925_v7  ;;  %5558 = vst [vmem:[%s6421_s24 + $0x41c] ss:$32 sm:$0x2] %v1925_v7 }
 0x3c3   : > { %5559 = vst [vmem:[%s6421_s24 + $0x41c] ss:$32 sm:$0x4] %v1925_v7  ;;  %5560 = vst [vmem:[%s6421_s24 + $0x41c] ss:$32 sm:$0x8] %v1925_v7 }
 0x3c4   : > { %5561 = vst [vmem:[%s6421_s24 + $0x41c] ss:$32 sm:$0x10] %v1925_v7  ;;  %5562 = vst [vmem:[%s6421_s24 + $0x41c] ss:$32 sm:$0x20] %v1925_v7 }
 0x3c5   : > { %5563 = vst [vmem:[%s6421_s24 + $0x41c] ss:$32 sm:$0x40] %v1925_v7  ;;  %5564 = vst [vmem:[%s6421_s24 + $0x41c] ss:$32 sm:$0x80] %v1925_v7 }
 0x3c6   : > { %5653 = vst [vmem:[%s6421_s24 + $0x41e] ss:$32 sm:$0x1] %v2026_v8  ;;  %5654 = vst [vmem:[%s6421_s24 + $0x41e] ss:$32 sm:$0x2] %v2026_v8 }
 0x3c7   : > { %5655 = vst [vmem:[%s6421_s24 + $0x41e] ss:$32 sm:$0x4] %v2026_v8  ;;  %5656 = vst [vmem:[%s6421_s24 + $0x41e] ss:$32 sm:$0x8] %v2026_v8 }
 0x3c8   : > { %5657 = vst [vmem:[%s6421_s24 + $0x41e] ss:$32 sm:$0x10] %v2026_v8  ;;  %5658 = vst [vmem:[%s6421_s24 + $0x41e] ss:$32 sm:$0x20] %v2026_v8 }
 0x3c9   : > { %5659 = vst [vmem:[%s6421_s24 + $0x41e] ss:$32 sm:$0x40] %v2026_v8  ;;  %5660 = vst [vmem:[%s6421_s24 + $0x41e] ss:$32 sm:$0x80] %v2026_v8 }
 0x3ca   : > { %5605 = vst [vmem:[%s6421_s24 + $0x41d] ss:$32 sm:$0x1] %v1927_v9  ;;  %5606 = vst [vmem:[%s6421_s24 + $0x41d] ss:$32 sm:$0x2] %v1927_v9 }
 0x3cb   : > { %5607 = vst [vmem:[%s6421_s24 + $0x41d] ss:$32 sm:$0x4] %v1927_v9  ;;  %5608 = vst [vmem:[%s6421_s24 + $0x41d] ss:$32 sm:$0x8] %v1927_v9 }
 0x3cc   : > { %5609 = vst [vmem:[%s6421_s24 + $0x41d] ss:$32 sm:$0x10] %v1927_v9  ;;  %5610 = vst [vmem:[%s6421_s24 + $0x41d] ss:$32 sm:$0x20] %v1927_v9 }
 0x3cd   : > { %5611 = vst [vmem:[%s6421_s24 + $0x41d] ss:$32 sm:$0x40] %v1927_v9  ;;  %5612 = vst [vmem:[%s6421_s24 + $0x41d] ss:$32 sm:$0x80] %v1927_v9 }
 0x3ce   : > { %5701 = vst [vmem:[%s6421_s24 + $0x41f] ss:$32 sm:$0x1] %v2028_v10  ;;  %5702 = vst [vmem:[%s6421_s24 + $0x41f] ss:$32 sm:$0x2] %v2028_v10 }
 0x3cf   : > { %5703 = vst [vmem:[%s6421_s24 + $0x41f] ss:$32 sm:$0x4] %v2028_v10  ;;  %5704 = vst [vmem:[%s6421_s24 + $0x41f] ss:$32 sm:$0x8] %v2028_v10 }
 0x3d0   : > { %5705 = vst [vmem:[%s6421_s24 + $0x41f] ss:$32 sm:$0x10] %v2028_v10  ;;  %5706 = vst [vmem:[%s6421_s24 + $0x41f] ss:$32 sm:$0x20] %v2028_v10 }
 0x3d1   : > { %5707 = vst [vmem:[%s6421_s24 + $0x41f] ss:$32 sm:$0x40] %v2028_v10  ;;  %5708 = vst [vmem:[%s6421_s24 + $0x41f] ss:$32 sm:$0x80] %v2028_v10 }
 0x3d2   : > { %5565 = vst [vmem:[%s6421_s24 + $0x51c] ss:$32 sm:$0x1] %v1931_v11  ;;  %5566 = vst [vmem:[%s6421_s24 + $0x51c] ss:$32 sm:$0x2] %v1931_v11 }
 0x3d3   : > { %5567 = vst [vmem:[%s6421_s24 + $0x51c] ss:$32 sm:$0x4] %v1931_v11  ;;  %5568 = vst [vmem:[%s6421_s24 + $0x51c] ss:$32 sm:$0x8] %v1931_v11 }
 0x3d4   : > { %5569 = vst [vmem:[%s6421_s24 + $0x51c] ss:$32 sm:$0x10] %v1931_v11  ;;  %5570 = vst [vmem:[%s6421_s24 + $0x51c] ss:$32 sm:$0x20] %v1931_v11 }
 0x3d5   : > { %5571 = vst [vmem:[%s6421_s24 + $0x51c] ss:$32 sm:$0x40] %v1931_v11  ;;  %5572 = vst [vmem:[%s6421_s24 + $0x51c] ss:$32 sm:$0x80] %v1931_v11 }
 0x3d6   : > { %5661 = vst [vmem:[%s6421_s24 + $0x51e] ss:$32 sm:$0x1] %v2032_v12  ;;  %5662 = vst [vmem:[%s6421_s24 + $0x51e] ss:$32 sm:$0x2] %v2032_v12 }
 0x3d7   : > { %5663 = vst [vmem:[%s6421_s24 + $0x51e] ss:$32 sm:$0x4] %v2032_v12  ;;  %5664 = vst [vmem:[%s6421_s24 + $0x51e] ss:$32 sm:$0x8] %v2032_v12 }
 0x3d8   : > { %5665 = vst [vmem:[%s6421_s24 + $0x51e] ss:$32 sm:$0x10] %v2032_v12  ;;  %5666 = vst [vmem:[%s6421_s24 + $0x51e] ss:$32 sm:$0x20] %v2032_v12 }
 0x3d9   : > { %5667 = vst [vmem:[%s6421_s24 + $0x51e] ss:$32 sm:$0x40] %v2032_v12  ;;  %5668 = vst [vmem:[%s6421_s24 + $0x51e] ss:$32 sm:$0x80] %v2032_v12 }
 0x3da   : > { %5613 = vst [vmem:[%s6421_s24 + $0x51d] ss:$32 sm:$0x1] %v1933_v13  ;;  %5614 = vst [vmem:[%s6421_s24 + $0x51d] ss:$32 sm:$0x2] %v1933_v13 }
 0x3db   : > { %5615 = vst [vmem:[%s6421_s24 + $0x51d] ss:$32 sm:$0x4] %v1933_v13  ;;  %5616 = vst [vmem:[%s6421_s24 + $0x51d] ss:$32 sm:$0x8] %v1933_v13 }
 0x3dc   : > { %5617 = vst [vmem:[%s6421_s24 + $0x51d] ss:$32 sm:$0x10] %v1933_v13  ;;  %5618 = vst [vmem:[%s6421_s24 + $0x51d] ss:$32 sm:$0x20] %v1933_v13 }
 0x3dd   : > { %5619 = vst [vmem:[%s6421_s24 + $0x51d] ss:$32 sm:$0x40] %v1933_v13  ;;  %5620 = vst [vmem:[%s6421_s24 + $0x51d] ss:$32 sm:$0x80] %v1933_v13 }
 0x3de   : > { %5709 = vst [vmem:[%s6421_s24 + $0x51f] ss:$32 sm:$0x1] %v2034_v14  ;;  %5710 = vst [vmem:[%s6421_s24 + $0x51f] ss:$32 sm:$0x2] %v2034_v14 }
 0x3df   : > { %5711 = vst [vmem:[%s6421_s24 + $0x51f] ss:$32 sm:$0x4] %v2034_v14  ;;  %5712 = vst [vmem:[%s6421_s24 + $0x51f] ss:$32 sm:$0x8] %v2034_v14 }
 0x3e0   : > { %5713 = vst [vmem:[%s6421_s24 + $0x51f] ss:$32 sm:$0x10] %v2034_v14  ;;  %5714 = vst [vmem:[%s6421_s24 + $0x51f] ss:$32 sm:$0x20] %v2034_v14 }
 0x3e1   : > { %5715 = vst [vmem:[%s6421_s24 + $0x51f] ss:$32 sm:$0x40] %v2034_v14  ;;  %5716 = vst [vmem:[%s6421_s24 + $0x51f] ss:$32 sm:$0x80] %v2034_v14 }
 0x3e2   : > { %5794 = shalt.err (!%p5791_p5)
}
 0x3e3   : > { %s5795_s6 = scalar_lea.hbm %s7934_s29, 24576  ;;  %s5799_s15 = scalar_lea.hbm %s8019_s2, 49152 }
 0x3e4   : > { %p5796_p6 = scmp.ne.s32.totalorder %s7934_s29, %s5795_s6  ;;  %p5800_p10 = scmp.lt.s32.totalorder %s7934_s29, %s8019_s2 }
 0x3e5   : > { %p5801_p11 = scmp.lt.s32.totalorder %s5799_s15, %s5795_s6 }
 0x3e6   : > { %p5797_p7 = pnand %p5796_p6, %p5918_p4 }
 0x3e7   : > { %p5802_p12 = por %p5801_p11, %p5800_p10 }
 0x3e8   : > { %p5798_p9 = pneg %p5797_p7 }
 0x3ea   : > { %p5803_p13 = pnand %p5802_p12, %p5798_p9 }
 0x3ec   : > { %5806 = shalt.err (!%p5803_p13)
}
 0x3ed   : > { %s5861_s20 = smov 128   ;;  %s5862_s23 = smov 8  }
 0x3ee   : > { %5723 = dma.vmem_to_hbm [thread:$0]  (%p5918_p4), %s7936_s26, 24576, %s7934_s29, %s7972_s12, %s5861_s20, %s5861_s20, %s5862_s23  }
 0x3ef PF: > { %p5729_p0 = scmp.ge.s32.totalorder %s5857_s14, 2  ;;  %s3987_s24 = sand.u32 1, %s5837_s9  }
 0x3f0   : > { %s3988_s25 = scalar_lea.sflag [#allocation3], %s3987_s24 }
 0x3f1   : > { %p5726_p1 = pnand %p5729_p0, %p5925_p8 }
 0x3f3   : > { %p5727_p2 = pneg %p5726_p1 }
 0x3f5   : > { %5832 = dma.done.wait (%p5727_p2), %s3988_s25, 24576  }
 0x3f6   : > { %5834 = vsyncadd (%p5727_p2), %s3988_s25, 4294942720  ;;  %s15_s14 = sadd.s32 1, %s5857_s14   ;;  %s8022_s9 = smov %s5841_s10 }
 0x3f7   : > { %p12_p3 = scmp.ge.s32.totalorder %s15_s14, 4   ;;  %s8023_s10 = smov %s5845_s11 }
 0x3f8   : > { %s8024_s11 = smov %s5931_s22  ;;  %s8025_s12 = smov %s5853_s13 }
 0x3f9   : > { %s8026_s13 = smov %s8028_s17  ;;  %14 = sbr.rel (!%p12_p3) target bundleno = 4 (0x4), region = 254 }
 0x3fe   :  { %3993 = vsyncpa [#allocation3], 1 }
 0x3ff   :  { %3995 = vsyncpa [#allocation3 + $0x1], 1 }

</bundles_post_ra>
